<compile_context>
chip_gen: v5e
topology: v5e:2x2
jax: 0.10.0
libtpu: 0.0.40
codegen_flags: <defaults>
</compile_context>

<pallas_src>
import functools

import jax
import jax.numpy as jnp
from jax.experimental import pallas as pl
from jax.experimental.pallas import tpu as pltpu

EPS = 1e-5
LANE = 128


def _round_up(v, m):
    return ((v + m - 1) // m) * m


def _bottleneck_kernel(x_ref, w1_ref, b1_ref, w2_ref, b2_ref, w3_ref, ws_ref,
                       bo_ref, o_ref, pad_ref, *, H, W):
    B_t, HW, Cin = x_ref.shape
    Cin_p, Cp = w1_ref.shape
    Wpad = pad_ref.shape[1]
    dt = pad_ref.dtype

    # Zero only the halo ring. The (H, W) interior is fully overwritten for
    # every image below, so this is all the zero-fill the conv needs, and it
    # stays megacore-safe (scratch is per-core; each grid step is self-contained).
    zrow = jnp.zeros((Wpad, Cp), dt)
    pad_ref[0] = zrow                                           # top halo row
    pad_ref[H + 1] = zrow                                       # bottom halo row
    pad_ref[1:H + 1, 0:1, :] = jnp.zeros((H, 1, Cp), dt)        # left halo col
    pad_ref[1:H + 1, W + 1:Wpad, :] = jnp.zeros((H, Wpad - (W + 1), Cp), dt)

    for b in range(B_t):                        # static unroll; B_t is small
        # Unpadded input block -> bf16, lane-pad channels to Cin_p once.
        xb = x_ref[b].astype(jnp.bfloat16)                      # (HW, Cin)
        if Cin_p > Cin:
            xb = jnp.concatenate(
                [xb, jnp.zeros((HW, Cin_p - Cin), jnp.bfloat16)], axis=1)

        # --- 1x1 conv #1 (BN scale pre-folded into w1) + bias + ReLU --------
        t1 = jnp.dot(xb, w1_ref[...], preferred_element_type=jnp.float32)
        t1 = jnp.maximum(t1 + b1_ref[...], 0.0)                 # (HW, Cp) f32

        # --- 3x3 conv (stride=1, pad=1): 9 accumulating matmuls -------------
        # bf16 halo scratch; one window live at a time, no im2col buffer.
        pad_ref[1:H + 1, 1:W + 1, :] = t1.astype(dt).reshape(H, W, Cp)
        acc = None
        for kh in range(3):                     # static 9-tap unroll
            for kw in range(3):
                win = pad_ref[kh:kh + H, kw:kw + W, :].reshape(HW, Cp)
                tap = kh * 3 + kw
                d = jnp.dot(win, w2_ref[tap * Cp:(tap + 1) * Cp, :],
                            preferred_element_type=jnp.float32)
                acc = d if acc is None else acc + d
        t2 = jnp.maximum(acc + b2_ref[...], 0.0)                # (HW, Cp) f32

        # --- 1x1 conv #3 + 1x1 projection shortcut (split matmuls) ----------
        y = jnp.dot(t2.astype(jnp.bfloat16), w3_ref[...],
                    preferred_element_type=jnp.float32)
        y = y + jnp.dot(xb, ws_ref[...], preferred_element_type=jnp.float32)
        o_ref[b] = jnp.maximum(y + bo_ref[...], 0.0)            # (HW, Ce) f32


def residual_bottleneck_block(x_nchw, params, *, stride=1, images_per_step=1):
    """x_nchw: (N, Cin, H, W) float32. Returns (N, Ce, H, W) float32."""
    N, Cin, H, W = x_nchw.shape
    (w1, s1, b1, w2, s2, b2, w3, s3, b3, ws, ss, bs) = params
    C = w1.shape[1]
    Ce = w3.shape[1]
    HW = H * W

    if stride != 1:
        # TODO(synk): spatial downsampling (stride != 1) not implemented.
        raise NotImplementedError("stride != 1 is not implemented")
    if Cin == Ce:
        # TODO(synk): identity-shortcut variant not implemented.
        raise NotImplementedError(
            "identity shortcut (in_c == out_c*expansion, stride 1) not implemented")
    if N % images_per_step != 0:
        raise ValueError("images_per_step must divide the batch size")

    Cin_p = _round_up(Cin, LANE)
    Cp = _round_up(C, LANE)
    Wpad = _round_up(W + 2, 8)

    # NCHW -> (N, H*W, Cin) channels-last. No lane padding / no cast here: the
    # kernel pads+casts after the auto-DMA, so HBM holds only the real data.
    x = jnp.transpose(x_nchw, (0, 2, 3, 1)).reshape(N, HW, Cin)

    # One-time wrapper-side folding of BN scales into the conv weights.
    w1f = w1 * s1                               # (Cin, C)
    w2f = w2 * s2.reshape(1, 1, 1, C)           # (3, 3, C, C) HWIO
    w3f = w3 * s3                               # (C, Ce)
    wsf = ws * ss                               # (Cin, Ce)

    # Lane-pad the contraction dims; weights bf16, biases f32.
    w1p = jnp.zeros((Cin_p, Cp), jnp.float32).at[:Cin, :C].set(w1f)
    w1p = w1p.astype(jnp.bfloat16)
    b1p = jnp.zeros((1, Cp), jnp.float32).at[:, :C].set(b1)

    w2p = jnp.zeros((3, 3, Cp, Cp), jnp.float32).at[:, :, :C, :C].set(w2f)
    w2p = w2p.reshape(9 * Cp, Cp).astype(jnp.bfloat16)          # per-tap row blocks
    b2p = jnp.zeros((1, Cp), jnp.float32).at[:, :C].set(b2)

    # Output channels stay unpadded (Ce is the block's full last dim).
    w3p = jnp.zeros((Cp, Ce), jnp.float32).at[:C, :].set(w3f).astype(jnp.bfloat16)
    wsp = jnp.zeros((Cin_p, Ce), jnp.float32).at[:Cin, :].set(wsf).astype(jnp.bfloat16)
    bop = (b3 + bs).reshape(1, Ce).astype(jnp.float32)          # combined bias

    def _const_spec(arr):
        zeros = (0,) * arr.ndim
        return pl.BlockSpec(arr.shape, lambda n, _z=zeros: _z)

    B_t = images_per_step
    kernel = functools.partial(_bottleneck_kernel, H=H, W=W)

    out = pl.pallas_call(
        kernel,
        out_shape=jax.ShapeDtypeStruct((N, HW, Ce), jnp.float32),
        grid=(N // B_t,),
        in_specs=[
            pl.BlockSpec((B_t, HW, Cin), lambda n: (n, 0, 0)),
            _const_spec(w1p), _const_spec(b1p),
            _const_spec(w2p), _const_spec(b2p),
            _const_spec(w3p), _const_spec(wsp), _const_spec(bop),
        ],
        out_specs=pl.BlockSpec((B_t, HW, Ce), lambda n: (n, 0, 0)),
        scratch_shapes=[pltpu.VMEM((H + 2, Wpad, Cp), jnp.bfloat16)],
        compiler_params=pltpu.CompilerParams(
            dimension_semantics=("parallel",),
            # TODO(synk): derive per generation (v7x VMEM is 64 MiB) once
            # H-tiling for real ResNet spatial sizes lands.
            vmem_limit_bytes=32 * 1024 * 1024),
    )(x, w1p, b1p, w2p, b2p, w3p, wsp, bop)

    out = out.reshape(N, H, W, Ce)
    return jnp.transpose(out, (0, 3, 1, 2))                     # back to NCHW


def init_params(key, in_c, out_c):
    """Deterministic synthetic parameters matching the module's __init__ shapes."""
    # NOTE: the PyTorch module reads ResidualBasicBlock.expansion (=1) inside
    # ResidualBottleneckBlock.__init__, NOT its own class attribute (4).
    expansion = 1
    ce = out_c * expansion
    keys = jax.random.split(key, 9)

    def bn_fold(k, c):
        k1, k2, k3, k4 = jax.random.split(k, 4)
        gamma = 1.0 + 0.1 * jax.random.normal(k1, (c,), jnp.float32)
        beta = 0.1 * jax.random.normal(k2, (c,), jnp.float32)
        mean = 0.1 * jax.random.normal(k3, (c,), jnp.float32)
        var = 1.0 + 0.1 * jnp.abs(jax.random.normal(k4, (c,), jnp.float32))
        scale = gamma / jnp.sqrt(var + EPS)
        bias = beta - mean * scale
        return scale, bias

    w1 = 0.1 * jax.random.normal(keys[0], (in_c, out_c), jnp.float32)
    s1, b1 = bn_fold(keys[1], out_c)
    w2 = 0.1 * jax.random.normal(keys[2], (3, 3, out_c, out_c), jnp.float32)
    s2, b2 = bn_fold(keys[3], out_c)
    w3 = 0.1 * jax.random.normal(keys[4], (out_c, ce), jnp.float32)
    s3, b3 = bn_fold(keys[5], ce)
    # Shortcut path: Conv2d(in_c, ce, 1) WITH bias, then BN -> fold conv bias.
    ws = 0.1 * jax.random.normal(keys[6], (in_c, ce), jnp.float32)
    wsb = 0.1 * jax.random.normal(keys[7], (ce,), jnp.float32)
    ss, bsf = bn_fold(keys[8], ce)
    bs = bsf + wsb * ss

    r = lambda v: v.reshape(1, -1)
    return (w1, r(s1), r(b1), w2, r(s2), r(b2),
            w3, r(s3), r(b3), ws, r(ss), r(bs))


def reference(x_nchw, params):
    """Pure-JAX f32 reference (same folded BN params) for a correctness check."""
    x = jnp.transpose(x_nchw, (0, 2, 3, 1))
    (w1, s1, b1, w2, s2, b2, w3, s3, b3, ws, ss, bs) = params
    conv1x1 = lambda a, w: jnp.einsum('nhwc,cd->nhwd', a, w)
    t1 = jax.nn.relu(conv1x1(x, w1) * s1 + b1)
    t2 = jax.lax.conv_general_dilated(
        t1, w2, window_strides=(1, 1), padding=((1, 1), (1, 1)),
        dimension_numbers=('NHWC', 'HWIO', 'NHWC'))
    t2 = jax.nn.relu(t2 * s2 + b2)
    t3 = conv1x1(t2, w3) * s3 + b3
    sh = conv1x1(x, ws) * ss + bs
    return jnp.transpose(jax.nn.relu(t3 + sh), (0, 3, 1, 2))


if __name__ == "__main__":
    key = jax.random.PRNGKey(0)
    kx, kp = jax.random.split(key)
    N, in_c, H, W = 2, 4, 16, 16
    out_c = 8                      # in_c != out_c*expansion -> projection shortcut active
    x = jax.random.normal(kx, (N, in_c, H, W), jnp.float32)
    params = init_params(kp, in_c, out_c)

    y = jax.block_until_ready(residual_bottleneck_block(x, params))
    y_ref = reference(x, params)
    assert y.shape == (N, out_c, H, W)
    max_err = float(jnp.max(jnp.abs(y - y_ref)))
    # bf16 MXU operands with f32 accumulation -> relaxed tolerance vs f32 ref.
    assert jnp.allclose(y, y_ref, atol=2e-2, rtol=2e-2), max_err
    print("KERNEL_OK")
</pallas_src>

<mosaic_0001>
module attributes {stable_mosaic.version = 11 : i64} {
  func.func @_bottleneck_kernel(%arg0: i32, %arg1: memref<1x256x4xf32, #tpu.memory_space<vmem>>, %arg2: memref<128x128xbf16, #tpu.memory_space<vmem>>, %arg3: memref<1x128xf32, #tpu.memory_space<vmem>>, %arg4: memref<1152x128xbf16, #tpu.memory_space<vmem>>, %arg5: memref<1x128xf32, #tpu.memory_space<vmem>>, %arg6: memref<128x8xbf16, #tpu.memory_space<vmem>>, %arg7: memref<128x8xbf16, #tpu.memory_space<vmem>>, %arg8: memref<1x8xf32, #tpu.memory_space<vmem>>, %arg9: memref<1x256x8xf32, #tpu.memory_space<vmem>>, %arg10: memref<18x24x128xbf16, #tpu.memory_space<vmem>>) attributes {dimension_semantics = [#tpu.dimension_semantics<parallel>], iteration_bounds = array<i64: 2>, scalar_prefetch = 0 : i64, scratch_operands = 1 : i64, tpu.core_type = #tpu.core_type<tc>, window_params = [{transform_indices = @transform_0, window_bounds = array<i64: 1, 256, 4>}, {pipeline_mode = #tpu.pipeline_mode<synchronous>, transform_indices = @transform_1, window_bounds = array<i64: 128, 128>}, {pipeline_mode = #tpu.pipeline_mode<synchronous>, transform_indices = @transform_2, window_bounds = array<i64: 1, 128>}, {pipeline_mode = #tpu.pipeline_mode<synchronous>, transform_indices = @transform_3, window_bounds = array<i64: 1152, 128>}, {pipeline_mode = #tpu.pipeline_mode<synchronous>, transform_indices = @transform_4, window_bounds = array<i64: 1, 128>}, {pipeline_mode = #tpu.pipeline_mode<synchronous>, transform_indices = @transform_5, window_bounds = array<i64: 128, 8>}, {pipeline_mode = #tpu.pipeline_mode<synchronous>, transform_indices = @transform_6, window_bounds = array<i64: 128, 8>}, {pipeline_mode = #tpu.pipeline_mode<synchronous>, transform_indices = @transform_7, window_bounds = array<i64: 1, 8>}, {transform_indices = @transform_8, window_bounds = array<i64: 1, 256, 8>}]} {
    %cst = arith.constant 0.000000e+00 : bf16
    %0 = vector.broadcast %cst : bf16 to vector<24x128xbf16>
    %c0 = arith.constant 0 : index
    %c0_0 = arith.constant 0 : index
    %c0_1 = arith.constant 0 : index
    %1 = vector.load %arg10[%c0, %c0_0, %c0_1] : memref<18x24x128xbf16, #tpu.memory_space<vmem>>, vector<1x24x128xbf16>
    %2 = vector.shape_cast %1 : vector<1x24x128xbf16> to vector<24x128xbf16>
    %3 = vector.shape_cast %0 : vector<24x128xbf16> to vector<1x24x128xbf16>
    tpu.vector_store %arg10[%c0, %c0_0, %c0_1], %3 {strides = array<i32>} : memref<18x24x128xbf16, #tpu.memory_space<vmem>>, vector<1x24x128xbf16>,
    %c17 = arith.constant 17 : index
    %c0_2 = arith.constant 0 : index
    %c0_3 = arith.constant 0 : index
    %4 = vector.load %arg10[%c17, %c0_2, %c0_3] : memref<18x24x128xbf16, #tpu.memory_space<vmem>>, vector<1x24x128xbf16>
    %5 = vector.shape_cast %4 : vector<1x24x128xbf16> to vector<24x128xbf16>
    %6 = vector.shape_cast %0 : vector<24x128xbf16> to vector<1x24x128xbf16>
    tpu.vector_store %arg10[%c17, %c0_2, %c0_3], %6 {strides = array<i32>} : memref<18x24x128xbf16, #tpu.memory_space<vmem>>, vector<1x24x128xbf16>,
    %cst_4 = arith.constant 0.000000e+00 : bf16
    %7 = vector.broadcast %cst_4 : bf16 to vector<16x1x128xbf16>
    %c1 = arith.constant 1 : index
    %c0_5 = arith.constant 0 : index
    %c0_6 = arith.constant 0 : index
    %8 = vector.load %arg10[%c1, %c0_5, %c0_6] : memref<18x24x128xbf16, #tpu.memory_space<vmem>>, vector<16x1x128xbf16>
    tpu.vector_store %arg10[%c1, %c0_5, %c0_6], %7 {strides = array<i32>} : memref<18x24x128xbf16, #tpu.memory_space<vmem>>, vector<16x1x128xbf16>,
    %cst_7 = arith.constant 0.000000e+00 : bf16
    %9 = vector.broadcast %cst_7 : bf16 to vector<16x7x128xbf16>
    %c1_8 = arith.constant 1 : index
    %c17_9 = arith.constant 17 : index
    %c0_10 = arith.constant 0 : index
    %10 = vector.load %arg10[%c1_8, %c17_9, %c0_10] : memref<18x24x128xbf16, #tpu.memory_space<vmem>>, vector<16x7x128xbf16>
    tpu.vector_store %arg10[%c1_8, %c17_9, %c0_10], %9 {strides = array<i32>} : memref<18x24x128xbf16, #tpu.memory_space<vmem>>, vector<16x7x128xbf16>,
    %c0_11 = arith.constant 0 : index
    %c0_12 = arith.constant 0 : index
    %c0_13 = arith.constant 0 : index
    %11 = vector.load %arg1[%c0_11, %c0_12, %c0_13] : memref<1x256x4xf32, #tpu.memory_space<vmem>>, vector<1x256x4xf32>
    %12 = vector.shape_cast %11 : vector<1x256x4xf32> to vector<256x4xf32>
    %13 = arith.truncf %12 : vector<256x4xf32> to vector<256x4xbf16>
    %cst_14 = arith.constant 0.000000e+00 : bf16
    %14 = vector.broadcast %cst_14 : bf16 to vector<256x124xbf16>
    %15 = tpu.concatenate %13, %14 in 1 : vector<256x4xbf16>, vector<256x124xbf16> -> vector<256x128xbf16>
    %c0_15 = arith.constant 0 : index
    %c0_16 = arith.constant 0 : index
    %16 = vector.load %arg2[%c0_15, %c0_16] : memref<128x128xbf16, #tpu.memory_space<vmem>>, vector<128x128xbf16>
    %cst_17 = arith.constant dense<0.000000e+00> : vector<256x128xf32>
    %17 = tpu.matmul %15, %16, %cst_17 {dimension_numbers = #tpu.dot_dimension_numbers<[1], [0], [0], [1], [0, 0, 1, 1], [], []>} : vector<256x128xbf16>, vector<128x128xbf16>, vector<256x128xf32> -> vector<256x128xf32>
    %c0_18 = arith.constant 0 : index
    %c0_19 = arith.constant 0 : index
    %18 = vector.load %arg3[%c0_18, %c0_19] : memref<1x128xf32, #tpu.memory_space<vmem>>, vector<1x128xf32>
    %19 = vector.broadcast %18 : vector<1x128xf32> to vector<256x128xf32>
    %20 = arith.addf %17, %19 : vector<256x128xf32>
    %cst_20 = arith.constant 0.000000e+00 : f32
    %21 = vector.broadcast %cst_20 : f32 to vector<256x128xf32>
    %22 = arith.maximumf %20, %21 : vector<256x128xf32>
    %23 = arith.truncf %22 : vector<256x128xf32> to vector<256x128xbf16>
    %24 = vector.shape_cast %23 : vector<256x128xbf16> to vector<16x16x128xbf16>
    %c1_21 = arith.constant 1 : index
    %c1_22 = arith.constant 1 : index
    %c0_23 = arith.constant 0 : index
    %25 = vector.load %arg10[%c1_21, %c1_22, %c0_23] : memref<18x24x128xbf16, #tpu.memory_space<vmem>>, vector<16x16x128xbf16>
    tpu.vector_store %arg10[%c1_21, %c1_22, %c0_23], %24 {strides = array<i32>} : memref<18x24x128xbf16, #tpu.memory_space<vmem>>, vector<16x16x128xbf16>,
    %c0_24 = arith.constant 0 : index
    %c0_25 = arith.constant 0 : index
    %c0_26 = arith.constant 0 : index
    %26 = vector.load %arg10[%c0_24, %c0_25, %c0_26] : memref<18x24x128xbf16, #tpu.memory_space<vmem>>, vector<16x16x128xbf16>
    %27 = vector.shape_cast %26 : vector<16x16x128xbf16> to vector<256x128xbf16>
    %c0_27 = arith.constant 0 : index
    %c0_28 = arith.constant 0 : index
    %28 = vector.load %arg4[%c0_27, %c0_28] : memref<1152x128xbf16, #tpu.memory_space<vmem>>, vector<128x128xbf16>
    %cst_29 = arith.constant dense<0.000000e+00> : vector<256x128xf32>
    %29 = tpu.matmul %27, %28, %cst_29 {dimension_numbers = #tpu.dot_dimension_numbers<[1], [0], [0], [1], [0, 0, 1, 1], [], []>} : vector<256x128xbf16>, vector<128x128xbf16>, vector<256x128xf32> -> vector<256x128xf32>
    %c0_30 = arith.constant 0 : index
    %c1_31 = arith.constant 1 : index
    %c0_32 = arith.constant 0 : index
    %30 = vector.load %arg10[%c0_30, %c1_31, %c0_32] : memref<18x24x128xbf16, #tpu.memory_space<vmem>>, vector<16x16x128xbf16>
    %31 = vector.shape_cast %30 : vector<16x16x128xbf16> to vector<256x128xbf16>
    %c128 = arith.constant 128 : index
    %c0_33 = arith.constant 0 : index
    %32 = vector.load %arg4[%c128, %c0_33] : memref<1152x128xbf16, #tpu.memory_space<vmem>>, vector<128x128xbf16>
    %cst_34 = arith.constant dense<0.000000e+00> : vector<256x128xf32>
    %33 = tpu.matmul %31, %32, %cst_34 {dimension_numbers = #tpu.dot_dimension_numbers<[1], [0], [0], [1], [0, 0, 1, 1], [], []>} : vector<256x128xbf16>, vector<128x128xbf16>, vector<256x128xf32> -> vector<256x128xf32>
    %34 = arith.addf %29, %33 : vector<256x128xf32>
    %c0_35 = arith.constant 0 : index
    %c2 = arith.constant 2 : index
    %c0_36 = arith.constant 0 : index
    %35 = vector.load %arg10[%c0_35, %c2, %c0_36] : memref<18x24x128xbf16, #tpu.memory_space<vmem>>, vector<16x16x128xbf16>
    %36 = vector.shape_cast %35 : vector<16x16x128xbf16> to vector<256x128xbf16>
    %c256 = arith.constant 256 : index
    %c0_37 = arith.constant 0 : index
    %37 = vector.load %arg4[%c256, %c0_37] : memref<1152x128xbf16, #tpu.memory_space<vmem>>, vector<128x128xbf16>
    %cst_38 = arith.constant dense<0.000000e+00> : vector<256x128xf32>
    %38 = tpu.matmul %36, %37, %cst_38 {dimension_numbers = #tpu.dot_dimension_numbers<[1], [0], [0], [1], [0, 0, 1, 1], [], []>} : vector<256x128xbf16>, vector<128x128xbf16>, vector<256x128xf32> -> vector<256x128xf32>
    %39 = arith.addf %34, %38 : vector<256x128xf32>
    %c1_39 = arith.constant 1 : index
    %c0_40 = arith.constant 0 : index
    %c0_41 = arith.constant 0 : index
    %40 = vector.load %arg10[%c1_39, %c0_40, %c0_41] : memref<18x24x128xbf16, #tpu.memory_space<vmem>>, vector<16x16x128xbf16>
    %41 = vector.shape_cast %40 : vector<16x16x128xbf16> to vector<256x128xbf16>
    %c384 = arith.constant 384 : index
    %c0_42 = arith.constant 0 : index
    %42 = vector.load %arg4[%c384, %c0_42] : memref<1152x128xbf16, #tpu.memory_space<vmem>>, vector<128x128xbf16>
    %cst_43 = arith.constant dense<0.000000e+00> : vector<256x128xf32>
    %43 = tpu.matmul %41, %42, %cst_43 {dimension_numbers = #tpu.dot_dimension_numbers<[1], [0], [0], [1], [0, 0, 1, 1], [], []>} : vector<256x128xbf16>, vector<128x128xbf16>, vector<256x128xf32> -> vector<256x128xf32>
    %44 = arith.addf %39, %43 : vector<256x128xf32>
    %c1_44 = arith.constant 1 : index
    %c1_45 = arith.constant 1 : index
    %c0_46 = arith.constant 0 : index
    %45 = vector.load %arg10[%c1_44, %c1_45, %c0_46] : memref<18x24x128xbf16, #tpu.memory_space<vmem>>, vector<16x16x128xbf16>
    %46 = vector.shape_cast %45 : vector<16x16x128xbf16> to vector<256x128xbf16>
    %c512 = arith.constant 512 : index
    %c0_47 = arith.constant 0 : index
    %47 = vector.load %arg4[%c512, %c0_47] : memref<1152x128xbf16, #tpu.memory_space<vmem>>, vector<128x128xbf16>
    %cst_48 = arith.constant dense<0.000000e+00> : vector<256x128xf32>
    %48 = tpu.matmul %46, %47, %cst_48 {dimension_numbers = #tpu.dot_dimension_numbers<[1], [0], [0], [1], [0, 0, 1, 1], [], []>} : vector<256x128xbf16>, vector<128x128xbf16>, vector<256x128xf32> -> vector<256x128xf32>
    %49 = arith.addf %44, %48 : vector<256x128xf32>
    %c1_49 = arith.constant 1 : index
    %c2_50 = arith.constant 2 : index
    %c0_51 = arith.constant 0 : index
    %50 = vector.load %arg10[%c1_49, %c2_50, %c0_51] : memref<18x24x128xbf16, #tpu.memory_space<vmem>>, vector<16x16x128xbf16>
    %51 = vector.shape_cast %50 : vector<16x16x128xbf16> to vector<256x128xbf16>
    %c640 = arith.constant 640 : index
    %c0_52 = arith.constant 0 : index
    %52 = vector.load %arg4[%c640, %c0_52] : memref<1152x128xbf16, #tpu.memory_space<vmem>>, vector<128x128xbf16>
    %cst_53 = arith.constant dense<0.000000e+00> : vector<256x128xf32>
    %53 = tpu.matmul %51, %52, %cst_53 {dimension_numbers = #tpu.dot_dimension_numbers<[1], [0], [0], [1], [0, 0, 1, 1], [], []>} : vector<256x128xbf16>, vector<128x128xbf16>, vector<256x128xf32> -> vector<256x128xf32>
    %54 = arith.addf %49, %53 : vector<256x128xf32>
    %c2_54 = arith.constant 2 : index
    %c0_55 = arith.constant 0 : index
    %c0_56 = arith.constant 0 : index
    %55 = vector.load %arg10[%c2_54, %c0_55, %c0_56] : memref<18x24x128xbf16, #tpu.memory_space<vmem>>, vector<16x16x128xbf16>
    %56 = vector.shape_cast %55 : vector<16x16x128xbf16> to vector<256x128xbf16>
    %c768 = arith.constant 768 : index
    %c0_57 = arith.constant 0 : index
    %57 = vector.load %arg4[%c768, %c0_57] : memref<1152x128xbf16, #tpu.memory_space<vmem>>, vector<128x128xbf16>
    %cst_58 = arith.constant dense<0.000000e+00> : vector<256x128xf32>
    %58 = tpu.matmul %56, %57, %cst_58 {dimension_numbers = #tpu.dot_dimension_numbers<[1], [0], [0], [1], [0, 0, 1, 1], [], []>} : vector<256x128xbf16>, vector<128x128xbf16>, vector<256x128xf32> -> vector<256x128xf32>
    %59 = arith.addf %54, %58 : vector<256x128xf32>
    %c2_59 = arith.constant 2 : index
    %c1_60 = arith.constant 1 : index
    %c0_61 = arith.constant 0 : index
    %60 = vector.load %arg10[%c2_59, %c1_60, %c0_61] : memref<18x24x128xbf16, #tpu.memory_space<vmem>>, vector<16x16x128xbf16>
    %61 = vector.shape_cast %60 : vector<16x16x128xbf16> to vector<256x128xbf16>
    %c896 = arith.constant 896 : index
    %c0_62 = arith.constant 0 : index
    %62 = vector.load %arg4[%c896, %c0_62] : memref<1152x128xbf16, #tpu.memory_space<vmem>>, vector<128x128xbf16>
    %cst_63 = arith.constant dense<0.000000e+00> : vector<256x128xf32>
    %63 = tpu.matmul %61, %62, %cst_63 {dimension_numbers = #tpu.dot_dimension_numbers<[1], [0], [0], [1], [0, 0, 1, 1], [], []>} : vector<256x128xbf16>, vector<128x128xbf16>, vector<256x128xf32> -> vector<256x128xf32>
    %64 = arith.addf %59, %63 : vector<256x128xf32>
    %c2_64 = arith.constant 2 : index
    %c2_65 = arith.constant 2 : index
    %c0_66 = arith.constant 0 : index
    %65 = vector.load %arg10[%c2_64, %c2_65, %c0_66] : memref<18x24x128xbf16, #tpu.memory_space<vmem>>, vector<16x16x128xbf16>
    %66 = vector.shape_cast %65 : vector<16x16x128xbf16> to vector<256x128xbf16>
    %c1024 = arith.constant 1024 : index
    %c0_67 = arith.constant 0 : index
    %67 = vector.load %arg4[%c1024, %c0_67] : memref<1152x128xbf16, #tpu.memory_space<vmem>>, vector<128x128xbf16>
    %cst_68 = arith.constant dense<0.000000e+00> : vector<256x128xf32>
    %68 = tpu.matmul %66, %67, %cst_68 {dimension_numbers = #tpu.dot_dimension_numbers<[1], [0], [0], [1], [0, 0, 1, 1], [], []>} : vector<256x128xbf16>, vector<128x128xbf16>, vector<256x128xf32> -> vector<256x128xf32>
    %69 = arith.addf %64, %68 : vector<256x128xf32>
    %c0_69 = arith.constant 0 : index
    %c0_70 = arith.constant 0 : index
    %70 = vector.load %arg5[%c0_69, %c0_70] : memref<1x128xf32, #tpu.memory_space<vmem>>, vector<1x128xf32>
    %71 = vector.broadcast %70 : vector<1x128xf32> to vector<256x128xf32>
    %72 = arith.addf %69, %71 : vector<256x128xf32>
    %cst_71 = arith.constant 0.000000e+00 : f32
    %73 = vector.broadcast %cst_71 : f32 to vector<256x128xf32>
    %74 = arith.maximumf %72, %73 : vector<256x128xf32>
    %75 = arith.truncf %74 : vector<256x128xf32> to vector<256x128xbf16>
    %c0_72 = arith.constant 0 : index
    %c0_73 = arith.constant 0 : index
    %76 = vector.load %arg6[%c0_72, %c0_73] : memref<128x8xbf16, #tpu.memory_space<vmem>>, vector<128x8xbf16>
    %cst_74 = arith.constant dense<0.000000e+00> : vector<256x8xf32>
    %77 = tpu.matmul %75, %76, %cst_74 {dimension_numbers = #tpu.dot_dimension_numbers<[1], [0], [0], [1], [0, 0, 1, 1], [], []>} : vector<256x128xbf16>, vector<128x8xbf16>, vector<256x8xf32> -> vector<256x8xf32>
    %c0_75 = arith.constant 0 : index
    %c0_76 = arith.constant 0 : index
    %78 = vector.load %arg7[%c0_75, %c0_76] : memref<128x8xbf16, #tpu.memory_space<vmem>>, vector<128x8xbf16>
    %cst_77 = arith.constant dense<0.000000e+00> : vector<256x8xf32>
    %79 = tpu.matmul %15, %78, %cst_77 {dimension_numbers = #tpu.dot_dimension_numbers<[1], [0], [0], [1], [0, 0, 1, 1], [], []>} : vector<256x128xbf16>, vector<128x8xbf16>, vector<256x8xf32> -> vector<256x8xf32>
    %80 = arith.addf %77, %79 : vector<256x8xf32>
    %c0_78 = arith.constant 0 : index
    %c0_79 = arith.constant 0 : index
    %81 = vector.load %arg8[%c0_78, %c0_79] : memref<1x8xf32, #tpu.memory_space<vmem>>, vector<1x8xf32>
    %82 = vector.broadcast %81 : vector<1x8xf32> to vector<256x8xf32>
    %83 = arith.addf %80, %82 : vector<256x8xf32>
    %cst_80 = arith.constant 0.000000e+00 : f32
    %84 = vector.broadcast %cst_80 : f32 to vector<256x8xf32>
    %85 = arith.maximumf %83, %84 : vector<256x8xf32>
    %c0_81 = arith.constant 0 : index
    %c0_82 = arith.constant 0 : index
    %c0_83 = arith.constant 0 : index
    %86 = vector.load %arg9[%c0_81, %c0_82, %c0_83] : memref<1x256x8xf32, #tpu.memory_space<vmem>>, vector<1x256x8xf32>
    %87 = vector.shape_cast %86 : vector<1x256x8xf32> to vector<256x8xf32>
    %88 = vector.shape_cast %85 : vector<256x8xf32> to vector<1x256x8xf32>
    tpu.vector_store %arg9[%c0_81, %c0_82, %c0_83], %88 {strides = array<i32>} : memref<1x256x8xf32, #tpu.memory_space<vmem>>, vector<1x256x8xf32>,
    return
  }
  func.func @transform_0(%arg0: i32) -> (i32, i32, i32) {
    %c0_i32 = arith.constant 0 : i32
    %c0_i32_0 = arith.constant 0 : i32
    %c0_i32_1 = arith.constant 0 : i32
    return %arg0, %c0_i32, %c0_i32_0 : i32, i32, i32
  }
  func.func @transform_1(%arg0: i32) -> (i32, i32) {
    %c0_i32 = arith.constant 0 : i32
    %c0_i32_0 = arith.constant 0 : i32
    %c0_i32_1 = arith.constant 0 : i32
    return %c0_i32, %c0_i32_0 : i32, i32
  }
  func.func @transform_2(%arg0: i32) -> (i32, i32) {
    %c0_i32 = arith.constant 0 : i32
    %c0_i32_0 = arith.constant 0 : i32
    %c0_i32_1 = arith.constant 0 : i32
    return %c0_i32, %c0_i32_0 : i32, i32
  }
  func.func @transform_3(%arg0: i32) -> (i32, i32) {
    %c0_i32 = arith.constant 0 : i32
    %c0_i32_0 = arith.constant 0 : i32
    %c0_i32_1 = arith.constant 0 : i32
    return %c0_i32, %c0_i32_0 : i32, i32
  }
  func.func @transform_4(%arg0: i32) -> (i32, i32) {
    %c0_i32 = arith.constant 0 : i32
    %c0_i32_0 = arith.constant 0 : i32
    %c0_i32_1 = arith.constant 0 : i32
    return %c0_i32, %c0_i32_0 : i32, i32
  }
  func.func @transform_5(%arg0: i32) -> (i32, i32) {
    %c0_i32 = arith.constant 0 : i32
    %c0_i32_0 = arith.constant 0 : i32
    %c0_i32_1 = arith.constant 0 : i32
    return %c0_i32, %c0_i32_0 : i32, i32
  }
  func.func @transform_6(%arg0: i32) -> (i32, i32) {
    %c0_i32 = arith.constant 0 : i32
    %c0_i32_0 = arith.constant 0 : i32
    %c0_i32_1 = arith.constant 0 : i32
    return %c0_i32, %c0_i32_0 : i32, i32
  }
  func.func @transform_7(%arg0: i32) -> (i32, i32) {
    %c0_i32 = arith.constant 0 : i32
    %c0_i32_0 = arith.constant 0 : i32
    %c0_i32_1 = arith.constant 0 : i32
    return %c0_i32, %c0_i32_0 : i32, i32
  }
  func.func @transform_8(%arg0: i32) -> (i32, i32, i32) {
    %c0_i32 = arith.constant 0 : i32
    %c0_i32_0 = arith.constant 0 : i32
    %c0_i32_1 = arith.constant 0 : i32
    return %arg0, %c0_i32, %c0_i32_0 : i32, i32, i32
  }
}

</mosaic_0001>

<bundles_post_ra>
// kernel: tpu_custom_call.1
= control target key start
LH: loop header
LB: loop body
LE: loop exit
PB: predicated region body
PF: predicated region fallthrough
CT: control target
= control target key end

     0   :  { %s6846_s27 = smov 0   ;;  %s8980_s0 = inlined_call_operand.vmem [shape: f32[2,256,4], index: 0, kind: input, shape index: {}]   ;;  %s8981_s1 = inlined_call_operand.vmem [shape: bf16[128,128], index: 1, kind: input, shape index: {}]   ;;  %s8982_s2 = inlined_call_operand.vmem [shape: f32[1,128], index: 2, kind: input, shape index: {}]   ;;  %s8983_s3 = inlined_call_operand.vmem [shape: bf16[1152,128], index: 3, kind: input, shape index: {}]   ;;  %s8984_s4 = inlined_call_operand.vmem [shape: f32[1,128], index: 4, kind: input, shape index: {}]   ;;  %s8985_s5 = inlined_call_operand.vmem [shape: bf16[128,8], index: 5, kind: input, shape index: {}]   ;;  %s8986_s6 = inlined_call_operand.vmem [shape: bf16[128,8], index: 6, kind: input, shape index: {}]   ;;  %s8987_s7 = inlined_call_operand.vmem [shape: f32[1,8], index: 7, kind: input, shape index: {}]   ;;  %s8988_s8 = inlined_call_operand.vmem [shape: f32[2,256,8], index: 8, kind: output, shape index: {}]  }
   0x1 LB: > { %s5964_s28 = sadd.s32 4294967295, %s6798_s27   ;;  %p5968_p0 = scmp.ge.s32.totalorder %s6798_s27, 1  ;;  %s6798_s27 = sphi %s6846_s27, %s18_s27  }
   0x2   : > { %p262_p1 = scmp.lt.s32.totalorder %s6798_s27, 3 }
   0x4   : > { %p263_p2 = pnand %p5968_p0, %p262_p1 }
   0x6   : > { %266 = sbr.rel (%p263_p2) target bundleno = 1238 (0x4d6), region = 52 }
   0xb   : > { %v6640_v0 = vld [vmem:[%s8981_s1 + $0x38] sm:$0xff]  ;;  %v6639_v1 = vld [vmem:[%s8981_s1 + $0x30] sm:$0xff]  ;;  %p296_p3 = scmp.lt.s32.totalorder %s5964_s28, 1  ;;  %v6638_v2 = vld [vmem:[%s8981_s1 + $0x28] sm:$0xff]  ;;  %vm561_vm0 = vcmask 31744   ;;  %vm315_vm1 = vcmask 1040384  }
   0xc   : > { %679 = vmatpush.bf16.msra.mxu0 %v6640_v0  ;;  %v6637_v3 = vld [vmem:[%s8981_s1 + $0x20] sm:$0xff]  ;;  %v6636_v4 = vld [vmem:[%s8981_s1 + $0x18] sm:$0xff]  ;;  %v6635_v5 = vld [vmem:[%s8981_s1 + $0x10] sm:$0xff]  ;;  %vm316_vm2 = vsmask.f32 256  ;;  %vm366_vm4 = vcmask 1043456  }
   0xd   : > { %s9155_s28 = smov (!%p296_p3, %s5964_s28), 1  ;;  %v6634_v10 = vld [vmem:[%s8981_s1 + $0x8] sm:$0xff]  ;;  %v6633_v13 = vld [vmem:[%s8981_s1] sm:$0xff]  ;;  %v6664_v43 = vld [vmem:[%s8983_s3 + $0x38] sm:$0xff]  ;;  %vm367_vm5 = vsmask.f32 7938 }
   0xe   : > { %s6631_s15 = sshll.u32 %s9155_s28, 8  ;;  %v6680_v44 = vld [vmem:[%s8983_s3 + $0xb8] sm:$0xff]  ;;  %2078 = vmatpush.bf16.msra.mxu2 %v6664_v43  ;;  %v6663_v47 = vld [vmem:[%s8983_s3 + $0x30] sm:$0xff]  ;;  %v6662_v56 = vld [vmem:[%s8983_s3 + $0x28] sm:$0xff]  ;;  %vm2215_vm7 = vcmask 1042432   ;;  %vm2216_vm8 = vcmask 1046532  }
   0xf   : > { %s6877_s20 = scalar_lea.vmem %s8980_s0, %s6631_s15  ;;  %2458 = vmatpush.bf16.msra.mxu3 %v6680_v44  ;;  %v6672_v53 = vld [vmem:[%s8983_s3 + $0x78] sm:$0xff]  ;;  %v6679_v54 = vld [vmem:[%s8983_s3 + $0xb0] sm:$0xff]  ;;  %v6678_v59 = vld [vmem:[%s8983_s3 + $0xa8] sm:$0xff]  ;;  %vm1330_vm10 = vsmask.f32 3328  ;;  %s8809_s30 = scalar_lea.vmem %s8988_s8, %s6631_s15  ;;  %vm5876_vm15 = vcmask 64512  }
  0x10   : > { %680 = vmatpush.bf16.msra.mxu0 %v6639_v1  ;;  %v417_v6 = vld [vmem:[%s6877_s20] sm:$0xff]  ;;  %v418_v7 = vld [vmem:[%s6877_s20 + $0x8] sm:$0xff]  ;;  %v419_v15 = vld [vmem:[%s6877_s20 + $0x10] sm:$0xff]  ;;  %1845 = vmatpush.bf16.msra.mxu1 %v6672_v53  ;;  %vm1331_vm11 = vsmask.f32 7440 }
  0x11   : > { %v449_v8 = vpack.c.bf16 %v417_v6, %v417_v6  ;;  %v450_v9 = vpack.c.bf16 %v418_v7, %v418_v7  ;;  %v420_v16 = vld [vmem:[%s6877_s20 + $0x18] sm:$0xff]  ;;  %v451_v17 = vpack.c.bf16 %v419_v15, %v419_v15  ;;  %v421_v22 = vld [vmem:[%s6877_s20 + $0x20] sm:$0xff]  ;;  %v422_v23 = vld [vmem:[%s6877_s20 + $0x28] sm:$0xff]  ;;  %vm832_vm13 = vsmask.f32 4368 }
  0x12   : > { %v452_v18 = vpack.c.bf16 %v420_v16, %v420_v16  ;;  %v453_v24 = vpack.c.bf16 %v421_v22, %v421_v22  ;;  %v454_v25 = vpack.c.bf16 %v422_v23, %v422_v23  ;;  %v423_v29 = vld [vmem:[%s6877_s20 + $0x30] sm:$0xff]  ;;  %v424_v30 = vld [vmem:[%s6877_s20 + $0x38] sm:$0xff]  ;;  %v425_v36 = vld [vmem:[%s6877_s20 + $0x40] sm:$0xff]  ;;  %2079 = vmatpush.bf16.msra.mxu2 %v6663_v47 }
  0x13   : > { %v513_v11 = vunpack.c.l.b16 %v449_v8  ;;  %v514_v12 = vunpack.c.l.b16 %v450_v9  ;;  %v515_v19 = vunpack.c.l.b16 %v451_v17  ;;  %v455_v31 = vpack.c.bf16 %v423_v29, %v423_v29  ;;  %v426_v37 = vld [vmem:[%s6877_s20 + $0x48] sm:$0xff]  ;;  %v427_v45 = vld [vmem:[%s6877_s20 + $0x50] sm:$0xff]  ;;  %v428_v46 = vld [vmem:[%s6877_s20 + $0x58] sm:$0xff]  ;;  %2459 = vmatpush.bf16.msra.mxu3 %v6679_v54 }
  0x14   : > { %681 = vmatpush.bf16.msra.mxu0 %v6638_v2  ;;  %v516_v20 = vunpack.c.l.b16 %v452_v18  ;;  %v517_v26 = vunpack.c.l.b16 %v453_v24  ;;  %v518_v27 = vunpack.c.l.b16 %v454_v25  ;;  %v456_v32 = vpack.c.bf16 %v424_v30, %v424_v30  ;;  %v429_v55 = vld [vmem:[%s6877_s20 + $0x60] sm:$0xff]  ;;  %v430_v57 = vld [vmem:[%s6877_s20 + $0x68] sm:$0xff]  ;;  %v6671_v58 = vld [vmem:[%s8983_s3 + $0x70] sm:$0xff] }
  0x15   : > { %v6890_v14 = vpack.c.b16 %v514_v12, %v513_v11  ;;  %v519_v33 = vunpack.c.l.b16 %v455_v31  ;;  %v457_v38 = vpack.c.bf16 %v425_v36, %v425_v36  ;;  %v458_v39 = vpack.c.bf16 %v426_v37, %v426_v37  ;;  %v6661_v60 = vld [vmem:[%s8983_s3 + $0x20] sm:$0xff]  ;;  %vm6954_vm3 = vmand %vm315_vm1, %vm316_vm2  ;;  %v318_v62 = vld [vmem:[#allocation2 + $0xc] sm:$0x1]  ;;  %1846 = vmatpush.bf16.msra.mxu1 %v6671_v58 }
  0x16   : > { %v6896_v21 = vpack.c.b16 %v516_v20, %v515_v19  ;;  %v6902_v28 = vpack.c.b16 %v518_v27, %v517_v26  ;;  %v520_v34 = vunpack.c.l.b16 %v456_v32  ;;  %v459_v48 = vpack.c.bf16 %v427_v45, %v427_v45  ;;  %2080 = vmatpush.bf16.msra.mxu2 %v6662_v56  ;;  %v6670_v2 = vld [vmem:[%s8983_s3 + $0x68] sm:$0xff]  ;;  %v6669_v7 = vld [vmem:[%s8983_s3 + $0x60] sm:$0xff]  ;;  %v6676_v8 = vld [vmem:[%s8983_s3 + $0x98] sm:$0xff] }
  0x17   : > { %9008 = vst [vmem:[#allocation3_spill] sm:$0xff] %v6890_v14  ;;  %v521_v40 = vunpack.c.l.b16 %v457_v38  ;;  %v522_v41 = vunpack.c.l.b16 %v458_v39  ;;  %v460_v49 = vpack.c.bf16 %v428_v46, %v428_v46  ;;  %v319_v63 = vsel %vm6954_vm3, 0, %v318_v62  ;;  %2460 = vmatpush.bf16.msra.mxu3 %v6678_v59  ;;  %v6659_v11 = vld [vmem:[%s8983_s3 + $0x10] sm:$0xff]  ;;  %v432_v16 = vld [vmem:[%s6877_s20 + $0x78] sm:$0xff]  ;;  %v6658_v18 = vld [vmem:[%s8983_s3 + $0x8] sm:$0xff] }
  0x18   : > { %682 = vmatpush.bf16.msra.mxu0 %v6637_v3  ;;  %9009 = vst [vmem:[#allocation4_spill] sm:$0xff] %v6896_v21  ;;  %v6908_v35 = vpack.c.b16 %v520_v34, %v519_v33  ;;  %v523_v50 = vunpack.c.l.b16 %v459_v48  ;;  %v461_v0 = vpack.c.bf16 %v429_v55, %v429_v55  ;;  %v462_v1 = vpack.c.bf16 %v430_v57, %v430_v57  ;;  %v6677_v3 = vld [vmem:[%s8983_s3 + $0xa0] sm:$0xff]  ;;  %v431_v12 = vld [vmem:[%s6877_s20 + $0x70] sm:$0xff]  ;;  %v6674_v23 = vld [vmem:[%s8983_s3 + $0x88] sm:$0xff] }
  0x19   : > { %9010 = vst [vmem:[#allocation5_spill] sm:$0xff] %v6902_v28  ;;  %v6914_v42 = vpack.c.b16 %v522_v41, %v521_v40  ;;  %v524_v51 = vunpack.c.l.b16 %v460_v49  ;;  %1847 = vmatpush.bf16.msra.mxu1 %v6670_v2  ;;  %v6675_v15 = vld [vmem:[%s8983_s3 + $0x90] sm:$0xff]  ;;  %v463_v17 = vpack.c.bf16 %v431_v12, %v431_v12  ;;  %v464_v19 = vpack.c.bf16 %v432_v16, %v432_v16  ;;  %vm6999_vm6 = vmand %vm366_vm4, %vm367_vm5  ;;  %v6657_v34 = vld [vmem:[%s8983_s3] sm:$0xff] }
  0x1a   : > { %9011 = vst [vmem:[#allocation6_spill] sm:$0xff] %v6908_v35  ;;  %2081 = vmatpush.bf16.msra.mxu2 %v6661_v60  ;;  %v526_v6 = vunpack.c.l.b16 %v462_v1  ;;  %v6667_v22 = vld [vmem:[%s8983_s3 + $0x50] sm:$0xff]  ;;  %vm7006_vm9 = vmor %vm2215_vm7, %vm2216_vm8  ;;  %v6666_v45 = vld [vmem:[%s8983_s3 + $0x48] sm:$0xff] }
  0x1b   : > { %9012 = vst [vmem:[#allocation7_spill] sm:$0xff] %v6914_v42  ;;  %v6929_v52 = vpack.c.b16 %v524_v51, %v523_v50  ;;  %2461 = vmatpush.bf16.msra.mxu3 %v6677_v3  ;;  %v527_v27 = vunpack.c.l.b16 %v463_v17  ;;  %v528_v38 = vunpack.c.l.b16 %v464_v19  ;;  %v369_v44 = vld [vmem:[#allocation2 + $0x14] sm:$0xf]  ;;  %v6673_v49 = vld [vmem:[%s8983_s3 + $0x80] sm:$0xff]  ;;  %vm7027_vm12 = vmor %vm1330_vm10, %vm1331_vm11 }
  0x1c   : > { %683 = vmatpush.bf16.msra.mxu0 %v6636_v4  ;;  %320 = vst [vmem:[#allocation2 + $0xc] sm:$0x1] %v319_v63  ;;  %v6660_v4 = vld [vmem:[%s8983_s3 + $0x18] sm:$0xff]  ;;  %v370_v48 = vsel %vm6999_vm6, 0, %v369_v44  ;;  %v6665_v59 = vld [vmem:[%s8983_s3 + $0x40] sm:$0xff]  ;;  %vm7072_vm14 = vmor %vm316_vm2, %vm832_vm13 }
  0x1d   : > { %9013 = vst [vmem:[#allocation8_spill] sm:$0xff] %v6929_v52  ;;  %1848 = vmatpush.bf16.msra.mxu1 %v6669_v7  ;;  %v7022_v57 = vpack.c.b16 %v528_v38, %v527_v27  ;;  %v321_v7 = vld [vmem:[#allocation2 + $0x18] sm:$0x1]  ;;  %v372_v19 = vld [vmem:[#allocation2 + $0x20] sm:$0xf]  ;;  %v435_v27 = vld [vmem:[%s6877_s20 + $0x90] sm:$0xff] }
  0x1e   : > { %2082 = vmatpush.bf16.msra.mxu2 %v6660_v4  ;;  %371 = vst [vmem:[#allocation2 + $0x14] sm:$0xf] %v370_v48  ;;  %v6704_v38 = vld [vmem:[%s8983_s3 + $0xf8] sm:$0xff] }
  0x1f   : > { %2462 = vmatpush.bf16.msra.mxu3 %v6676_v8  ;;  %9021 = vst [vmem:[#allocation10_spill] sm:$0xff] %v7022_v57  ;;  %v6760_v33 = vld [vmem:[%s8983_s3 + $0x238] sm:$0xff] }
  0x20   : > { %684 = vmatpush.bf16.msra.mxu0 %v6635_v5  ;;  %v525_v5 = vunpack.c.l.b16 %v461_v0 }
  0x22   : > { %v6975_v9 = vpack.c.b16 %v526_v6, %v525_v5  ;;  %2083 = vmatpush.bf16.msra.mxu2 %v6659_v11  ;;  %v433_v5 = vld [vmem:[%s6877_s20 + $0x80] sm:$0xff]  ;;  %v434_v6 = vld [vmem:[%s6877_s20 + $0x88] sm:$0xff] }
  0x23   : > { %2463 = vmatpush.bf16.msra.mxu3 %v6675_v15  ;;  %v466_v15 = vpack.c.bf16 %v434_v6, %v434_v6 }
  0x24   : > { %685 = vmatpush.bf16.msra.mxu0 %v6634_v10  ;;  %9016 = vst [vmem:[#allocation9_spill] sm:$0xff] %v6975_v9  ;;  %v6800_v10 = vmov 0  }
  0x25   : > { %307 = vst [vmem:[#allocation2] sm:$0xf] %v6800_v10 }
  0x26   : > { %308 = vst [vmem:[#allocation2 + $0x4] sm:$0xf] %v6800_v10  ;;  %2084 = vmatpush.bf16.msra.mxu2 %v6658_v18  ;;  %v530_v18 = vunpack.c.l.b16 %v466_v15  ;;  %v327_v15 = vld [vmem:[#allocation2 + $0x30] sm:$0x1] }
  0x27   : > { %309 = vst [vmem:[#allocation2 + $0x8] sm:$0xf] %v6800_v10  ;;  %2464 = vmatpush.bf16.msra.mxu3 %v6674_v23 }
  0x28   : > { %686 = vmatpush.bf16.msra.mxu0 %v6633_v13  ;;  %v6668_v13 = vld [vmem:[%s8983_s3 + $0x58] sm:$0xff]  ;;  %311 = vst [vmem:[#allocation2 + $0xcc] sm:$0xf] %v6800_v10 }
  0x29   : > { %312 = vst [vmem:[#allocation2 + $0xd0] sm:$0xf] %v6800_v10  ;;  %1849 = vmatpush.bf16.msra.mxu1 %v6668_v13  ;;  %v465_v13 = vpack.c.bf16 %v433_v5, %v433_v5 }
  0x2a   : > { %313 = vst [vmem:[#allocation2 + $0xd4] sm:$0xf] %v6800_v10  ;;  %2085 = vmatpush.bf16.msra.mxu2 %v6657_v34  ;;  %v322_v10 = vsel %vm6954_vm3, 0, %v321_v7  ;;  %v437_v7 = vld [vmem:[%s6877_s20 + $0xa0] sm:$0xff] }
  0x2b   : > { %6005 = vmatmul.msk.bf16.vlgmr.msra.gmra.mxu0 %vm561_vm0, %v6890_v14  ;;  %2465 = vmatpush.bf16.msra.mxu3 %v6673_v49  ;;  %323 = vst [vmem:[#allocation2 + $0x18] sm:$0x1] %v322_v10  ;;  %v529_v17 = vunpack.c.l.b16 %v465_v13 }
  0x2c   : > { %v1266_v20 = vld [vmem:[#allocation2] sm:$0xf]  ;;  %2771 = vmatpush.bf16.msrb.mxu0 %v6704_v38 }
  0x2d   : > { %v1267_v24 = vld [vmem:[#allocation2 + $0x4] sm:$0xf]  ;;  %v1334_v25 = vshrl.u32 %v1266_v20, 16  ;;  %v1337_v26 = vshll.u32 %v1266_v20, 16  ;;  %v2167_v30 = vld [vmem:[#allocation2] sm:$0xe]  ;;  %1850 = vmatpush.bf16.msra.mxu1 %v6667_v22  ;;  %v7048_v23 = vpack.c.b16 %v530_v18, %v529_v17 }
  0x2e   : > { %v1314_v29 = vld [vmem:[#allocation2 + $0x8] sm:$0x1]  ;;  %v2220_v31 = vrot.slane %v1267_v24, 5  ;;  %v1343_v32 = vshll.u32 %v1267_v24, 16  ;;  %v6149_v36 = vrot.slane %v2167_v30, 9  ;;  %v1347_v47 = vshrl.u32 %v1267_v24, 16 }
  0x2f   : > { %v2223_v37 = vrot.slane %v1314_v29, 5  ;;  %v1336_v41 = vrot.slane %v1334_v25, 4  ;;  %v1339_v43 = vrot.slane %v1337_v26, 5  ;;  %v6641_v50 = vld [vmem:[#allocation2] sm:$0xff]  ;;  %v1353_v63 = vshll.u32 %v1314_v29, 16  ;;  %9024 = vst [vmem:[#allocation11_spill] sm:$0xff] %v7048_v23 }
  0x30   : > { %v2222_v40 = vrot.slane %v2220_v31, 4  ;;  %v2221_v46 = vsel %vm7006_vm9, %v6149_v36, %v2220_v31  ;;  %v1345_v56 = vrot.slane %v1343_v32, 5  ;;  %2086 = vmatmul.bf16.vlgmr.msra.gmra.mxu2 %v6641_v50  ;;  %v1349_v62 = vrot.slane %v1347_v47, 4  ;;  %v7044_v20 = vld [vmem:[%s8982_s2] ss:$0 sm:$0xff]  ;;  %v436_v29 = vld [vmem:[%s6877_s20 + $0x98] sm:$0xff] }
  0x31   : > { %v2346_v53 = vunpack.c.l.b16 %v2221_v46  ;;  %v1340_v54 = vor.u32 %v1339_v43, %v1336_v41  ;;  %1851 = vmatpush.bf16.msra.mxu1 %v6666_v45  ;;  %v1355_v3 = vrot.slane %v1353_v63, 5  ;;  %v373_v22 = vsel %vm6999_vm6, 0, %v372_v19  ;;  %v324_v30 = vld [vmem:[#allocation2 + $0x24] sm:$0x1]  ;;  %v1154_v46 = vld [vmem:[#allocation2 + $0xc] sm:$0xf] }
  0x32   : > { %v2224_v51 = vsel %vm7006_vm9, %v2222_v40, %v2223_v37  ;;  %v1350_v2 = vor.u32 %v1349_v62, %v1345_v56  ;;  %374 = vst [vmem:[#allocation2 + $0x20] sm:$0xf] %v373_v22  ;;  %v325_v32 = vsel %vm6954_vm3, 0, %v324_v30  ;;  %v467_v36 = vpack.c.bf16 %v435_v27, %v435_v27  ;;  %v6712_v40 = vld [vmem:[%s8983_s3 + $0x138] sm:$0xff] }
  0x33   : > { %v2347_v55 = vunpack.c.l.b16 %v2224_v51  ;;  %v1341_v60 = vrot.slane %v1340_v54, 4  ;;  %326 = vst [vmem:[#allocation2 + $0x24] sm:$0x1] %v325_v32  ;;  %v468_v37 = vpack.c.bf16 %v436_v29, %v436_v29  ;;  %v375_v51 = vld [vmem:[#allocation2 + $0x2c] sm:$0xf] }
  0x34   : > { %v1351_v4 = vrot.slane %v1350_v2, 4  ;;  %v531_v49 = vunpack.c.l.b16 %v467_v36  ;;  %v1158_v2 = vld [vmem:[#allocation2 + $0x14] sm:$0x1]  ;;  %v1161_v32 = vld [vmem:[#allocation2 + $0x18] sm:$0xf] }
  0x35   : > { %v2378_v58 = vpack.c.b16 %v2347_v55, %v2346_v53  ;;  %1852 = vmatpush.bf16.msra.mxu1 %v6665_v59  ;;  %v1346_v1 = vsel %vm7027_vm12, %v1341_v60, %v1345_v56  ;;  %v532_v50 = vunpack.c.l.b16 %v468_v37  ;;  %v376_v55 = vsel %vm6999_vm6, 0, %v375_v51 }
  0x36   : > { %v1733_v8 = vunpack.c.l.b16 %v1346_v1  ;;  %v1356_v11 = vsel %vm7027_vm12, %v1351_v4, %v1355_v3  ;;  %377 = vst [vmem:[#allocation2 + $0x2c] sm:$0xf] %v376_v55 }
  0x37   : > { %2466 = vmatmul.bf16.vlgmr.msra.gmra.mxu3 %v2378_v58  ;;  %v1734_v12 = vunpack.c.l.b16 %v1356_v11  ;;  %v7068_v58 = vpack.c.b16 %v532_v50, %v531_v49 }
  0x39   : > { %v1765_v16 = vpack.c.b16 %v1734_v12, %v1733_v8  ;;  %3452 = vmatpush.bf16.msrb.mxu1 %v6712_v40  ;;  %9025 = vst [vmem:[#allocation12_spill] sm:$0xff] %v7068_v58  ;;  %v438_v8 = vld [vmem:[%s6877_s20 + $0xa8] sm:$0xff] }
  0x3a   : > { %v470_v17 = vpack.c.bf16 %v438_v8, %v438_v8  ;;  %v439_v8 = vld [vmem:[%s6877_s20 + $0xb0] sm:$0xff] }
  0x3b   : > { %6006 = vmatmul.msk.bf16.gmra.mxu0 %vm561_vm0, %v6896_v21  ;;  %1853 = vmatmul.bf16.vlgmr.msra.gmra.mxu1 %v1765_v16  ;;  %v469_v16 = vpack.c.bf16 %v437_v7, %v437_v7 }
  0x3c   : > { %v534_v36 = vunpack.c.l.b16 %v470_v17 }
  0x4b   : > { %6007 = vmatmul.msk.bf16.gmra.mxu0 %vm561_vm0, %v6902_v28 }
  0x5b   : > { %6008 = vmatmul.msk.bf16.gmra.mxu0 %vm561_vm0, %v6908_v35 }
  0x6b   : > { %6009 = vmatmul.msk.bf16.gmra.mxu0 %vm561_vm0, %v6914_v42 }
  0x7b   : > { %6010 = vmatmul.msk.bf16.gmra.mxu0 %vm561_vm0, %v6929_v52 }
  0x8b   : > { %6011 = vmatmul.msk.bf16.gmra.mxu0 %vm561_vm0, %v6975_v9 }
  0x9b   : > { %6012 = vmatmul.msk.bf16.gmra.mxu0 %vm561_vm0, %v7022_v57 }
  0xa8   : > { %v688_v24 = vpop.f32.mrf.mxu0 }
  0xa9   : > { %v689_v25 = vadd.f32 %v7044_v20, %v688_v24  ;;  %v328_v24 = vsel %vm6954_vm3, 0, %v327_v15 }
  0xaa   : > { %329 = vst [vmem:[#allocation2 + $0x30] sm:$0x1] %v328_v24 }
  0xab   : > { %v768_v26 = vmax.f32 %v689_v25, 0.0  ;;  %6013 = vmatmul.msk.bf16.gmra.mxu0 %vm561_vm0, %v7048_v23 }
  0xad   : > { %v800_v31 = vpack.c.bf16 %v768_v26, %v768_v26 }
  0xaf   : > { %v835_v34 = vshrl.u32 %v800_v31, 16  ;;  %v838_v44 = vshll.u32 %v800_v31, 16 }
  0xb0   : > { %v690_v41 = vpop.f32.mrf.mxu0 }
  0xb1   : > { %v837_v43 = vrot.slane %v835_v34, 7  ;;  %v691_v45 = vadd.f32 %v7044_v20, %v690_v41  ;;  %v533_v34 = vunpack.c.l.b16 %v469_v16 }
  0xb3   : > { %v840_v47 = vor.u32 %v838_v44, %v837_v43  ;;  %v769_v48 = vmax.f32 %v691_v45, 0.0  ;;  %v841_v3 = vrot.slane %v837_v43, 4 }
  0xb5   : > { %v1155_v53 = vsel %vm6999_vm6, %v840_v47, %v1154_v46  ;;  %v801_v54 = vpack.c.bf16 %v769_v48, %v769_v48  ;;  %v7089_v48 = vpack.c.b16 %v534_v36, %v533_v34  ;;  %v330_v36 = vld [vmem:[#allocation2 + $0x3c] sm:$0x1] }
  0xb6   : > { %1156 = vst [vmem:[#allocation2 + $0xc] sm:$0xf] %v1155_v53 }
  0xb7   : > { %v843_v56 = vshrl.u32 %v801_v54, 16  ;;  %v846_v62 = vshll.u32 %v801_v54, 16  ;;  %9028 = vst [vmem:[#allocation13_spill] sm:$0xff] %v7089_v48 }
  0xb8   : > { %v693_v59 = vpop.f32.mrf.mxu0 }
  0xb9   : > { %v845_v60 = vrot.slane %v843_v56, 7  ;;  %v694_v63 = vadd.f32 %v7044_v20, %v693_v59  ;;  %v378_v59 = vld [vmem:[#allocation2 + $0x38] sm:$0xf] }
  0xba   : > { %v379_v16 = vsel %vm6999_vm6, 0, %v378_v59 }
  0xbb   : > { %v848_v4 = vor.u32 %v846_v62, %v845_v60  ;;  %v850_v5 = vrot.slane %v845_v60, 4  ;;  %v770_v6 = vmax.f32 %v694_v63, 0.0  ;;  %6014 = vmatmul.msk.bf16.gmra.mxu0 %vm561_vm0, %v7068_v58  ;;  %380 = vst [vmem:[#allocation2 + $0x38] sm:$0xf] %v379_v16 }
  0xbd   : > { %v849_v10 = vsel %vm7072_vm14, %v841_v3, %v848_v4  ;;  %v1159_v11 = vsel %vm6954_vm3, %v850_v5, %v1158_v2  ;;  %v802_v12 = vpack.c.bf16 %v770_v6, %v770_v6  ;;  %v1268_v13 = vld [vmem:[#allocation2 + $0xc] sm:$0xf] }
  0xbe   : > { %1157 = vst [vmem:[#allocation2 + $0x10] sm:$0xf] %v849_v10  ;;  %v1358_v18 = vshrl.u32 %v1268_v13, 16  ;;  %v1361_v22 = vshll.u32 %v1268_v13, 16  ;;  %v2168_v37 = vld [vmem:[#allocation2 + $0xc] sm:$0xe] }
  0xbf   : > { %1160 = vst [vmem:[#allocation2 + $0x14] sm:$0x1] %v1159_v11  ;;  %v852_v19 = vshrl.u32 %v802_v12, 16  ;;  %v855_v29 = vshll.u32 %v802_v12, 16  ;;  %v6150_v47 = vrot.slane %v2168_v37, 9  ;;  %v440_v10 = vld [vmem:[%s6877_s20 + $0xb8] sm:$0xff] }
  0xc0   : > { %v695_v25 = vpop.f32.mrf.mxu0  ;;  %v1360_v26 = vrot.slane %v1358_v18, 4  ;;  %v1363_v31 = vrot.slane %v1361_v22, 5  ;;  %v1165_v11 = vld [vmem:[#allocation2 + $0x20] sm:$0x1] }
  0xc1   : > { %v854_v27 = vrot.slane %v852_v19, 7  ;;  %v696_v30 = vadd.f32 %v7044_v20, %v695_v25 }
  0xc2   : > { %v1364_v41 = vor.u32 %v1363_v31, %v1360_v26  ;;  %v471_v26 = vpack.c.bf16 %v439_v8, %v439_v8 }
  0xc3   : > { %v857_v38 = vor.u32 %v855_v29, %v854_v27  ;;  %v771_v40 = vmax.f32 %v696_v30, 0.0  ;;  %v858_v53 = vrot.slane %v854_v27, 4  ;;  %v472_v27 = vpack.c.bf16 %v440_v10, %v440_v10 }
  0xc4   : > { %v1365_v55 = vrot.slane %v1364_v41, 4 }
  0xc5   : > { %v1162_v43 = vsel %vm6999_vm6, %v857_v38, %v1161_v32  ;;  %v803_v44 = vpack.c.bf16 %v771_v40, %v771_v40  ;;  %v6642_v45 = vld [vmem:[#allocation2 + $0xc] sm:$0xff] }
  0xc6   : > { %v1269_v46 = vld [vmem:[#allocation2 + $0x10] sm:$0xf]  ;;  %1163 = vst [vmem:[#allocation2 + $0x18] sm:$0xf] %v1162_v43  ;;  %v1315_v49 = vld [vmem:[#allocation2 + $0x14] sm:$0x1]  ;;  %2091 = vmatmul.bf16.gmra.mxu2 %v6642_v45 }
  0xc7   : > { %v2227_v50 = vrot.slane %v1269_v46, 5  ;;  %v1367_v51 = vshll.u32 %v1269_v46, 16  ;;  %v860_v54 = vshrl.u32 %v803_v44, 16  ;;  %v1371_v56 = vshrl.u32 %v1269_v46, 16  ;;  %v6703_v45 = vld [vmem:[%s8983_s3 + $0xf0] sm:$0xff] }
  0xc8   : > { %v698_v60 = vpop.f32.mrf.mxu0  ;;  %v2230_v2 = vrot.slane %v1315_v49, 5  ;;  %v863_v5 = vshll.u32 %v803_v44, 16  ;;  %v1377_v15 = vshll.u32 %v1315_v49, 16  ;;  %v6711_v46 = vld [vmem:[%s8983_s3 + $0x130] sm:$0xff]  ;;  %2772 = vmatpush.bf16.msrb.mxu0 %v6703_v45 }
  0xc9   : > { %v2228_v62 = vsel %vm7006_vm9, %v6150_v47, %v2227_v50  ;;  %v2229_v63 = vrot.slane %v2227_v50, 4  ;;  %v1369_v3 = vrot.slane %v1367_v51, 5  ;;  %v862_v4 = vrot.slane %v860_v54, 7  ;;  %3453 = vmatpush.bf16.msrb.mxu1 %v6711_v46 }
  0xca   : > { %v699_v6 = vadd.f32 %v7044_v20, %v698_v60  ;;  %v1373_v7 = vrot.slane %v1371_v56, 4  ;;  %v2348_v13 = vunpack.c.l.b16 %v2228_v62  ;;  %v1379_v38 = vrot.slane %v1377_v15, 5  ;;  %v1168_v60 = vld [vmem:[#allocation2 + $0x24] sm:$0xf] }
  0xcb   : > { %v2231_v12 = vsel %vm7006_vm9, %v2229_v63, %v2230_v2  ;;  %v865_v17 = vor.u32 %v863_v5, %v862_v4  ;;  %v867_v18 = vrot.slane %v862_v4, 4  ;;  %6015 = vmatmul.msk.bf16.gmra.mxu0 %vm561_vm0, %v7089_v48  ;;  %v1370_v24 = vsel %vm7027_vm12, %v1365_v55, %v1369_v3 }
  0xcc   : > { %v772_v19 = vmax.f32 %v699_v6, 0.0  ;;  %v2349_v22 = vunpack.c.l.b16 %v2231_v12  ;;  %v1374_v25 = vor.u32 %v1373_v7, %v1369_v3  ;;  %v1735_v44 = vunpack.c.l.b16 %v1370_v24 }
  0xcd   : > { %v866_v29 = vsel %vm7072_vm14, %v858_v53, %v865_v17  ;;  %v1166_v30 = vsel %vm6954_vm3, %v867_v18, %v1165_v11  ;;  %v1270_v34 = vld [vmem:[#allocation2 + $0x18] sm:$0xf]  ;;  %v331_v53 = vsel %vm6954_vm3, 0, %v330_v36  ;;  %v535_v62 = vunpack.c.l.b16 %v471_v26 }
  0xce   : > { %v804_v31 = vpack.c.bf16 %v772_v19, %v772_v19  ;;  %v2379_v32 = vpack.c.b16 %v2349_v22, %v2348_v13  ;;  %1164 = vst [vmem:[#allocation2 + $0x1c] sm:$0xf] %v866_v29  ;;  %v1375_v37 = vrot.slane %v1374_v25, 4  ;;  %v1382_v40 = vshrl.u32 %v1270_v34, 16  ;;  %v2169_v2 = vld [vmem:[#allocation2 + $0x18] sm:$0xe] }
  0xcf   : > { %v1385_v41 = vshll.u32 %v1270_v34, 16  ;;  %1167 = vst [vmem:[#allocation2 + $0x20] sm:$0x1] %v1166_v30  ;;  %v536_v63 = vunpack.c.l.b16 %v472_v27  ;;  %v6151_v12 = vrot.slane %v2169_v2, 9  ;;  %v381_v25 = vld [vmem:[#allocation2 + $0x44] sm:$0xf] }
  0xd0   : > { %v869_v43 = vshrl.u32 %v804_v31, 16  ;;  %2471 = vmatmul.bf16.gmra.mxu3 %v2379_v32  ;;  %v700_v47 = vpop.f32.mrf.mxu0  ;;  %v1380_v49 = vsel %vm7027_vm12, %v1375_v37, %v1379_v38  ;;  %v1384_v50 = vrot.slane %v1382_v40, 4  ;;  %v872_v55 = vshll.u32 %v804_v31, 16  ;;  %332 = vst [vmem:[#allocation2 + $0x3c] sm:$0x1] %v331_v53  ;;  %v441_v38 = vld [vmem:[%s6877_s20 + $0xc0] sm:$0xff] }
  0xd1   : > { %v1387_v51 = vrot.slane %v1385_v41, 5  ;;  %v701_v56 = vadd.f32 %v7044_v20, %v700_v47  ;;  %v1736_v59 = vunpack.c.l.b16 %v1380_v49  ;;  %v7121_v13 = vpack.c.b16 %v536_v63, %v535_v62  ;;  %v442_v40 = vld [vmem:[%s6877_s20 + $0xc8] sm:$0xff] }
  0xd2   : > { %v871_v54 = vrot.slane %v869_v43, 7  ;;  %v1172_v41 = vld [vmem:[#allocation2 + $0x2c] sm:$0x1]  ;;  %v382_v46 = vsel %vm6999_vm6, 0, %v381_v25  ;;  %v1175_v25 = vld [vmem:[#allocation2 + $0x30] sm:$0xf] }
  0xd3   : > { %v773_v4 = vmax.f32 %v701_v56, 0.0  ;;  %v1766_v5 = vpack.c.b16 %v1736_v59, %v1735_v44  ;;  %v1388_v6 = vor.u32 %v1387_v51, %v1384_v50  ;;  %9029 = vst [vmem:[#allocation14_spill] sm:$0xff] %v7121_v13  ;;  %v474_v56 = vpack.c.bf16 %v442_v40, %v442_v40 }
  0xd4   : > { %v874_v3 = vor.u32 %v872_v55, %v871_v54  ;;  %v875_v18 = vrot.slane %v871_v54, 4  ;;  %383 = vst [vmem:[#allocation2 + $0x44] sm:$0xf] %v382_v46  ;;  %v473_v55 = vpack.c.bf16 %v441_v38, %v441_v38 }
  0xd5   : > { %v805_v8 = vpack.c.bf16 %v773_v4, %v773_v4  ;;  %1858 = vmatmul.bf16.gmra.mxu1 %v1766_v5  ;;  %v6643_v10 = vld [vmem:[#allocation2 + $0x18] sm:$0xff]  ;;  %v1389_v22 = vrot.slane %v1388_v6, 4 }
  0xd6   : > { %v1169_v7 = vsel %vm6999_vm6, %v874_v3, %v1168_v60  ;;  %v1271_v11 = vld [vmem:[#allocation2 + $0x1c] sm:$0xf]  ;;  %v1316_v15 = vld [vmem:[#allocation2 + $0x20] sm:$0x1]  ;;  %2096 = vmatmul.bf16.gmra.mxu2 %v6643_v10  ;;  %v333_v3 = vld [vmem:[#allocation2 + $0x48] sm:$0x1] }
  0xd7   : > { %1170 = vst [vmem:[#allocation2 + $0x24] sm:$0xf] %v1169_v7  ;;  %v2234_v16 = vrot.slane %v1271_v11, 5  ;;  %v1391_v17 = vshll.u32 %v1271_v11, 16  ;;  %v877_v19 = vshrl.u32 %v805_v8, 16  ;;  %v1395_v24 = vshrl.u32 %v1271_v11, 16 }
  0xd8   : > { %v703_v26 = vpop.f32.mrf.mxu0  ;;  %v2237_v30 = vrot.slane %v1316_v15, 5  ;;  %v880_v34 = vshll.u32 %v805_v8, 16  ;;  %v1401_v45 = vshll.u32 %v1316_v15, 16  ;;  %v334_v10 = vsel %vm6954_vm3, 0, %v333_v3 }
  0xd9   : > { %v2235_v27 = vsel %vm7006_vm9, %v6151_v12, %v2234_v16  ;;  %v2236_v29 = vrot.slane %v2234_v16, 4  ;;  %v1393_v31 = vrot.slane %v1391_v17, 5  ;;  %v879_v32 = vrot.slane %v877_v19, 7  ;;  %335 = vst [vmem:[#allocation2 + $0x48] sm:$0x1] %v334_v10 }
  0xda   : > { %v704_v36 = vadd.f32 %v7044_v20, %v703_v26  ;;  %v1397_v37 = vrot.slane %v1395_v24, 4  ;;  %v2350_v44 = vunpack.c.l.b16 %v2235_v27  ;;  %v1403_v5 = vrot.slane %v1401_v45, 5 }
  0xdb   : > { %v2238_v43 = vsel %vm7006_vm9, %v2236_v29, %v2237_v30  ;;  %v882_v47 = vor.u32 %v880_v34, %v879_v32  ;;  %v884_v49 = vrot.slane %v879_v32, 4  ;;  %6016 = vmatmul.msk.bf16.gmra.mxu0 %vm561_vm0, %v7121_v13  ;;  %v1394_v53 = vsel %vm7027_vm12, %v1389_v22, %v1393_v31 }
  0xdc   : > { %v774_v50 = vmax.f32 %v704_v36, 0.0  ;;  %v2351_v51 = vunpack.c.l.b16 %v2238_v43  ;;  %v1398_v54 = vor.u32 %v1397_v37, %v1393_v31  ;;  %v1737_v15 = vunpack.c.l.b16 %v1394_v53  ;;  %v384_v53 = vld [vmem:[#allocation2 + $0x50] sm:$0xf] }
  0xdd   : > { %v883_v59 = vsel %vm7072_vm14, %v875_v18, %v882_v47  ;;  %v1173_v60 = vsel %vm6954_vm3, %v884_v49, %v1172_v41  ;;  %v537_v26 = vunpack.c.l.b16 %v473_v55  ;;  %v538_v27 = vunpack.c.l.b16 %v474_v56 }
  0xde   : > { %v806_v62 = vpack.c.bf16 %v774_v50, %v774_v50  ;;  %v2380_v63 = vpack.c.b16 %v2351_v51, %v2350_v44  ;;  %v1272_v2 = vld [vmem:[#allocation2 + $0x24] sm:$0xf]  ;;  %1171 = vst [vmem:[#allocation2 + $0x28] sm:$0xf] %v883_v59  ;;  %v1399_v4 = vrot.slane %v1398_v54, 4 }
  0xdf   : > { %v1406_v6 = vshrl.u32 %v1272_v2, 16  ;;  %v1409_v7 = vshll.u32 %v1272_v2, 16  ;;  %1174 = vst [vmem:[#allocation2 + $0x2c] sm:$0x1] %v1173_v60  ;;  %v2170_v29 = vld [vmem:[#allocation2 + $0x24] sm:$0xe]  ;;  %v7147_v43 = vpack.c.b16 %v538_v27, %v537_v26 }
  0xe0   : > { %v886_v8 = vshrl.u32 %v806_v62, 16  ;;  %2476 = vmatmul.bf16.gmra.mxu3 %v2380_v63  ;;  %v705_v11 = vpop.f32.mrf.mxu0  ;;  %v1404_v12 = vsel %vm7027_vm12, %v1399_v4, %v1403_v5  ;;  %v889_v19 = vshll.u32 %v806_v62, 16  ;;  %v6152_v41 = vrot.slane %v2170_v29, 9  ;;  %v443_v4 = vld [vmem:[%s6877_s20 + $0xd0] sm:$0xff]  ;;  %v444_v5 = vld [vmem:[%s6877_s20 + $0xd8] sm:$0xff] }
  0xe1   : > { %v1408_v16 = vrot.slane %v1406_v6, 4  ;;  %v1411_v17 = vrot.slane %v1409_v7, 5  ;;  %v706_v22 = vadd.f32 %v7044_v20, %v705_v11  ;;  %v1738_v24 = vunpack.c.l.b16 %v1404_v12  ;;  %9030 = vst [vmem:[#allocation15_spill] sm:$0xff] %v7147_v43  ;;  %v1179_v6 = vld [vmem:[#allocation2 + $0x38] sm:$0x1] }
  0xe2   : > { %v888_v18 = vrot.slane %v886_v8, 7  ;;  %v385_v11 = vsel %vm6999_vm6, 0, %v384_v53 }
  0xe3   : > { %v775_v31 = vmax.f32 %v706_v22, 0.0  ;;  %v1767_v32 = vpack.c.b16 %v1738_v24, %v1737_v15  ;;  %v1412_v34 = vor.u32 %v1411_v17, %v1408_v16  ;;  %386 = vst [vmem:[#allocation2 + $0x50] sm:$0xf] %v385_v11  ;;  %v475_v22 = vpack.c.bf16 %v443_v4, %v443_v4 }
  0xe4   : > { %v891_v30 = vor.u32 %v889_v19, %v888_v18  ;;  %v892_v47 = vrot.slane %v888_v18, 4  ;;  %v476_v24 = vpack.c.bf16 %v444_v5, %v444_v5 }
  0xe5   : > { %v807_v37 = vpack.c.bf16 %v775_v31, %v775_v31  ;;  %1863 = vmatmul.bf16.gmra.mxu1 %v1767_v32  ;;  %v6644_v38 = vld [vmem:[#allocation2 + $0x24] sm:$0xff]  ;;  %v1413_v50 = vrot.slane %v1412_v34, 4  ;;  %v336_v31 = vld [vmem:[#allocation2 + $0x54] sm:$0x1] }
  0xe6   : > { %v1176_v36 = vsel %vm6999_vm6, %v891_v30, %v1175_v25  ;;  %v1273_v40 = vld [vmem:[#allocation2 + $0x28] sm:$0xf]  ;;  %v1317_v44 = vld [vmem:[#allocation2 + $0x2c] sm:$0x1]  ;;  %2101 = vmatmul.bf16.gmra.mxu2 %v6644_v38 }
  0xe7   : > { %1177 = vst [vmem:[#allocation2 + $0x30] sm:$0xf] %v1176_v36  ;;  %v2241_v45 = vrot.slane %v1273_v40, 5  ;;  %v1415_v46 = vshll.u32 %v1273_v40, 16  ;;  %v894_v49 = vshrl.u32 %v807_v37, 16  ;;  %v1419_v51 = vshrl.u32 %v1273_v40, 16 }
  0xe8   : > { %v708_v54 = vpop.f32.mrf.mxu0  ;;  %v2244_v59 = vrot.slane %v1317_v44, 5  ;;  %v897_v63 = vshll.u32 %v807_v37, 16  ;;  %v1425_v10 = vshll.u32 %v1317_v44, 16  ;;  %v6710_v44 = vld [vmem:[%s8983_s3 + $0x128] sm:$0xff] }
  0xe9   : > { %v2242_v55 = vsel %vm7006_vm9, %v6152_v41, %v2241_v45  ;;  %v2243_v56 = vrot.slane %v2241_v45, 4  ;;  %v1417_v60 = vrot.slane %v1415_v46, 5  ;;  %v896_v62 = vrot.slane %v894_v49, 7  ;;  %v6702_v41 = vld [vmem:[%s8983_s3 + $0xe8] sm:$0xff]  ;;  %3454 = vmatpush.bf16.msrb.mxu1 %v6710_v44 }
  0xea   : > { %v709_v2 = vadd.f32 %v7044_v20, %v708_v54  ;;  %v1421_v3 = vrot.slane %v1419_v51, 4  ;;  %v2352_v8 = vunpack.c.l.b16 %v2242_v55  ;;  %v1427_v34 = vrot.slane %v1425_v10, 5  ;;  %2773 = vmatpush.bf16.msrb.mxu0 %v6702_v41  ;;  %v1186_v41 = vld [vmem:[#allocation2 + $0x44] sm:$0x1] }
  0xeb   : > { %v2245_v7 = vsel %vm7006_vm9, %v2243_v56, %v2244_v59  ;;  %v899_v12 = vor.u32 %v897_v63, %v896_v62  ;;  %v901_v15 = vrot.slane %v896_v62, 4  ;;  %6017 = vmatmul.msk.bf16.gmra.mxu0 %vm561_vm0, %v7147_v43  ;;  %v1418_v18 = vsel %vm7027_vm12, %v1413_v50, %v1417_v60  ;;  %v1182_v56 = vld [vmem:[#allocation2 + $0x3c] sm:$0xf] }
  0xec   : > { %v776_v16 = vmax.f32 %v709_v2, 0.0  ;;  %v2353_v17 = vunpack.c.l.b16 %v2245_v7  ;;  %v1422_v19 = vor.u32 %v1421_v3, %v1417_v60  ;;  %v1739_v40 = vunpack.c.l.b16 %v1418_v18 }
  0xed   : > { %v900_v25 = vsel %vm7072_vm14, %v892_v47, %v899_v12  ;;  %v1180_v26 = vsel %vm6954_vm3, %v901_v15, %v1179_v6  ;;  %v337_v50 = vsel %vm6954_vm3, 0, %v336_v31  ;;  %v539_v59 = vunpack.c.l.b16 %v475_v22  ;;  %v6701_v31 = vld [vmem:[%s8983_s3 + $0xe0] sm:$0xff] }
  0xee   : > { %v808_v27 = vpack.c.bf16 %v776_v16, %v776_v16  ;;  %v2381_v29 = vpack.c.b16 %v2353_v17, %v2352_v8  ;;  %v1274_v30 = vld [vmem:[#allocation2 + $0x30] sm:$0xf]  ;;  %1178 = vst [vmem:[#allocation2 + $0x34] sm:$0xf] %v900_v25  ;;  %v1423_v32 = vrot.slane %v1422_v19, 4  ;;  %v540_v60 = vunpack.c.l.b16 %v476_v24  ;;  %2774 = vmatpush.bf16.msrb.mxu0 %v6701_v31 }
  0xef   : > { %v1430_v36 = vshrl.u32 %v1274_v30, 16  ;;  %v1433_v37 = vshll.u32 %v1274_v30, 16  ;;  %1181 = vst [vmem:[#allocation2 + $0x38] sm:$0x1] %v1180_v26  ;;  %v2171_v62 = vld [vmem:[#allocation2 + $0x30] sm:$0xe] }
  0xf0   : > { %v903_v38 = vshrl.u32 %v808_v27, 16  ;;  %2481 = vmatmul.bf16.gmra.mxu3 %v2381_v29  ;;  %v710_v45 = vpop.f32.mrf.mxu0  ;;  %v1428_v46 = vsel %vm7027_vm12, %v1423_v32, %v1427_v34  ;;  %v906_v53 = vshll.u32 %v808_v27, 16  ;;  %338 = vst [vmem:[#allocation2 + $0x54] sm:$0x1] %v337_v50  ;;  %v6153_v10 = vrot.slane %v2171_v62, 9 }
  0xf1   : > { %v1432_v47 = vrot.slane %v1430_v36, 4  ;;  %v1435_v49 = vrot.slane %v1433_v37, 5  ;;  %v711_v54 = vadd.f32 %v7044_v20, %v710_v45  ;;  %v1740_v55 = vunpack.c.l.b16 %v1428_v46  ;;  %v387_v24 = vld [vmem:[#allocation2 + $0x5c] sm:$0xf] }
  0xf2   : > { %v7176_v51 = vrot.slane %v903_v38, 7  ;;  %v7182_v11 = vpack.c.b16 %v540_v60, %v539_v59  ;;  %v445_v38 = vld [vmem:[%s6877_s20 + $0xe0] sm:$0xff]  ;;  %v6700_v60 = vld [vmem:[%s8983_s3 + $0xd8] sm:$0xff] }
  0xf3   : > { %v777_v2 = vmax.f32 %v711_v54, 0.0  ;;  %v1768_v3 = vpack.c.b16 %v1740_v55, %v1739_v40  ;;  %v1436_v4 = vor.u32 %v1435_v49, %v1432_v47  ;;  %v446_v40 = vld [vmem:[%s6877_s20 + $0xe8] sm:$0xff]  ;;  %v388_v47 = vsel %vm6999_vm6, 0, %v387_v24  ;;  %2775 = vmatpush.bf16.msrb.mxu0 %v6700_v60  ;;  %v6699_v24 = vld [vmem:[%s8983_s3 + $0xd0] sm:$0xff] }
  0xf4   : > { %v908_v63 = vor.u32 %v906_v53, %v7176_v51  ;;  %9031 = vst [vmem:[#allocation16_spill] sm:$0xff] %v7182_v11  ;;  %v909_v17 = vrot.slane %v7176_v51, 4  ;;  %v478_v59 = vpack.c.bf16 %v446_v40, %v446_v40 }
  0xf5   : > { %v809_v6 = vpack.c.bf16 %v777_v2, %v777_v2  ;;  %1868 = vmatmul.bf16.gmra.mxu1 %v1768_v3  ;;  %v6645_v7 = vld [vmem:[#allocation2 + $0x30] sm:$0xff]  ;;  %v1437_v19 = vrot.slane %v1436_v4, 4  ;;  %389 = vst [vmem:[#allocation2 + $0x5c] sm:$0xf] %v388_v47 }
  0xf6   : > { %v1183_v5 = vsel %vm6999_vm6, %v908_v63, %v1182_v56  ;;  %v1275_v8 = vld [vmem:[#allocation2 + $0x34] sm:$0xf]  ;;  %v1318_v12 = vld [vmem:[#allocation2 + $0x38] sm:$0x1]  ;;  %2106 = vmatmul.bf16.gmra.mxu2 %v6645_v7  ;;  %v477_v56 = vpack.c.bf16 %v445_v38, %v445_v38 }
  0xf7   : > { %1184 = vst [vmem:[#allocation2 + $0x3c] sm:$0xf] %v1183_v5  ;;  %v2248_v15 = vrot.slane %v1275_v8, 5  ;;  %v1439_v16 = vshll.u32 %v1275_v8, 16  ;;  %v911_v18 = vshrl.u32 %v809_v6, 16  ;;  %v1443_v22 = vshrl.u32 %v1275_v8, 16  ;;  %2776 = vmatpush.bf16.msrb.mxu0 %v6699_v24 }
  0xf8   : > { %v713_v25 = vpop.f32.mrf.mxu0  ;;  %v2251_v29 = vrot.slane %v1318_v12, 5  ;;  %v914_v34 = vshll.u32 %v809_v6, 16  ;;  %v1449_v46 = vshll.u32 %v1318_v12, 16  ;;  %v339_v5 = vld [vmem:[#allocation2 + $0x60] sm:$0x1]  ;;  %v541_v31 = vunpack.c.l.b16 %v477_v56 }
  0xf9   : > { %v2249_v26 = vsel %vm7006_vm9, %v6153_v10, %v2248_v15  ;;  %v2250_v27 = vrot.slane %v2248_v15, 4  ;;  %v1441_v30 = vrot.slane %v1439_v16, 5  ;;  %v913_v32 = vrot.slane %v911_v18, 7  ;;  %v7664_v57 = vld [vmem:[#allocation2 + $0x38] sm:$0x1] }
  0xfa   : > { %v714_v36 = vadd.f32 %v7044_v20, %v713_v25  ;;  %v1445_v37 = vrot.slane %v1443_v22, 4  ;;  %v2354_v45 = vunpack.c.l.b16 %v2249_v26  ;;  %v1451_v7 = vrot.slane %v1449_v46, 5 }
  0xfb   : > { %v2252_v44 = vsel %vm7006_vm9, %v2250_v27, %v2251_v29  ;;  %v916_v49 = vor.u32 %v914_v34, %v913_v32  ;;  %v918_v50 = vrot.slane %v913_v32, 4  ;;  %6018 = vmatmul.msk.bf16.gmra.mxu0 %vm561_vm0, %v7182_v11  ;;  %v1442_v54 = vsel %vm7027_vm12, %v1437_v19, %v1441_v30 }
  0xfc   : > { %v778_v51 = vmax.f32 %v714_v36, 0.0  ;;  %v2355_v53 = vunpack.c.l.b16 %v2252_v44  ;;  %v1446_v55 = vor.u32 %v1445_v37, %v1441_v30  ;;  %v340_v15 = vsel %vm6954_vm3, 0, %v339_v5  ;;  %v1189_v30 = vld [vmem:[#allocation2 + $0x48] sm:$0xf] }
  0xfd   : > { %v917_v62 = vsel %vm7072_vm14, %v909_v17, %v916_v49  ;;  %v1187_v63 = vsel %vm6954_vm3, %v918_v50, %v1186_v41  ;;  %v1741_v18 = vunpack.c.l.b16 %v1442_v54  ;;  %341 = vst [vmem:[#allocation2 + $0x60] sm:$0x1] %v340_v15  ;;  %v542_v32 = vunpack.c.l.b16 %v478_v59  ;;  %v6698_v41 = vld [vmem:[%s8983_s3 + $0xc8] sm:$0xff]  ;;  %v447_v15 = vld [vmem:[%s6877_s20 + $0xf0] sm:$0xff] }
  0xfe   : > { %v810_v2 = vpack.c.bf16 %v778_v51, %v778_v51  ;;  %v2382_v3 = vpack.c.b16 %v2355_v53, %v2354_v45  ;;  %v1276_v4 = vld [vmem:[#allocation2 + $0x3c] sm:$0xf]  ;;  %1185 = vst [vmem:[#allocation2 + $0x40] sm:$0xf] %v917_v62  ;;  %v1447_v6 = vrot.slane %v1446_v55, 4  ;;  %2777 = vmatpush.bf16.msrb.mxu0 %v6698_v41  ;;  %v5076_v42 = vrot.slane %v7664_v57, 5 }
  0xff   : > { %v1454_v8 = vshrl.u32 %v1276_v4, 16  ;;  %v1457_v10 = vshll.u32 %v1276_v4, 16  ;;  %1188 = vst [vmem:[#allocation2 + $0x44] sm:$0x1] %v1187_v63  ;;  %v2172_v34 = vld [vmem:[#allocation2 + $0x3c] sm:$0xe]  ;;  %v7221_v50 = vpack.c.b16 %v542_v32, %v541_v31  ;;  %v479_v32 = vpack.c.bf16 %v447_v15, %v447_v15 }
 0x100   : > { %v920_v12 = vshrl.u32 %v810_v2, 16  ;;  %2486 = vmatmul.bf16.gmra.mxu3 %v2382_v3  ;;  %v715_v16 = vpop.f32.mrf.mxu0  ;;  %v1452_v17 = vsel %vm7027_vm12, %v1447_v6, %v1451_v7  ;;  %v923_v26 = vshll.u32 %v810_v2, 16  ;;  %v6154_v49 = vrot.slane %v2172_v34, 9  ;;  %v390_v62 = vld [vmem:[#allocation2 + $0x68] sm:$0xf]  ;;  %v6697_v6 = vld [vmem:[%s8983_s3 + $0xc0] sm:$0xff] }
 0x101   : > { %v1456_v19 = vrot.slane %v1454_v8, 4  ;;  %v1459_v22 = vrot.slane %v1457_v10, 5  ;;  %v716_v27 = vadd.f32 %v7044_v20, %v715_v16  ;;  %v1742_v29 = vunpack.c.l.b16 %v1452_v17  ;;  %9032 = vst [vmem:[#allocation17_spill] sm:$0xff] %v7221_v50  ;;  %v448_v16 = vld [vmem:[%s6877_s20 + $0xf8] sm:$0xff]  ;;  %v1193_v17 = vld [vmem:[#allocation2 + $0x50] sm:$0x1] }
 0x102   : > { %v922_v25 = vrot.slane %v920_v12, 7  ;;  %v391_v24 = vsel %vm6999_vm6, 0, %v390_v62  ;;  %2778 = vmatpush.bf16.msrb.mxu0 %v6697_v6  ;;  %v480_v34 = vpack.c.bf16 %v448_v16, %v448_v16  ;;  %v543_v6 = vunpack.c.l.b16 %v479_v32 }
 0x103   : > { %v779_v37 = vmax.f32 %v716_v27, 0.0  ;;  %v1769_v38 = vpack.c.b16 %v1742_v29, %v1741_v18  ;;  %v1460_v40 = vor.u32 %v1459_v22, %v1456_v19  ;;  %392 = vst [vmem:[#allocation2 + $0x68] sm:$0xf] %v391_v24 }
 0x104   : > { %v925_v36 = vor.u32 %v923_v26, %v922_v25  ;;  %v926_v55 = vrot.slane %v922_v25, 4 }
 0x105   : > { %v811_v45 = vpack.c.bf16 %v779_v37, %v779_v37  ;;  %1873 = vmatmul.bf16.gmra.mxu1 %v1769_v38  ;;  %v6646_v46 = vld [vmem:[#allocation2 + $0x3c] sm:$0xff]  ;;  %v1461_v59 = vrot.slane %v1460_v40, 4 }
 0x106   : > { %v1190_v44 = vsel %vm6999_vm6, %v925_v36, %v1189_v30  ;;  %v1277_v47 = vld [vmem:[#allocation2 + $0x40] sm:$0xf]  ;;  %v1319_v51 = vld [vmem:[#allocation2 + $0x44] sm:$0x1]  ;;  %2111 = vmatmul.bf16.gmra.mxu2 %v6646_v46 }
 0x107   : > { %1191 = vst [vmem:[#allocation2 + $0x48] sm:$0xf] %v1190_v44  ;;  %v2255_v53 = vrot.slane %v1277_v47, 5  ;;  %v1463_v54 = vshll.u32 %v1277_v47, 16  ;;  %v928_v56 = vshrl.u32 %v811_v45, 16  ;;  %v1467_v60 = vshrl.u32 %v1277_v47, 16 }
 0x108   : > { %v718_v63 = vpop.f32.mrf.mxu0  ;;  %v2258_v4 = vrot.slane %v1319_v51, 5  ;;  %v931_v8 = vshll.u32 %v811_v45, 16  ;;  %v1473_v22 = vshll.u32 %v1319_v51, 16  ;;  %v342_v44 = vld [vmem:[#allocation2 + $0x6c] sm:$0x1] }
 0x109   : > { %v2256_v2 = vsel %vm7006_vm9, %v6154_v49, %v2255_v53  ;;  %v2257_v3 = vrot.slane %v2255_v53, 4  ;;  %v1465_v5 = vrot.slane %v1463_v54, 5  ;;  %v930_v7 = vrot.slane %v928_v56, 7  ;;  %v6709_v53 = vld [vmem:[%s8983_s3 + $0x120] sm:$0xff] }
 0x10a   : > { %v719_v10 = vadd.f32 %v7044_v20, %v718_v63  ;;  %v1469_v12 = vrot.slane %v1467_v60, 4  ;;  %v2356_v19 = vunpack.c.l.b16 %v2256_v2  ;;  %v1475_v46 = vrot.slane %v1473_v22, 5  ;;  %3455 = vmatpush.bf16.msrb.mxu1 %v6709_v53  ;;  %v2905_v28 = vld [vmem:[#allocation2 + $0x40] sm:$0xf] }
 0x10b   : > { %v2259_v18 = vsel %vm7006_vm9, %v2257_v3, %v2258_v4  ;;  %v933_v25 = vor.u32 %v931_v8, %v930_v7  ;;  %v935_v26 = vrot.slane %v930_v7, 4  ;;  %6019 = vmatmul.msk.bf16.gmra.mxu0 %vm561_vm0, %v7221_v50  ;;  %v1466_v30 = vsel %vm7027_vm12, %v1461_v59, %v1465_v5 }
 0x10c   : > { %v780_v27 = vmax.f32 %v719_v10, 0.0  ;;  %v2357_v29 = vunpack.c.l.b16 %v2259_v18  ;;  %v1470_v31 = vor.u32 %v1469_v12, %v1465_v5  ;;  %v343_v54 = vsel %vm6954_vm3, 0, %v342_v44  ;;  %v1196_v5 = vld [vmem:[#allocation2 + $0x54] sm:$0xf] }
 0x10d   : > { %v934_v36 = vsel %vm7072_vm14, %v926_v55, %v933_v25  ;;  %v1194_v37 = vsel %vm6954_vm3, %v935_v26, %v1193_v17  ;;  %v1743_v59 = vunpack.c.l.b16 %v1466_v30  ;;  %344 = vst [vmem:[#allocation2 + $0x6c] sm:$0x1] %v343_v54  ;;  %v544_v7 = vunpack.c.l.b16 %v480_v34  ;;  %v393_v44 = vld [vmem:[#allocation2 + $0x74] sm:$0xf] }
 0x10e   : > { %v812_v38 = vpack.c.bf16 %v780_v27, %v780_v27  ;;  %v2383_v40 = vpack.c.b16 %v2357_v29, %v2356_v19  ;;  %v1278_v41 = vld [vmem:[#allocation2 + $0x48] sm:$0xf]  ;;  %1192 = vst [vmem:[#allocation2 + $0x4c] sm:$0xf] %v934_v36  ;;  %v1471_v45 = vrot.slane %v1470_v31, 4 }
 0x10f   : > { %v1478_v47 = vshrl.u32 %v1278_v41, 16  ;;  %v1481_v49 = vshll.u32 %v1278_v41, 16  ;;  %1195 = vst [vmem:[#allocation2 + $0x50] sm:$0x1] %v1194_v37  ;;  %v2173_v8 = vld [vmem:[#allocation2 + $0x48] sm:$0xe]  ;;  %v7253_v25 = vpack.c.b16 %v544_v7, %v543_v6 }
 0x110   : > { %v937_v51 = vshrl.u32 %v812_v38, 16  ;;  %2491 = vmatmul.bf16.gmra.mxu3 %v2383_v40  ;;  %v720_v55 = vpop.f32.mrf.mxu0  ;;  %v1476_v56 = vsel %vm7027_vm12, %v1471_v45, %v1475_v46  ;;  %v940_v2 = vshll.u32 %v812_v38, 16  ;;  %v6155_v24 = vrot.slane %v2173_v8, 9 }
 0x111   : > { %v1480_v60 = vrot.slane %v1478_v47, 4  ;;  %v1483_v62 = vrot.slane %v1481_v49, 5  ;;  %v721_v3 = vadd.f32 %v7044_v20, %v720_v55  ;;  %v1744_v4 = vunpack.c.l.b16 %v1476_v56  ;;  %9033 = vst [vmem:[#allocation18_spill] sm:$0xff] %v7253_v25 }
 0x112   : > { %v939_v63 = vrot.slane %v937_v51, 7  ;;  %v1200_v51 = vld [vmem:[#allocation2 + $0x5c] sm:$0x1]  ;;  %v394_v56 = vsel %vm6999_vm6, 0, %v393_v44 }
 0x113   : > { %v781_v12 = vmax.f32 %v721_v3, 0.0  ;;  %v1770_v15 = vpack.c.b16 %v1744_v4, %v1743_v59  ;;  %v1484_v16 = vor.u32 %v1483_v62, %v1480_v60  ;;  %395 = vst [vmem:[#allocation2 + $0x74] sm:$0xf] %v394_v56  ;;  %v2467_v56 = vpop.f32.mrf.mxu3 }
 0x114   : > { %v942_v10 = vor.u32 %v940_v2, %v939_v63  ;;  %v943_v30 = vrot.slane %v939_v63, 4 }
 0x115   : > { %v813_v18 = vpack.c.bf16 %v781_v12, %v781_v12  ;;  %1878 = vmatmul.bf16.gmra.mxu1 %v1770_v15  ;;  %v6647_v19 = vld [vmem:[#allocation2 + $0x48] sm:$0xff]  ;;  %v1485_v32 = vrot.slane %v1484_v16, 4 }
 0x116   : > { %v1197_v17 = vsel %vm6999_vm6, %v942_v10, %v1196_v5  ;;  %v1279_v22 = vld [vmem:[#allocation2 + $0x4c] sm:$0xf]  ;;  %v1320_v26 = vld [vmem:[#allocation2 + $0x50] sm:$0x1]  ;;  %2116 = vmatmul.bf16.gmra.mxu2 %v6647_v19 }
 0x117   : > { %1198 = vst [vmem:[#allocation2 + $0x54] sm:$0xf] %v1197_v17  ;;  %v2262_v27 = vrot.slane %v1279_v22, 5  ;;  %v1487_v29 = vshll.u32 %v1279_v22, 16  ;;  %v945_v31 = vshrl.u32 %v813_v18, 16  ;;  %v1491_v34 = vshrl.u32 %v1279_v22, 16 }
 0x118   : > { %v723_v36 = vpop.f32.mrf.mxu0  ;;  %v2265_v40 = vrot.slane %v1320_v26, 5  ;;  %v948_v46 = vshll.u32 %v813_v18, 16  ;;  %v1497_v55 = vshll.u32 %v1320_v26, 16  ;;  %v345_v18 = vld [vmem:[#allocation2 + $0x78] sm:$0x1] }
 0x119   : > { %v2263_v37 = vsel %vm7006_vm9, %v6155_v24, %v2262_v27  ;;  %v2264_v38 = vrot.slane %v2262_v27, 4  ;;  %v1489_v41 = vrot.slane %v1487_v29, 5  ;;  %v947_v45 = vrot.slane %v945_v31, 7  ;;  %v7277_v31 = vld [vmem:[%s8982_s2] ss:$0 sm:$0xff] }
 0x11a   : > { %v724_v47 = vadd.f32 %v7044_v20, %v723_v36  ;;  %v1493_v49 = vrot.slane %v1491_v34, 4  ;;  %v2358_v54 = vunpack.c.l.b16 %v2263_v37  ;;  %v1499_v10 = vrot.slane %v1497_v55, 5  ;;  %v1203_v36 = vld [vmem:[#allocation2 + $0x60] sm:$0xf] }
 0x11b   : > { %v2266_v53 = vsel %vm7006_vm9, %v2264_v38, %v2265_v40  ;;  %v950_v59 = vor.u32 %v948_v46, %v947_v45  ;;  %v952_v60 = vrot.slane %v947_v45, 4  ;;  %6020 = vmatmul.msk.bf16.gmra.mxu0 %vm561_vm0, %v7253_v25  ;;  %v1490_v20 = vsel %vm7027_vm12, %v1485_v32, %v1489_v41  ;;  %v1854_v45 = vpop.f32.mrf.mxu1  ;;  %v2087_v46 = vpop.f32.mrf.mxu2 }
 0x11c   : > { %v782_v62 = vmax.f32 %v724_v47, 0.0  ;;  %v2359_v63 = vunpack.c.l.b16 %v2266_v53  ;;  %v1494_v2 = vor.u32 %v1493_v49, %v1489_v41  ;;  %v1745_v17 = vunpack.c.l.b16 %v1490_v20 }
 0x11d   : > { %v951_v3 = vsel %vm7072_vm14, %v943_v30, %v950_v59  ;;  %v1201_v4 = vsel %vm6954_vm3, %v952_v60, %v1200_v51  ;;  %v346_v27 = vsel %vm6954_vm3, 0, %v345_v18  ;;  %v2088_v47 = vadd.f32 %v2087_v46, %v1854_v45  ;;  %v6681_v18 = vld [vmem:[#allocation2 + $0xc] sm:$0xff] }
 0x11e   : > { %v814_v5 = vpack.c.bf16 %v782_v62, %v782_v62  ;;  %v2384_v6 = vpack.c.b16 %v2359_v63, %v2358_v54  ;;  %v1280_v7 = vld [vmem:[#allocation2 + $0x54] sm:$0xf]  ;;  %1199 = vst [vmem:[#allocation2 + $0x58] sm:$0xf] %v951_v3  ;;  %v1495_v8 = vrot.slane %v1494_v2, 4 }
 0x11f   : > { %v1502_v12 = vshrl.u32 %v1280_v7, 16  ;;  %v1505_v15 = vshll.u32 %v1280_v7, 16  ;;  %1202 = vst [vmem:[#allocation2 + $0x5c] sm:$0x1] %v1201_v4  ;;  %v2174_v37 = vld [vmem:[#allocation2 + $0x54] sm:$0xe]  ;;  %v7282_v63 = vadd.f32 %v2467_v56, %v2088_v47 }
 0x120   : > { %v954_v16 = vshrl.u32 %v814_v5, 16  ;;  %2496 = vmatmul.bf16.gmra.mxu3 %v2384_v6  ;;  %v725_v19 = vpop.f32.mrf.mxu0  ;;  %v1500_v22 = vsel %vm7027_vm12, %v1495_v8, %v1499_v10  ;;  %v957_v30 = vshll.u32 %v814_v5, 16  ;;  %347 = vst [vmem:[#allocation2 + $0x78] sm:$0x1] %v346_v27  ;;  %v6156_v55 = vrot.slane %v2174_v37, 9 }
 0x121   : > { %v1504_v24 = vrot.slane %v1502_v12, 4  ;;  %v1507_v26 = vrot.slane %v1505_v15, 5  ;;  %v726_v32 = vadd.f32 %v7277_v31, %v725_v19  ;;  %v1746_v34 = vunpack.c.l.b16 %v1500_v22  ;;  %v396_v5 = vld [vmem:[#allocation2 + $0x80] sm:$0xf]  ;;  %v1207_v22 = vld [vmem:[#allocation2 + $0x68] sm:$0x1] }
 0x122   : > { %v956_v29 = vrot.slane %v954_v16, 7 }
 0x123   : > { %v783_v40 = vmax.f32 %v726_v32, 0.0  ;;  %v1771_v41 = vpack.c.b16 %v1746_v34, %v1745_v17  ;;  %v1508_v44 = vor.u32 %v1507_v26, %v1504_v24 }
 0x124   : > { %v959_v38 = vor.u32 %v957_v30, %v956_v29  ;;  %v960_v20 = vrot.slane %v956_v29, 4  ;;  %v397_v29 = vsel %vm6999_vm6, 0, %v396_v5 }
 0x125   : > { %v815_v51 = vpack.c.bf16 %v783_v40, %v783_v40  ;;  %1883 = vmatmul.bf16.gmra.mxu1 %v1771_v41  ;;  %v6648_v53 = vld [vmem:[#allocation2 + $0x54] sm:$0xff]  ;;  %v1509_v3 = vrot.slane %v1508_v44, 4  ;;  %398 = vst [vmem:[#allocation2 + $0x80] sm:$0xf] %v397_v29 }
 0x126   : > { %v1204_v49 = vsel %vm6999_vm6, %v959_v38, %v1203_v36  ;;  %v1281_v54 = vld [vmem:[#allocation2 + $0x58] sm:$0xf]  ;;  %v1321_v59 = vld [vmem:[#allocation2 + $0x5c] sm:$0x1]  ;;  %2121 = vmatmul.bf16.gmra.mxu2 %v6648_v53 }
 0x127   : > { %1205 = vst [vmem:[#allocation2 + $0x60] sm:$0xf] %v1204_v49  ;;  %v2269_v60 = vrot.slane %v1281_v54, 5  ;;  %v1511_v62 = vshll.u32 %v1281_v54, 16  ;;  %v962_v2 = vshrl.u32 %v815_v51, 16  ;;  %v1515_v4 = vshrl.u32 %v1281_v54, 16 }
 0x128   : > { %v728_v6 = vpop.f32.mrf.mxu0  ;;  %v2272_v10 = vrot.slane %v1321_v59, 5  ;;  %v965_v16 = vshll.u32 %v815_v51, 16  ;;  %v1521_v27 = vshll.u32 %v1321_v59, 16 }
 0x129   : > { %v2270_v7 = vsel %vm7006_vm9, %v6156_v55, %v2269_v60  ;;  %v2271_v8 = vrot.slane %v2269_v60, 4  ;;  %v1513_v12 = vrot.slane %v1511_v62, 5  ;;  %v964_v15 = vrot.slane %v962_v2, 7  ;;  %v6708_v55 = vld [vmem:[%s8983_s3 + $0x118] sm:$0xff]  ;;  %v348_v2 = vld [vmem:[#allocation2 + $0x84] sm:$0x1] }
 0x12a   : > { %v729_v17 = vadd.f32 %v7277_v31, %v728_v6  ;;  %v1517_v19 = vrot.slane %v1515_v4, 4  ;;  %v2360_v26 = vunpack.c.l.b16 %v2270_v7  ;;  %v1523_v49 = vrot.slane %v1521_v27, 5  ;;  %3456 = vmatpush.bf16.msrb.mxu1 %v6708_v55  ;;  %v1210_v7 = vld [vmem:[#allocation2 + $0x6c] sm:$0xf]  ;;  %v1214_v55 = vld [vmem:[#allocation2 + $0x74] sm:$0x1] }
 0x12b   : > { %v2273_v24 = vsel %vm7006_vm9, %v2271_v8, %v2272_v10  ;;  %v967_v30 = vor.u32 %v965_v16, %v964_v15  ;;  %v969_v32 = vrot.slane %v964_v15, 4  ;;  %2779 = vmatmul.bf16.vlgmr.msrb.gmra.mxu0 %v6681_v18  ;;  %v1514_v37 = vsel %vm7027_vm12, %v1509_v3, %v1513_v12 }
 0x12c   : > { %v784_v34 = vmax.f32 %v729_v17, 0.0  ;;  %v2361_v36 = vunpack.c.l.b16 %v2273_v24  ;;  %v1518_v38 = vor.u32 %v1517_v19, %v1513_v12  ;;  %v1747_v62 = vunpack.c.l.b16 %v1514_v37 }
 0x12d   : > { %v968_v40 = vsel %vm7072_vm14, %v960_v20, %v967_v30  ;;  %v1208_v41 = vsel %vm6954_vm3, %v969_v32, %v1207_v22  ;;  %v349_v10 = vsel %vm6954_vm3, 0, %v348_v2 }
 0x12e   : > { %v816_v44 = vpack.c.bf16 %v784_v34, %v784_v34  ;;  %v2385_v45 = vpack.c.b16 %v2361_v36, %v2360_v26  ;;  %v1282_v46 = vld [vmem:[#allocation2 + $0x60] sm:$0xf]  ;;  %1206 = vst [vmem:[#allocation2 + $0x64] sm:$0xf] %v968_v40  ;;  %v1519_v47 = vrot.slane %v1518_v38, 4 }
 0x12f   : > { %v1526_v51 = vshrl.u32 %v1282_v46, 16  ;;  %1209 = vst [vmem:[#allocation2 + $0x68] sm:$0x1] %v1208_v41  ;;  %v1529_v54 = vshll.u32 %v1282_v46, 16  ;;  %v2175_v8 = vld [vmem:[#allocation2 + $0x60] sm:$0xe] }
 0x130   : > { %v971_v53 = vshrl.u32 %v816_v44, 16  ;;  %2501 = vmatmul.bf16.gmra.mxu3 %v2385_v45  ;;  %v974_v56 = vshll.u32 %v816_v44, 16  ;;  %v730_v59 = vpop.f32.mrf.mxu0  ;;  %v1524_v60 = vsel %vm7027_vm12, %v1519_v47, %v1523_v49  ;;  %350 = vst [vmem:[#allocation2 + $0x84] sm:$0x1] %v349_v10  ;;  %v6157_v26 = vrot.slane %v2175_v8, 9 }
 0x131   : > { %v1528_v20 = vrot.slane %v1526_v51, 4  ;;  %v731_v4 = vadd.f32 %v7277_v31, %v730_v59  ;;  %v1748_v5 = vunpack.c.l.b16 %v1524_v60  ;;  %v1531_v6 = vrot.slane %v1529_v54, 5  ;;  %v399_v38 = vld [vmem:[#allocation2 + $0x8c] sm:$0xf]  ;;  %v6682_v51 = vld [vmem:[#allocation2 + $0x18] sm:$0xff] }
 0x132   : > { %v973_v3 = vrot.slane %v971_v53, 7 }
 0x133   : > { %v785_v15 = vmax.f32 %v731_v4, 0.0  ;;  %v1772_v16 = vpack.c.b16 %v1748_v5, %v1747_v62  ;;  %v1532_v17 = vor.u32 %v1531_v6, %v1528_v20  ;;  %v400_v62 = vsel %vm6999_vm6, 0, %v399_v38 }
 0x134   : > { %v976_v12 = vor.u32 %v974_v56, %v973_v3  ;;  %v977_v27 = vrot.slane %v973_v3, 4  ;;  %401 = vst [vmem:[#allocation2 + $0x8c] sm:$0xf] %v400_v62 }
 0x135   : > { %v817_v19 = vpack.c.bf16 %v785_v15, %v785_v15  ;;  %1888 = vmatmul.bf16.gmra.mxu1 %v1772_v16  ;;  %v6649_v22 = vld [vmem:[#allocation2 + $0x60] sm:$0xff]  ;;  %v1533_v36 = vrot.slane %v1532_v17, 4 }
 0x136   : > { %v1211_v18 = vsel %vm6999_vm6, %v976_v12, %v1210_v7  ;;  %v1283_v24 = vld [vmem:[#allocation2 + $0x64] sm:$0xf]  ;;  %v1322_v29 = vld [vmem:[#allocation2 + $0x68] sm:$0x1]  ;;  %2126 = vmatmul.bf16.gmra.mxu2 %v6649_v22  ;;  %v6720_v22 = vld [vmem:[%s8983_s3 + $0x178] sm:$0xff] }
 0x137   : > { %1212 = vst [vmem:[#allocation2 + $0x6c] sm:$0xf] %v1211_v18  ;;  %v2276_v30 = vrot.slane %v1283_v24, 5  ;;  %v979_v32 = vshrl.u32 %v817_v19, 16  ;;  %v982_v34 = vshll.u32 %v817_v19, 16  ;;  %v1535_v37 = vshll.u32 %v1283_v24, 16  ;;  %3877 = vmatpush.bf16.msrb.mxu2 %v6720_v22 }
 0x138   : > { %v733_v40 = vpop.f32.mrf.mxu0  ;;  %v2279_v45 = vrot.slane %v1322_v29, 5  ;;  %v1539_v46 = vshrl.u32 %v1283_v24, 16  ;;  %v1545_v54 = vshll.u32 %v1322_v29, 16  ;;  %v6744_v24 = vld [vmem:[%s8983_s3 + $0x1b8] sm:$0xff]  ;;  %v6683_v22 = vld [vmem:[#allocation2 + $0x24] sm:$0xff] }
 0x139   : > { %v2277_v41 = vsel %vm7006_vm9, %v6157_v26, %v2276_v30  ;;  %v2278_v44 = vrot.slane %v2276_v30, 4  ;;  %v981_v47 = vrot.slane %v979_v32, 7  ;;  %v734_v49 = vadd.f32 %v7277_v31, %v733_v40  ;;  %4191 = vmatpush.bf16.msrb.mxu3 %v6744_v24 }
 0x13a   : > { %v1537_v53 = vrot.slane %v1535_v37, 5  ;;  %v2362_v59 = vunpack.c.l.b16 %v2277_v41  ;;  %v1541_v60 = vrot.slane %v1539_v46, 4  ;;  %v1547_v17 = vrot.slane %v1545_v54, 5  ;;  %v1217_v37 = vld [vmem:[#allocation2 + $0x78] sm:$0xf] }
 0x13b   : > { %v2280_v56 = vsel %vm7006_vm9, %v2278_v44, %v2279_v45  ;;  %v984_v20 = vor.u32 %v982_v34, %v981_v47  ;;  %v986_v2 = vrot.slane %v981_v47, 4  ;;  %v786_v3 = vmax.f32 %v734_v49, 0.0  ;;  %2784 = vmatmul.bf16.gmra.mxu0 %v6682_v51  ;;  %v351_v34 = vld [vmem:[#allocation2 + $0x90] sm:$0x1]  ;;  %v7331_v44 = vpop.f32.mrf.mxu2 }
 0x13c   : > { %v2363_v4 = vunpack.c.l.b16 %v2280_v56  ;;  %v1538_v5 = vsel %vm7027_vm12, %v1533_v36, %v1537_v53  ;;  %v1542_v6 = vor.u32 %v1541_v60, %v1537_v53  ;;  %v352_v41 = vsel %vm6954_vm3, 0, %v351_v34 }
 0x13d   : > { %v985_v7 = vsel %vm7072_vm14, %v977_v27, %v984_v20  ;;  %v1215_v8 = vsel %vm6954_vm3, %v986_v2, %v1214_v55  ;;  %v818_v10 = vpack.c.bf16 %v786_v3, %v786_v3  ;;  %v1749_v30 = vunpack.c.l.b16 %v1538_v5  ;;  %353 = vst [vmem:[#allocation2 + $0x90] sm:$0x1] %v352_v41 }
 0x13e   : > { %v2386_v12 = vpack.c.b16 %v2363_v4, %v2362_v59  ;;  %v1284_v15 = vld [vmem:[#allocation2 + $0x6c] sm:$0xf]  ;;  %1213 = vst [vmem:[#allocation2 + $0x70] sm:$0xf] %v985_v7  ;;  %v1543_v16 = vrot.slane %v1542_v6, 4 }
 0x13f   : > { %v1550_v18 = vshrl.u32 %v1284_v15, 16  ;;  %1216 = vst [vmem:[#allocation2 + $0x74] sm:$0x1] %v1215_v8  ;;  %v988_v19 = vshrl.u32 %v818_v10, 16  ;;  %v991_v26 = vshll.u32 %v818_v10, 16  ;;  %v1553_v32 = vshll.u32 %v1284_v15, 16 }
 0x140   : > { %2506 = vmatmul.bf16.gmra.mxu3 %v2386_v12  ;;  %v735_v27 = vpop.f32.mrf.mxu0  ;;  %v1548_v29 = vsel %vm7027_vm12, %v1543_v16, %v1547_v17  ;;  %v2176_v45 = vld [vmem:[#allocation2 + $0x6c] sm:$0xe]  ;;  %v402_v7 = vld [vmem:[#allocation2 + $0x98] sm:$0xf] }
 0x141   : > { %v990_v36 = vrot.slane %v988_v19, 7  ;;  %v736_v38 = vadd.f32 %v7277_v31, %v735_v27  ;;  %v1750_v40 = vunpack.c.l.b16 %v1548_v29  ;;  %v1552_v46 = vrot.slane %v1550_v18, 4  ;;  %v7337_v18 = vpop.f32.mrf.mxu3  ;;  %v1221_v27 = vld [vmem:[#allocation2 + $0x80] sm:$0x1]  ;;  %v7340_v29 = vpop.f32.mrf.mxu1 }
 0x142   : > { %v1555_v53 = vrot.slane %v1553_v32, 5  ;;  %v6158_v60 = vrot.slane %v2176_v45, 9 }
 0x143   : > { %v993_v47 = vor.u32 %v991_v26, %v990_v36  ;;  %v787_v49 = vmax.f32 %v736_v38, 0.0  ;;  %v1773_v51 = vpack.c.b16 %v1750_v40, %v1749_v30  ;;  %v994_v62 = vrot.slane %v990_v36, 4 }
 0x144   : > { %v1556_v5 = vor.u32 %v1555_v53, %v1552_v46 }
 0x145   : > { %v1218_v54 = vsel %vm6999_vm6, %v993_v47, %v1217_v37  ;;  %v819_v55 = vpack.c.bf16 %v787_v49, %v787_v49  ;;  %1893 = vmatmul.bf16.gmra.mxu1 %v1773_v51  ;;  %v6650_v56 = vld [vmem:[#allocation2 + $0x6c] sm:$0xff]  ;;  %v403_v37 = vsel %vm6999_vm6, 0, %v402_v7 }
 0x146   : > { %v1285_v59 = vld [vmem:[#allocation2 + $0x70] sm:$0xf]  ;;  %1219 = vst [vmem:[#allocation2 + $0x78] sm:$0xf] %v1218_v54  ;;  %v1323_v20 = vld [vmem:[#allocation2 + $0x74] sm:$0x1]  ;;  %2131 = vmatmul.bf16.gmra.mxu2 %v6650_v56 }
 0x147   : > { %v2283_v2 = vrot.slane %v1285_v59, 5  ;;  %v996_v3 = vshrl.u32 %v819_v55, 16  ;;  %v999_v4 = vshll.u32 %v819_v55, 16  ;;  %v1559_v6 = vshll.u32 %v1285_v59, 16  ;;  %404 = vst [vmem:[#allocation2 + $0x98] sm:$0xf] %v403_v37 }
 0x148   : > { %v738_v8 = vpop.f32.mrf.mxu0  ;;  %v2286_v15 = vrot.slane %v1323_v20, 5  ;;  %v1563_v16 = vshrl.u32 %v1285_v59, 16  ;;  %v1569_v26 = vshll.u32 %v1323_v20, 16  ;;  %v1557_v46 = vrot.slane %v1556_v5, 4 }
 0x149   : > { %v2284_v10 = vsel %vm7006_vm9, %v6158_v60, %v2283_v2  ;;  %v2285_v12 = vrot.slane %v2283_v2, 4  ;;  %v998_v17 = vrot.slane %v996_v3, 7  ;;  %v739_v19 = vadd.f32 %v7277_v31, %v738_v8  ;;  %v2092_v30 = vpop.f32.mrf.mxu2 }
 0x14a   : > { %v1561_v24 = vrot.slane %v1559_v6, 5  ;;  %v2364_v34 = vunpack.c.l.b16 %v2284_v10  ;;  %v1565_v36 = vrot.slane %v1563_v16, 4  ;;  %v1571_v59 = vrot.slane %v1569_v26, 5  ;;  %v354_v6 = vld [vmem:[#allocation2 + $0x9c] sm:$0x1] }
 0x14b   : > { %v2287_v32 = vsel %vm7006_vm9, %v2285_v12, %v2286_v15  ;;  %v1001_v38 = vor.u32 %v999_v4, %v998_v17  ;;  %v1003_v40 = vrot.slane %v998_v17, 4  ;;  %v788_v41 = vmax.f32 %v739_v19, 0.0  ;;  %2789 = vmatmul.bf16.gmra.mxu0 %v6683_v22  ;;  %v1224_v15 = vld [vmem:[#allocation2 + $0x84] sm:$0xf] }
 0x14c   : > { %v2365_v45 = vunpack.c.l.b16 %v2287_v32  ;;  %v1566_v47 = vor.u32 %v1565_v36, %v1561_v24  ;;  %v1562_v2 = vsel %vm7027_vm12, %v1557_v46, %v1561_v24  ;;  %v355_v24 = vsel %vm6954_vm3, 0, %v354_v6  ;;  %v6684_v6 = vld [vmem:[#allocation2 + $0x30] sm:$0xff] }
 0x14d   : > { %v1002_v49 = vsel %vm7072_vm14, %v994_v62, %v1001_v38  ;;  %v1222_v51 = vsel %vm6954_vm3, %v1003_v40, %v1221_v27  ;;  %v820_v53 = vpack.c.bf16 %v788_v41, %v788_v41  ;;  %v1286_v55 = vld [vmem:[#allocation2 + $0x78] sm:$0xf]  ;;  %v6707_v62 = vld [vmem:[%s8983_s3 + $0x110] sm:$0xff]  ;;  %v1751_v19 = vunpack.c.l.b16 %v1562_v2  ;;  %356 = vst [vmem:[#allocation2 + $0x9c] sm:$0x1] %v355_v24 }
 0x14e   : > { %v2387_v54 = vpack.c.b16 %v2365_v45, %v2364_v34  ;;  %1220 = vst [vmem:[#allocation2 + $0x7c] sm:$0xf] %v1002_v49  ;;  %v1567_v56 = vrot.slane %v1566_v47, 4  ;;  %v1574_v60 = vshrl.u32 %v1286_v55, 16  ;;  %v1577_v3 = vshll.u32 %v1286_v55, 16  ;;  %3457 = vmatpush.bf16.msrb.mxu1 %v6707_v62 }
 0x14f   : > { %1223 = vst [vmem:[#allocation2 + $0x80] sm:$0x1] %v1222_v51  ;;  %v1005_v20 = vshrl.u32 %v820_v53, 16  ;;  %v1008_v8 = vshll.u32 %v820_v53, 16  ;;  %v2177_v36 = vld [vmem:[#allocation2 + $0x78] sm:$0xe] }
 0x150   : > { %2511 = vmatmul.bf16.gmra.mxu3 %v2387_v54  ;;  %v740_v4 = vpop.f32.mrf.mxu0  ;;  %v1572_v5 = vsel %vm7027_vm12, %v1567_v56, %v1571_v59  ;;  %v1576_v22 = vrot.slane %v1574_v60, 4  ;;  %v1579_v37 = vrot.slane %v1577_v3, 5  ;;  %v6159_v51 = vrot.slane %v2177_v36, 9  ;;  %v405_v59 = vld [vmem:[#allocation2 + $0xa4] sm:$0xf] }
 0x151   : > { %v7357_v7 = vrot.slane %v1005_v20, 7  ;;  %v741_v10 = vadd.f32 %v7277_v31, %v740_v4  ;;  %v1752_v12 = vunpack.c.l.b16 %v1572_v5  ;;  %v2094_v34 = vpop.f32.mrf.mxu2 }
 0x152   : > { %v1859_v16 = vpop.f32.mrf.mxu1  ;;  %v1580_v55 = vor.u32 %v1579_v37, %v1576_v22  ;;  %v406_v22 = vsel %vm6999_vm6, 0, %v405_v59 }
 0x153   : > { %v2472_v17 = vpop.f32.mrf.mxu3  ;;  %v1010_v26 = vor.u32 %v1008_v8, %v7357_v7  ;;  %v789_v27 = vmax.f32 %v741_v10, 0.0  ;;  %v2093_v32 = vadd.f32 %v2092_v30, %v1859_v16  ;;  %v1774_v38 = vpack.c.b16 %v1752_v12, %v1751_v19  ;;  %v1228_v12 = vld [vmem:[#allocation2 + $0x8c] sm:$0x1]  ;;  %407 = vst [vmem:[#allocation2 + $0xa4] sm:$0xf] %v406_v22 }
 0x154   : > { %v1011_v30 = vrot.slane %v7357_v7, 4 }
 0x155   : > { %v1225_v40 = vsel %vm6999_vm6, %v1010_v26, %v1224_v15  ;;  %v821_v41 = vpack.c.bf16 %v789_v27, %v789_v27  ;;  %v7365_v45 = vadd.f32 %v2472_v17, %v2093_v32  ;;  %v6651_v46 = vld [vmem:[#allocation2 + $0x78] sm:$0xff]  ;;  %1898 = vmatmul.bf16.gmra.mxu1 %v1774_v38 }
 0x156   : > { %v1287_v47 = vld [vmem:[#allocation2 + $0x7c] sm:$0xf]  ;;  %1226 = vst [vmem:[#allocation2 + $0x84] sm:$0xf] %v1225_v40  ;;  %v1324_v49 = vld [vmem:[#allocation2 + $0x80] sm:$0x1]  ;;  %2136 = vmatmul.bf16.gmra.mxu2 %v6651_v46 }
 0x157   : > { %v2290_v53 = vrot.slane %v1287_v47, 5  ;;  %v1013_v54 = vshrl.u32 %v821_v41, 16  ;;  %v1583_v56 = vshll.u32 %v1287_v47, 16  ;;  %v1016_v60 = vshll.u32 %v821_v41, 16 }
 0x158   : > { %v743_v20 = vpop.f32.mrf.mxu0  ;;  %v2293_v3 = vrot.slane %v1324_v49, 5  ;;  %v1587_v62 = vshrl.u32 %v1287_v47, 16  ;;  %v1593_v19 = vshll.u32 %v1324_v49, 16  ;;  %v1581_v40 = vrot.slane %v1580_v55, 4 }
 0x159   : > { %v2292_v2 = vrot.slane %v2290_v53, 4  ;;  %v1015_v4 = vrot.slane %v1013_v54, 7  ;;  %v744_v5 = vadd.f32 %v7277_v31, %v743_v20  ;;  %v2291_v8 = vsel %vm7006_vm9, %v6159_v51, %v2290_v53  ;;  %v2097_v36 = vpop.f32.mrf.mxu2 }
 0x15a   : > { %v1585_v10 = vrot.slane %v1583_v56, 5  ;;  %v1861_v7 = vpop.f32.mrf.mxu1  ;;  %v1589_v17 = vrot.slane %v1587_v62, 4  ;;  %v2366_v37 = vunpack.c.l.b16 %v2291_v8  ;;  %v1595_v56 = vrot.slane %v1593_v19, 5 }
 0x15b   : > { %v2474_v15 = vpop.f32.mrf.mxu3  ;;  %v2294_v16 = vsel %vm7006_vm9, %v2292_v2, %v2293_v3  ;;  %v1018_v24 = vor.u32 %v1016_v60, %v1015_v4  ;;  %v1020_v26 = vrot.slane %v1015_v4, 4  ;;  %v790_v27 = vmax.f32 %v744_v5, 0.0  ;;  %2794 = vmatmul.bf16.gmra.mxu0 %v6684_v6  ;;  %v6743_v60 = vld [vmem:[%s8983_s3 + $0x1b0] sm:$0xff]  ;;  %v357_v5 = vld [vmem:[#allocation2 + $0xa8] sm:$0x1] }
 0x15c   : > { %v2095_v32 = vadd.f32 %v2094_v34, %v1861_v7  ;;  %v2367_v38 = vunpack.c.l.b16 %v2294_v16  ;;  %v1590_v41 = vor.u32 %v1589_v17, %v1585_v10  ;;  %v1586_v55 = vsel %vm7027_vm12, %v1581_v40, %v1585_v10  ;;  %4192 = vmatpush.bf16.msrb.mxu3 %v6743_v60  ;;  %v1231_v7 = vld [vmem:[#allocation2 + $0x90] sm:$0xf] }
 0x15d   : > { %v1019_v46 = vsel %vm7072_vm14, %v1011_v30, %v1018_v24  ;;  %v1229_v47 = vsel %vm6954_vm3, %v1020_v26, %v1228_v12  ;;  %v822_v49 = vpack.c.bf16 %v790_v27, %v790_v27  ;;  %v1288_v53 = vld [vmem:[#allocation2 + $0x84] sm:$0xf]  ;;  %v6719_v30 = vld [vmem:[%s8983_s3 + $0x170] sm:$0xff]  ;;  %v358_v12 = vsel %vm6954_vm3, 0, %v357_v5 }
 0x15e   : > { %v7379_v51 = vadd.f32 %v2474_v15, %v2095_v32  ;;  %1227 = vst [vmem:[#allocation2 + $0x88] sm:$0xf] %v1019_v46  ;;  %v2388_v54 = vpack.c.b16 %v2367_v38, %v2366_v37  ;;  %v1591_v34 = vrot.slane %v1590_v41, 4  ;;  %v1598_v62 = vshrl.u32 %v1288_v53, 16  ;;  %3878 = vmatpush.bf16.msrb.mxu2 %v6719_v30  ;;  %v2178_v32 = vld [vmem:[#allocation2 + $0x84] sm:$0xe] }
 0x15f   : > { %1230 = vst [vmem:[#allocation2 + $0x8c] sm:$0x1] %v1229_v47  ;;  %v1022_v59 = vshrl.u32 %v822_v49, 16  ;;  %v1025_v20 = vshll.u32 %v822_v49, 16  ;;  %v1601_v4 = vshll.u32 %v1288_v53, 16  ;;  %v1753_v17 = vunpack.c.l.b16 %v1586_v55 }
 0x160   : > { %2516 = vmatmul.bf16.gmra.mxu3 %v2388_v54  ;;  %v745_v2 = vpop.f32.mrf.mxu0  ;;  %v1596_v3 = vsel %vm7027_vm12, %v1591_v34, %v1595_v56  ;;  %v1600_v19 = vrot.slane %v1598_v62, 4  ;;  %359 = vst [vmem:[#allocation2 + $0xa8] sm:$0x1] %v358_v12  ;;  %v6160_v54 = vrot.slane %v2178_v32, 9  ;;  %v408_v30 = vld [vmem:[#allocation2 + $0xb0] sm:$0xf] }
 0x161   : > { %v7391_v6 = vrot.slane %v1022_v59, 7  ;;  %v746_v8 = vadd.f32 %v7277_v31, %v745_v2  ;;  %v1754_v10 = vunpack.c.l.b16 %v1596_v3  ;;  %v2099_v27 = vpop.f32.mrf.mxu2  ;;  %v1603_v37 = vrot.slane %v1601_v4, 5 }
 0x162   : > { %v1864_v15 = vpop.f32.mrf.mxu1 }
 0x163   : > { %v2477_v16 = vpop.f32.mrf.mxu3  ;;  %v1027_v22 = vor.u32 %v1025_v20, %v7391_v6  ;;  %v791_v24 = vmax.f32 %v746_v8, 0.0  ;;  %v2098_v26 = vadd.f32 %v2097_v36, %v1864_v15  ;;  %v1775_v38 = vpack.c.b16 %v1754_v10, %v1753_v17  ;;  %v6685_v8 = vld [vmem:[#allocation2 + $0x3c] sm:$0xff] }
 0x164   : > { %v1028_v56 = vrot.slane %v7391_v6, 4  ;;  %v1604_v59 = vor.u32 %v1603_v37, %v1600_v19 }
 0x165   : > { %v1232_v40 = vsel %vm6999_vm6, %v1027_v22, %v1231_v7  ;;  %v823_v41 = vpack.c.bf16 %v791_v24, %v791_v24  ;;  %v7399_v46 = vadd.f32 %v2477_v16, %v2098_v26  ;;  %v6652_v47 = vld [vmem:[#allocation2 + $0x84] sm:$0xff]  ;;  %1903 = vmatmul.bf16.gmra.mxu1 %v1775_v38  ;;  %v1235_v7 = vld [vmem:[#allocation2 + $0x98] sm:$0x1]  ;;  %v409_v22 = vsel %vm6999_vm6, 0, %v408_v30 }
 0x166   : > { %v1289_v49 = vld [vmem:[#allocation2 + $0x88] sm:$0xf]  ;;  %1233 = vst [vmem:[#allocation2 + $0x90] sm:$0xf] %v1232_v40  ;;  %v1325_v53 = vld [vmem:[#allocation2 + $0x8c] sm:$0x1]  ;;  %2141 = vmatmul.bf16.gmra.mxu2 %v6652_v47 }
 0x167   : > { %v2297_v34 = vrot.slane %v1289_v49, 5  ;;  %v1030_v36 = vshrl.u32 %v823_v41, 16  ;;  %v1607_v55 = vshll.u32 %v1289_v49, 16  ;;  %v1033_v60 = vshll.u32 %v823_v41, 16  ;;  %410 = vst [vmem:[#allocation2 + $0xb0] sm:$0xf] %v409_v22 }
 0x168   : > { %v748_v20 = vpop.f32.mrf.mxu0  ;;  %v2300_v3 = vrot.slane %v1325_v53, 5  ;;  %v1611_v62 = vshrl.u32 %v1289_v49, 16  ;;  %v1617_v19 = vshll.u32 %v1325_v53, 16  ;;  %v1605_v47 = vrot.slane %v1604_v59, 4 }
 0x169   : > { %v2299_v2 = vrot.slane %v2297_v34, 4  ;;  %v1032_v4 = vrot.slane %v1030_v36, 7  ;;  %v749_v5 = vadd.f32 %v7277_v31, %v748_v20  ;;  %v2298_v10 = vsel %vm7006_vm9, %v6160_v54, %v2297_v34  ;;  %v2102_v38 = vpop.f32.mrf.mxu2 }
 0x16a   : > { %v1609_v12 = vrot.slane %v1607_v55, 5  ;;  %v1866_v6 = vpop.f32.mrf.mxu1  ;;  %v1613_v17 = vrot.slane %v1611_v62, 4  ;;  %v2368_v40 = vunpack.c.l.b16 %v2298_v10 }
 0x16b   : > { %v2479_v15 = vpop.f32.mrf.mxu3  ;;  %v2301_v16 = vsel %vm7006_vm9, %v2299_v2, %v2300_v3  ;;  %v1035_v24 = vor.u32 %v1033_v60, %v1032_v4  ;;  %v1037_v26 = vrot.slane %v1032_v4, 4  ;;  %v792_v32 = vmax.f32 %v749_v5, 0.0  ;;  %2799 = vmatmul.bf16.gmra.mxu0 %v6685_v8  ;;  %v6706_v4 = vld [vmem:[%s8983_s3 + $0x108] sm:$0xff]  ;;  %v360_v5 = vld [vmem:[#allocation2 + $0xb4] sm:$0x1] }
 0x16c   : > { %v2100_v37 = vadd.f32 %v2099_v27, %v1866_v6  ;;  %v2369_v41 = vunpack.c.l.b16 %v2301_v16  ;;  %v1614_v49 = vor.u32 %v1613_v17, %v1609_v12  ;;  %v1619_v60 = vrot.slane %v1617_v19, 5  ;;  %3458 = vmatpush.bf16.msrb.mxu1 %v6706_v4 }
 0x16d   : > { %v1036_v54 = vsel %vm7072_vm14, %v1028_v56, %v1035_v24  ;;  %v1236_v53 = vsel %vm6954_vm3, %v1037_v26, %v1235_v7  ;;  %v824_v34 = vpack.c.bf16 %v792_v32, %v792_v32  ;;  %v1290_v55 = vld [vmem:[#allocation2 + $0x90] sm:$0xf]  ;;  %v1610_v59 = vsel %vm7027_vm12, %v1605_v47, %v1609_v12 }
 0x16e   : > { %v7413_v36 = vadd.f32 %v2479_v15, %v2100_v37  ;;  %1234 = vst [vmem:[#allocation2 + $0x94] sm:$0xf] %v1036_v54  ;;  %v2389_v30 = vpack.c.b16 %v2369_v41, %v2368_v40  ;;  %v1615_v27 = vrot.slane %v1614_v49, 4  ;;  %v1622_v2 = vshrl.u32 %v1290_v55, 16  ;;  %v1238_v15 = vld [vmem:[#allocation2 + $0x9c] sm:$0xf] }
 0x16f   : > { %1237 = vst [vmem:[#allocation2 + $0x98] sm:$0x1] %v1236_v53  ;;  %v1039_v20 = vshrl.u32 %v824_v34, 16  ;;  %v1625_v3 = vshll.u32 %v1290_v55, 16  ;;  %v1042_v10 = vshll.u32 %v824_v34, 16  ;;  %v1755_v17 = vunpack.c.l.b16 %v1610_v59 }
 0x170   : > { %2521 = vmatmul.bf16.gmra.mxu3 %v2389_v30  ;;  %v750_v56 = vpop.f32.mrf.mxu0  ;;  %v1620_v62 = vsel %vm7027_vm12, %v1615_v27, %v1619_v60  ;;  %v1624_v19 = vrot.slane %v1622_v2, 4  ;;  %v361_v22 = vsel %vm6954_vm3, 0, %v360_v5  ;;  %v2179_v40 = vld [vmem:[#allocation2 + $0x90] sm:$0xe] }
 0x171   : > { %v7422_v8 = vrot.slane %v1039_v20, 7  ;;  %v751_v7 = vadd.f32 %v7277_v31, %v750_v56  ;;  %v1756_v6 = vunpack.c.l.b16 %v1620_v62  ;;  %v2104_v37 = vpop.f32.mrf.mxu2  ;;  %v1627_v41 = vrot.slane %v1625_v3, 5  ;;  %362 = vst [vmem:[#allocation2 + $0xb4] sm:$0x1] %v361_v22  ;;  %v411_v3 = vld [vmem:[#allocation2 + $0xbc] sm:$0xf] }
 0x172   : > { %v1869_v12 = vpop.f32.mrf.mxu1  ;;  %v6161_v27 = vrot.slane %v2179_v40, 9 }
 0x173   : > { %v2482_v16 = vpop.f32.mrf.mxu3  ;;  %v1044_v24 = vor.u32 %v1042_v10, %v7422_v8  ;;  %v793_v26 = vmax.f32 %v751_v7, 0.0  ;;  %v2103_v32 = vadd.f32 %v2102_v38, %v1869_v12  ;;  %v1776_v47 = vpack.c.b16 %v1756_v6, %v1755_v17  ;;  %v1242_v17 = vld [vmem:[#allocation2 + $0xa4] sm:$0x1] }
 0x174   : > { %v1045_v38 = vrot.slane %v7422_v8, 4  ;;  %v1628_v59 = vor.u32 %v1627_v41, %v1624_v19 }
 0x175   : > { %v1239_v49 = vsel %vm6999_vm6, %v1044_v24, %v1238_v15  ;;  %v825_v54 = vpack.c.bf16 %v793_v26, %v793_v26  ;;  %v7430_v53 = vadd.f32 %v2482_v16, %v2103_v32  ;;  %v6653_v34 = vld [vmem:[#allocation2 + $0x90] sm:$0xff]  ;;  %1908 = vmatmul.bf16.gmra.mxu1 %v1776_v47  ;;  %v6686_v15 = vld [vmem:[#allocation2 + $0x48] sm:$0xff]  ;;  %v412_v32 = vsel %vm6999_vm6, 0, %v411_v3 }
 0x176   : > { %v1291_v55 = vld [vmem:[#allocation2 + $0x94] sm:$0xf]  ;;  %1240 = vst [vmem:[#allocation2 + $0x9c] sm:$0xf] %v1239_v49  ;;  %v1326_v30 = vld [vmem:[#allocation2 + $0x98] sm:$0x1]  ;;  %2146 = vmatmul.bf16.gmra.mxu2 %v6653_v34 }
 0x177   : > { %v2304_v60 = vrot.slane %v1291_v55, 5  ;;  %v1047_v20 = vshrl.u32 %v825_v54, 16  ;;  %v1631_v2 = vshll.u32 %v1291_v55, 16  ;;  %v1050_v56 = vshll.u32 %v825_v54, 16  ;;  %413 = vst [vmem:[#allocation2 + $0xbc] sm:$0xf] %v412_v32 }
 0x178   : > { %v753_v62 = vpop.f32.mrf.mxu0  ;;  %v2307_v5 = vrot.slane %v1326_v30, 5  ;;  %v1635_v10 = vshrl.u32 %v1291_v55, 16  ;;  %v1641_v26 = vshll.u32 %v1326_v30, 16 }
 0x179   : > { %v2306_v4 = vrot.slane %v2304_v60, 4  ;;  %v1049_v7 = vrot.slane %v1047_v20, 7  ;;  %v754_v6 = vadd.f32 %v7277_v31, %v753_v62  ;;  %v2305_v12 = vsel %vm7006_vm9, %v6161_v27, %v2304_v60  ;;  %v2107_v54 = vpop.f32.mrf.mxu2 }
 0x17a   : > { %v1633_v16 = vrot.slane %v1631_v2, 5  ;;  %v1871_v8 = vpop.f32.mrf.mxu1  ;;  %v1637_v24 = vrot.slane %v1635_v10, 4  ;;  %v2370_v34 = vunpack.c.l.b16 %v2305_v12  ;;  %v1629_v27 = vrot.slane %v1628_v59, 4  ;;  %v6742_v10 = vld [vmem:[%s8983_s3 + $0x1a8] sm:$0xff] }
 0x17b   : > { %v2484_v22 = vpop.f32.mrf.mxu3  ;;  %v2308_v19 = vsel %vm7006_vm9, %v2306_v4, %v2307_v5  ;;  %v1052_v40 = vor.u32 %v1050_v56, %v1049_v7  ;;  %v1054_v41 = vrot.slane %v1049_v7, 4  ;;  %v794_v47 = vmax.f32 %v754_v6, 0.0  ;;  %2804 = vmatmul.bf16.gmra.mxu0 %v6686_v15  ;;  %4193 = vmatpush.bf16.msrb.mxu3 %v6742_v10 }
 0x17c   : > { %v2105_v49 = vadd.f32 %v2104_v37, %v1871_v8  ;;  %v2371_v55 = vunpack.c.l.b16 %v2308_v19  ;;  %v1638_v60 = vor.u32 %v1637_v24, %v1633_v16  ;;  %v1643_v4 = vrot.slane %v1641_v26, 5  ;;  %v363_v8 = vld [vmem:[#allocation2 + $0xc0] sm:$0x1]  ;;  %v1245_v26 = vld [vmem:[#allocation2 + $0xa8] sm:$0xf] }
 0x17d   : > { %v1053_v20 = vsel %vm7072_vm14, %v1045_v38, %v1052_v40  ;;  %v1243_v30 = vsel %vm6954_vm3, %v1054_v41, %v1242_v17  ;;  %v826_v2 = vpack.c.bf16 %v794_v47, %v794_v47  ;;  %v1292_v3 = vld [vmem:[#allocation2 + $0x9c] sm:$0xf]  ;;  %v1634_v59 = vsel %vm7027_vm12, %v1629_v27, %v1633_v16  ;;  %v6718_v38 = vld [vmem:[%s8983_s3 + $0x168] sm:$0xff] }
 0x17e   : > { %v7444_v62 = vadd.f32 %v2484_v22, %v2105_v49  ;;  %1241 = vst [vmem:[#allocation2 + $0xa0] sm:$0xf] %v1053_v20  ;;  %v2390_v56 = vpack.c.b16 %v2371_v55, %v2370_v34  ;;  %v1639_v37 = vrot.slane %v1638_v60, 4  ;;  %v1646_v12 = vshrl.u32 %v1292_v3, 16  ;;  %3879 = vmatpush.bf16.msrb.mxu2 %v6718_v38  ;;  %v2180_v60 = vld [vmem:[#allocation2 + $0x9c] sm:$0xe] }
 0x17f   : > { %1244 = vst [vmem:[#allocation2 + $0xa4] sm:$0x1] %v1243_v30  ;;  %v1056_v5 = vshrl.u32 %v826_v2, 16  ;;  %v1059_v7 = vshll.u32 %v826_v2, 16  ;;  %v1649_v17 = vshll.u32 %v1292_v3, 16  ;;  %v364_v24 = vsel %vm6954_vm3, 0, %v363_v8 }
 0x180   : > { %2526 = vmatmul.bf16.gmra.mxu3 %v2390_v56  ;;  %v755_v6 = vpop.f32.mrf.mxu0  ;;  %v1644_v15 = vsel %vm7027_vm12, %v1639_v37, %v1643_v4  ;;  %v1757_v41 = vunpack.c.l.b16 %v1634_v59  ;;  %v1648_v47 = vrot.slane %v1646_v12, 4  ;;  %365 = vst [vmem:[#allocation2 + $0xc0] sm:$0x1] %v364_v24 }
 0x181   : > { %v7456_v22 = vrot.slane %v1056_v5, 7  ;;  %v756_v16 = vadd.f32 %v7277_v31, %v755_v6  ;;  %v1758_v19 = vunpack.c.l.b16 %v1644_v15  ;;  %v2109_v27 = vpop.f32.mrf.mxu2  ;;  %v1651_v20 = vrot.slane %v1649_v17, 5  ;;  %v414_v6 = vld [vmem:[#allocation2 + $0xc8] sm:$0xf] }
 0x182   : > { %v1874_v32 = vpop.f32.mrf.mxu1  ;;  %v6162_v5 = vrot.slane %v2180_v60, 9 }
 0x183   : > { %v2487_v40 = vpop.f32.mrf.mxu3  ;;  %v1061_v49 = vor.u32 %v1059_v7, %v7456_v22  ;;  %v795_v34 = vmax.f32 %v756_v16, 0.0  ;;  %v2108_v55 = vadd.f32 %v2107_v54, %v1874_v32  ;;  %v1777_v31 = vpack.c.b16 %v1758_v19, %v1757_v41  ;;  %v6717_v19 = vld [vmem:[%s8983_s3 + $0x160] sm:$0xff]  ;;  %v6687_v32 = vld [vmem:[#allocation2 + $0x54] sm:$0xff] }
 0x184   : > { %v1062_v38 = vrot.slane %v7456_v22, 4  ;;  %v1652_v10 = vor.u32 %v1651_v20, %v1648_v47  ;;  %v1249_v47 = vld [vmem:[#allocation2 + $0xb0] sm:$0x1]  ;;  %3880 = vmatpush.bf16.msrb.mxu2 %v6717_v19 }
 0x185   : > { %v1246_v30 = vsel %vm6999_vm6, %v1061_v49, %v1245_v26  ;;  %v827_v2 = vpack.c.bf16 %v795_v34, %v795_v34  ;;  %v7464_v3 = vadd.f32 %v2487_v40, %v2108_v55  ;;  %v6654_v56 = vld [vmem:[#allocation2 + $0x9c] sm:$0xff]  ;;  %1913 = vmatmul.bf16.gmra.mxu1 %v1777_v31  ;;  %v415_v31 = vsel %vm6999_vm6, 0, %v414_v6 }
 0x186   : > { %v1293_v37 = vld [vmem:[#allocation2 + $0xa0] sm:$0xf]  ;;  %1247 = vst [vmem:[#allocation2 + $0xa8] sm:$0xf] %v1246_v30  ;;  %v1327_v4 = vld [vmem:[#allocation2 + $0xa4] sm:$0x1]  ;;  %2151 = vmatmul.bf16.gmra.mxu2 %v6654_v56 }
 0x187   : > { %v2311_v59 = vrot.slane %v1293_v37, 5  ;;  %v1064_v54 = vshrl.u32 %v827_v2, 16  ;;  %v1655_v7 = vshll.u32 %v1293_v37, 16  ;;  %v1067_v15 = vshll.u32 %v827_v2, 16  ;;  %v7473_v26 = vld [vmem:[%s8982_s2] ss:$0 sm:$0xff] }
 0x188   : > { %v758_v12 = vpop.f32.mrf.mxu0  ;;  %v2314_v8 = vrot.slane %v1327_v4, 5  ;;  %v1659_v16 = vshrl.u32 %v1293_v37, 16  ;;  %v1665_v20 = vshll.u32 %v1327_v4, 16  ;;  %v6716_v30 = vld [vmem:[%s8983_s3 + $0x158] sm:$0xff]  ;;  %416 = vst [vmem:[#allocation2 + $0xc8] sm:$0xf] %v415_v31 }
 0x189   : > { %v2313_v17 = vrot.slane %v2311_v59, 4  ;;  %v1066_v24 = vrot.slane %v1064_v54, 7  ;;  %v759_v22 = vadd.f32 %v7473_v26, %v758_v12  ;;  %v2312_v40 = vsel %vm7006_vm9, %v6162_v5, %v2311_v59  ;;  %v2112_v59 = vpop.f32.mrf.mxu2  ;;  %3881 = vmatpush.bf16.msrb.mxu2 %v6716_v30 }
 0x18a   : > { %v1657_v41 = vrot.slane %v1655_v7, 5  ;;  %v1876_v49 = vpop.f32.mrf.mxu1  ;;  %v1661_v60 = vrot.slane %v1659_v16, 4  ;;  %v2372_v54 = vunpack.c.l.b16 %v2312_v40  ;;  %v1653_v12 = vrot.slane %v1652_v10, 4  ;;  %v6741_v10 = vld [vmem:[%s8983_s3 + $0x1a0] sm:$0xff] }
 0x18b   : > { %v2489_v34 = vpop.f32.mrf.mxu3  ;;  %v2315_v55 = vsel %vm7006_vm9, %v2313_v17, %v2314_v8  ;;  %v1069_v2 = vor.u32 %v1067_v15, %v1066_v24  ;;  %v1071_v56 = vrot.slane %v1066_v24, 4  ;;  %v796_v37 = vmax.f32 %v759_v22, 0.0  ;;  %2809 = vmatmul.bf16.gmra.mxu0 %v6687_v32  ;;  %4194 = vmatpush.bf16.msrb.mxu3 %v6741_v10 }
 0x18c   : > { %v2110_v5 = vadd.f32 %v2109_v27, %v1876_v49  ;;  %v2373_v7 = vunpack.c.l.b16 %v2315_v55  ;;  %v1662_v17 = vor.u32 %v1661_v60, %v1657_v41  ;;  %v1667_v24 = vrot.slane %v1665_v20, 5  ;;  %v6705_v55 = vld [vmem:[%s8983_s3 + $0x100] sm:$0xff] }
 0x18d   : > { %v1070_v4 = vsel %vm7072_vm14, %v1062_v38, %v1069_v2  ;;  %v1250_v6 = vsel %vm6954_vm3, %v1071_v56, %v1249_v47  ;;  %v828_v8 = vpack.c.bf16 %v796_v37, %v796_v37  ;;  %v1294_v15 = vld [vmem:[#allocation2 + $0xa8] sm:$0xf]  ;;  %v6715_v38 = vld [vmem:[%s8983_s3 + $0x150] sm:$0xff]  ;;  %v1658_v32 = vsel %vm7027_vm12, %v1653_v12, %v1657_v41  ;;  %3459 = vmatpush.bf16.msrb.mxu1 %v6705_v55 }
 0x18e   : > { %v7489_v16 = vadd.f32 %v2489_v34, %v2110_v5  ;;  %1248 = vst [vmem:[#allocation2 + $0xac] sm:$0xf] %v1070_v4  ;;  %v2391_v19 = vpack.c.b16 %v2373_v7, %v2372_v54  ;;  %v1663_v27 = vrot.slane %v1662_v17, 4  ;;  %v1670_v40 = vshrl.u32 %v1294_v15, 16  ;;  %v1252_v2 = vld [vmem:[#allocation2 + $0xb4] sm:$0xf]  ;;  %3882 = vmatpush.bf16.msrb.mxu2 %v6715_v38 }
 0x18f   : > { %1251 = vst [vmem:[#allocation2 + $0xb0] sm:$0x1] %v1250_v6  ;;  %v1073_v22 = vshrl.u32 %v828_v8, 16  ;;  %v1673_v47 = vshll.u32 %v1294_v15, 16  ;;  %v1076_v20 = vshll.u32 %v828_v8, 16  ;;  %v1759_v37 = vunpack.c.l.b16 %v1658_v32  ;;  %v6740_v54 = vld [vmem:[%s8983_s3 + $0x198] sm:$0xff] }
 0x190   : > { %2531 = vmatmul.bf16.gmra.mxu3 %v2391_v19  ;;  %v760_v49 = vpop.f32.mrf.mxu0  ;;  %v1668_v34 = vsel %vm7027_vm12, %v1663_v27, %v1667_v24  ;;  %v1672_v5 = vrot.slane %v1670_v40, 4  ;;  %v6714_v7 = vld [vmem:[%s8983_s3 + $0x148] sm:$0xff]  ;;  %v6739_v55 = vld [vmem:[%s8983_s3 + $0x190] sm:$0xff] }
 0x191   : > { %v7504_v60 = vrot.slane %v1073_v22, 7  ;;  %v761_v31 = vadd.f32 %v7473_v26, %v760_v49  ;;  %v1760_v30 = vunpack.c.l.b16 %v1668_v34  ;;  %v2114_v6 = vpop.f32.mrf.mxu2  ;;  %v1675_v8 = vrot.slane %v1673_v47, 5  ;;  %v2181_v19 = vld [vmem:[#allocation2 + $0xa8] sm:$0xe]  ;;  %4195 = vmatpush.bf16.msrb.mxu3 %v6740_v54  ;;  %5297 = vmatpush.bf16.msra.mxu1 %v6760_v33  ;;  %v2892_v33 = vld [vmem:[#allocation2 + $0xc] sm:$0xf] }
 0x192   : > { %v1879_v41 = vpop.f32.mrf.mxu1  ;;  %3883 = vmatpush.bf16.msrb.mxu2 %v6714_v7  ;;  %v6688_v7 = vld [vmem:[#allocation2 + $0x60] sm:$0xff] }
 0x193   : > { %v2492_v56 = vpop.f32.mrf.mxu3  ;;  %v1078_v12 = vor.u32 %v1076_v20, %v7504_v60  ;;  %v797_v17 = vmax.f32 %v761_v31, 0.0  ;;  %v2113_v4 = vadd.f32 %v2112_v59, %v1879_v41  ;;  %v1778_v15 = vpack.c.b16 %v1760_v30, %v1759_v37  ;;  %v6713_v20 = vld [vmem:[%s8983_s3 + $0x140] sm:$0xff] }
 0x194   : > { %v6163_v59 = vrot.slane %v2181_v19, 9  ;;  %v1676_v47 = vor.u32 %v1675_v8, %v1672_v5 }
 0x195   : > { %v1253_v27 = vsel %vm6999_vm6, %v1078_v12, %v1252_v2  ;;  %v829_v24 = vpack.c.bf16 %v797_v17, %v797_v17  ;;  %v7516_v10 = vadd.f32 %v2492_v56, %v2113_v4  ;;  %v6655_v38 = vld [vmem:[#allocation2 + $0xa8] sm:$0xff]  ;;  %1918 = vmatmul.bf16.gmra.mxu1 %v1778_v15  ;;  %4196 = vmatpush.bf16.msrb.mxu3 %v6739_v55  ;;  %v1079_v17 = vrot.slane %v7504_v60, 4  ;;  %v1256_v4 = vld [vmem:[#allocation2 + $0xbc] sm:$0x1] }
 0x196   : > { %v1295_v22 = vld [vmem:[#allocation2 + $0xac] sm:$0xf]  ;;  %1254 = vst [vmem:[#allocation2 + $0xb4] sm:$0xf] %v1253_v27  ;;  %v1328_v32 = vld [vmem:[#allocation2 + $0xb0] sm:$0x1]  ;;  %2156 = vmatmul.bf16.gmra.mxu2 %v6655_v38 }
 0x197   : > { %v2318_v40 = vrot.slane %v1295_v22, 5  ;;  %v1081_v49 = vshrl.u32 %v829_v24, 16  ;;  %v1679_v34 = vshll.u32 %v1295_v22, 16  ;;  %v1084_v31 = vshll.u32 %v829_v24, 16  ;;  %3884 = vmatpush.bf16.msrb.mxu2 %v6713_v20 }
 0x198   : > { %v763_v30 = vpop.f32.mrf.mxu0  ;;  %v2321_v41 = vrot.slane %v1328_v32, 5  ;;  %v1683_v56 = vshrl.u32 %v1295_v22, 16  ;;  %v1689_v24 = vshll.u32 %v1328_v32, 16 }
 0x199   : > { %v2320_v2 = vrot.slane %v2318_v40, 4  ;;  %v1083_v37 = vrot.slane %v1081_v49, 7  ;;  %v764_v54 = vadd.f32 %v7473_v26, %v763_v30  ;;  %v2319_v5 = vsel %vm7006_vm9, %v6163_v59, %v2318_v40  ;;  %v2117_v25 = vpop.f32.mrf.mxu2  ;;  %v6738_v40 = vld [vmem:[%s8983_s3 + $0x188] sm:$0xff] }
 0x19a   : > { %v1681_v12 = vrot.slane %v1679_v34, 5  ;;  %v1881_v8 = vpop.f32.mrf.mxu1  ;;  %v1685_v27 = vrot.slane %v1683_v56, 4  ;;  %v2374_v60 = vunpack.c.l.b16 %v2319_v5  ;;  %v1677_v34 = vrot.slane %v1676_v47, 4  ;;  %4197 = vmatpush.bf16.msrb.mxu3 %v6738_v40  ;;  %v6737_v56 = vld [vmem:[%s8983_s3 + $0x180] sm:$0xff] }
 0x19b   : > { %v2494_v15 = vpop.f32.mrf.mxu3  ;;  %v2322_v19 = vsel %vm7006_vm9, %v2320_v2, %v2321_v41  ;;  %v1086_v38 = vor.u32 %v1084_v31, %v1083_v37  ;;  %v1088_v22 = vrot.slane %v1083_v37, 4  ;;  %v798_v49 = vmax.f32 %v764_v54, 0.0  ;;  %2814 = vmatmul.bf16.gmra.mxu0 %v6688_v7  ;;  %v7539_v41 = vld [vmem:[#allocation2 + $0x10] sm:$0xf] }
 0x19c   : > { %v2115_v30 = vadd.f32 %v2114_v6, %v1881_v8  ;;  %v2375_v59 = vunpack.c.l.b16 %v2322_v19  ;;  %v1686_v55 = vor.u32 %v1685_v27, %v1681_v12  ;;  %v1682_v37 = vsel %vm7027_vm12, %v1677_v34, %v1681_v12  ;;  %v7552_v12 = vld [vmem:[#allocation2 + $0x14] sm:$0x1] }
 0x19d   : > { %v1087_v2 = vsel %vm7072_vm14, %v1079_v17, %v1086_v38  ;;  %v1257_v32 = vsel %vm6954_vm3, %v1088_v22, %v1256_v4  ;;  %v830_v20 = vpack.c.bf16 %v798_v49, %v798_v49  ;;  %v1296_v6 = vld [vmem:[#allocation2 + $0xb4] sm:$0xf]  ;;  %v1691_v7 = vrot.slane %v1689_v24, 5  ;;  %v1259_v24 = vld [vmem:[#allocation2 + $0xc0] sm:$0xf] }
 0x19e   : > { %v7537_v31 = vadd.f32 %v2494_v15, %v2115_v30  ;;  %1255 = vst [vmem:[#allocation2 + $0xb8] sm:$0xf] %v1087_v2  ;;  %v2392_v47 = vpack.c.b16 %v2375_v59, %v2374_v60  ;;  %v1687_v54 = vrot.slane %v1686_v55, 4  ;;  %v1694_v4 = vshrl.u32 %v1296_v6, 16  ;;  %4198 = vmatpush.bf16.msrb.mxu3 %v6737_v56 }
 0x19f   : > { %1258 = vst [vmem:[#allocation2 + $0xbc] sm:$0x1] %v1257_v32  ;;  %v1090_v5 = vshrl.u32 %v830_v20, 16  ;;  %v1093_v17 = vshll.u32 %v830_v20, 16  ;;  %v1697_v8 = vshll.u32 %v1296_v6, 16  ;;  %v8990_v27 = vrot.slane %v7539_v41, 5 }
 0x1a0   : > { %2536 = vmatmul.bf16.gmra.mxu3 %v2392_v47  ;;  %v765_v15 = vpop.f32.mrf.mxu0  ;;  %v1692_v19 = vsel %vm7027_vm12, %v1687_v54, %v1691_v7  ;;  %v1761_v60 = vunpack.c.l.b16 %v1682_v37  ;;  %v1696_v59 = vrot.slane %v1694_v4, 4  ;;  %v2182_v20 = vld [vmem:[#allocation2 + $0xb4] sm:$0xe]  ;;  %v3642_v54 = vrot.slane %v7552_v12, 5 }
 0x1a1   : > { %v7549_v38 = vrot.slane %v1090_v5, 7  ;;  %v766_v22 = vadd.f32 %v7473_v26, %v765_v15  ;;  %v1762_v49 = vunpack.c.l.b16 %v1692_v19  ;;  %v2119_v32 = vpop.f32.mrf.mxu2  ;;  %v1699_v6 = vrot.slane %v1697_v8, 5  ;;  %v6752_v26 = vld [vmem:[%s8983_s3 + $0x1f8] sm:$0xff] }
 0x1a2   : > { %v1884_v30 = vpop.f32.mrf.mxu1  ;;  %v3641_v56 = vrot.slane %v8990_v27, 4  ;;  %4872 = vmatpush.bf16.msra.mxu0 %v6752_v26  ;;  %v2950_v4 = vshll.u32 %v7539_v41, 16  ;;  %v6164_v15 = vrot.slane %v2182_v20, 9  ;;  %v2954_v48 = vshrl.u32 %v7539_v41, 16 }
 0x1a3   : > { %v2497_v40 = vpop.f32.mrf.mxu3  ;;  %v1095_v34 = vor.u32 %v1093_v17, %v7549_v38  ;;  %v799_v55 = vmax.f32 %v766_v22, 0.0  ;;  %v2118_v2 = vadd.f32 %v2117_v25, %v1884_v30  ;;  %v1779_v47 = vpack.c.b16 %v1762_v49, %v1761_v60 }
 0x1a4   : > { %v1700_v30 = vor.u32 %v1699_v6, %v1696_v59  ;;  %v1096_v26 = vrot.slane %v7549_v38, 4  ;;  %v1263_v6 = vld [vmem:[#allocation2 + $0xc8] sm:$0x1]  ;;  %v9034_v61 = vrot.slane %v7539_v41, 5 }
 0x1a5   : > { %v1260_v37 = vsel %vm6999_vm6, %v1095_v34, %v1259_v24  ;;  %v831_v7 = vpack.c.bf16 %v799_v55, %v799_v55  ;;  %v7563_v5 = vadd.f32 %v2497_v40, %v2118_v2  ;;  %v6656_v25 = vld [vmem:[#allocation2 + $0xb4] sm:$0xff]  ;;  %1923 = vmatmul.bf16.gmra.mxu1 %v1779_v47 }
 0x1a6   : > { %v1297_v17 = vld [vmem:[#allocation2 + $0xb8] sm:$0xf]  ;;  %1261 = vst [vmem:[#allocation2 + $0xc0] sm:$0xf] %v1260_v37  ;;  %v1329_v8 = vld [vmem:[#allocation2 + $0xbc] sm:$0x1]  ;;  %2161 = vmatmul.bf16.gmra.mxu2 %v6656_v25 }
 0x1a7   : > { %v2325_v19 = vrot.slane %v1297_v17, 5  ;;  %v1098_v22 = vshrl.u32 %v831_v7, 16  ;;  %v1101_v49 = vshll.u32 %v831_v7, 16  ;;  %v1703_v60 = vshll.u32 %v1297_v17, 16  ;;  %v6689_v37 = vld [vmem:[#allocation2 + $0x6c] sm:$0xff] }
 0x1a8   : > { %v2780_v24 = vpop.f32.mrf.mxu0  ;;  %v2328_v55 = vrot.slane %v1329_v8, 5  ;;  %v1707_v2 = vshrl.u32 %v1297_v17, 16 }
 0x1a9   : > { %v2326_v40 = vsel %vm7006_vm9, %v6164_v15, %v2325_v19  ;;  %v2327_v34 = vrot.slane %v2325_v19, 4  ;;  %v1100_v20 = vrot.slane %v1098_v22, 7  ;;  %v7573_v47 = vadd.f32 %v2780_v24, %v7282_v63  ;;  %v2122_v38 = vpop.f32.mrf.mxu2  ;;  %v3573_v63 = vld [vmem:[#allocation2 + $0xc] sm:$0xe] }
 0x1aa   : > { %v1705_v59 = vrot.slane %v1703_v60, 5  ;;  %v1886_v7 = vpop.f32.mrf.mxu1  ;;  %v2376_v50 = vunpack.c.l.b16 %v2326_v40  ;;  %v1709_v15 = vrot.slane %v1707_v2, 4  ;;  %v1713_v19 = vshll.u32 %v1329_v8, 16 }
 0x1ab   : > { %v2499_v25 = vpop.f32.mrf.mxu3  ;;  %v2329_v27 = vsel %vm7006_vm9, %v2327_v34, %v2328_v55  ;;  %v1103_v11 = vor.u32 %v1101_v49, %v1100_v20  ;;  %v1105_v17 = vrot.slane %v1100_v20, 4  ;;  %v2120_v43 = vadd.f32 %v2119_v32, %v1886_v7  ;;  %2819 = vmatmul.bf16.gmra.mxu0 %v6689_v37 }
 0x1ac   : > { %v2377_v22 = vunpack.c.l.b16 %v2329_v27  ;;  %v1701_v24 = vrot.slane %v1700_v30, 4  ;;  %v1710_v13 = vor.u32 %v1709_v15, %v1705_v59  ;;  %v3643_v60 = vsel %vm7006_vm9, %v3641_v56, %v3642_v54 }
 0x1ad   : > { %v1104_v40 = vsel %vm7072_vm14, %v1096_v26, %v1103_v11  ;;  %v1264_v8 = vsel %vm6954_vm3, %v1105_v17, %v1263_v6  ;;  %v7584_v49 = vadd.f32 %v2499_v25, %v2120_v43  ;;  %v1715_v34 = vrot.slane %v1713_v19, 5  ;;  %v2896_v19 = vld [vmem:[#allocation2 + $0x1c] sm:$0xf] }
 0x1ae   : > { %v2393_v32 = vpack.c.b16 %v2377_v22, %v2376_v50  ;;  %1262 = vst [vmem:[#allocation2 + $0xc4] sm:$0xf] %v1104_v40  ;;  %v1706_v27 = vsel %vm7027_vm12, %v1701_v24, %v1705_v59  ;;  %v1711_v30 = vrot.slane %v1710_v13, 4  ;;  %v6325_v55 = vrot.slane %v3573_v63, 9 }
 0x1af   : > { %1265 = vst [vmem:[#allocation2 + $0xc8] sm:$0x1] %v1264_v8  ;;  %v2941_v56 = vshrl.u32 %v2892_v33, 16  ;;  %v3766_v11 = vunpack.c.l.b16 %v3643_v60  ;;  %v2944_v50 = vshll.u32 %v2892_v33, 16  ;;  %v1763_v2 = vunpack.c.l.b16 %v1706_v27  ;;  %v2897_v27 = vld [vmem:[#allocation2 + $0x20] sm:$0x1] }
 0x1b0   : > { %2541 = vmatmul.bf16.gmra.mxu3 %v2393_v32  ;;  %v7588_v54 = vpop.f32.mrf.mxu0  ;;  %v1716_v1 = vsel %vm7027_vm12, %v1711_v30, %v1715_v34  ;;  %v3640_v43 = vsel %vm7006_vm9, %v6325_v55, %v9034_v61  ;;  %v2952_v13 = vrot.slane %v2950_v4, 5  ;;  %v2956_v20 = vrot.slane %v2954_v48, 4  ;;  %v2895_v48 = vld [vmem:[#allocation2 + $0x18] sm:$0xf] }
 0x1b1   : > { %v1764_v26 = vunpack.c.l.b16 %v1716_v1  ;;  %v2124_v25 = vpop.f32.mrf.mxu2  ;;  %v3765_v15 = vunpack.c.l.b16 %v3640_v43  ;;  %v2943_v17 = vrot.slane %v2941_v56, 4  ;;  %v2946_v63 = vrot.slane %v2944_v50, 5  ;;  %v3574_v50 = vld [vmem:[#allocation2 + $0x18] sm:$0xe] }
 0x1b2   : > { %v1889_v37 = vpop.f32.mrf.mxu1  ;;  %v2957_v24 = vor.u32 %v2956_v20, %v2952_v13  ;;  %v3646_v60 = vrot.slane %v2896_v19, 5  ;;  %v2960_v33 = vshll.u32 %v7552_v12, 16  ;;  %v2974_v56 = vshll.u32 %v2896_v19, 16 }
 0x1b3   : > { %v2502_v59 = vpop.f32.mrf.mxu3  ;;  %v2123_v6 = vadd.f32 %v2122_v38, %v1889_v37  ;;  %v1780_v7 = vpack.c.b16 %v1764_v26, %v1763_v2  ;;  %v3797_v41 = vpack.c.b16 %v3766_v11, %v3765_v15  ;;  %v6690_v38 = vld [vmem:[#allocation2 + $0x78] sm:$0xff]  ;;  %v2947_v8 = vor.u32 %v2946_v63, %v2943_v17 }
 0x1b4   : > { %v2958_v32 = vrot.slane %v2957_v24, 4  ;;  %v3648_v55 = vrot.slane %v3646_v60, 4  ;;  %v2978_v1 = vshrl.u32 %v2896_v19, 16  ;;  %v2962_v11 = vrot.slane %v2960_v33, 5 }
 0x1b5   : > { %v7596_v22 = vadd.f32 %v2502_v59, %v2123_v6  ;;  %1928 = vmatmul.bf16.gmra.mxu1 %v1780_v7  ;;  %v2965_v12 = vshrl.u32 %v2895_v48, 16  ;;  %v2968_v2 = vshll.u32 %v2895_v48, 16  ;;  %v3649_v26 = vrot.slane %v2897_v27, 5  ;;  %v6721_v59 = vld [vmem:[#allocation2 + $0x18] sm:$0xff] }
 0x1b6   : > { %3885 = vmatmul.bf16.vlgmr.msrb.gmra.mxu2 %v3797_v41  ;;  %v2963_v37 = vsel %vm7027_vm12, %v2958_v32, %v2962_v11  ;;  %v6326_v6 = vrot.slane %v3574_v50, 9  ;;  %v2976_v15 = vrot.slane %v2974_v56, 5  ;;  %v2984_v11 = vshll.u32 %v2897_v27, 16  ;;  %v6751_v50 = vld [vmem:[%s8983_s3 + $0x1f0] sm:$0xff] }
 0x1b7   : > { %v3650_v7 = vsel %vm7006_vm9, %v3648_v55, %v3649_v26  ;;  %v2967_v17 = vrot.slane %v2965_v12, 4  ;;  %v2970_v41 = vrot.slane %v2968_v2, 5  ;;  %v3341_v24 = vunpack.c.l.b16 %v2963_v37  ;;  %4873 = vmatpush.bf16.msra.mxu0 %v6751_v50  ;;  %v7623_v37 = vld [vmem:[#allocation2 + $0x1c] sm:$0xf]  ;;  %v7640_v50 = vld [vmem:[#allocation2 + $0x28] sm:$0xf] }
 0x1b8   : > { %v2785_v4 = vpop.f32.mrf.mxu0  ;;  %v3647_v33 = vsel %vm7006_vm9, %v6326_v6, %v3646_v60  ;;  %v3768_v48 = vunpack.c.l.b16 %v3650_v7  ;;  %v7625_v6 = vld [vmem:[#allocation2 + $0x2c] sm:$0x1]  ;;  %v4993_v7 = vld [vmem:[#allocation2 + $0x18] sm:$0xe] }
 0x1b9   : > { %v7600_v40 = vadd.f32 %v2785_v4, %v7365_v45  ;;  %v2127_v43 = vpop.f32.mrf.mxu2  ;;  %v2948_v45 = vrot.slane %v2947_v8, 4 }
 0x1ba   : > { %v1891_v30 = vpop.f32.mrf.mxu1 }
 0x1bb   : > { %v2504_v34 = vpop.f32.mrf.mxu3  ;;  %v2125_v61 = vadd.f32 %v2124_v25, %v1891_v30  ;;  %2824 = vmatmul.bf16.gmra.mxu0 %v6690_v38  ;;  %v2980_v25 = vrot.slane %v2978_v1, 4  ;;  %v2953_v19 = vsel %vm7027_vm12, %v2948_v45, %v2952_v13  ;;  %v3767_v13 = vunpack.c.l.b16 %v3647_v33  ;;  %v3575_v45 = vld [vmem:[#allocation2 + $0x24] sm:$0xe] }
 0x1bc   : > { %v3340_v32 = vunpack.c.l.b16 %v2953_v19  ;;  %v2971_v1 = vor.u32 %v2970_v41, %v2967_v17  ;;  %v6691_v19 = vld [vmem:[#allocation2 + $0x84] sm:$0xff] }
 0x1bd   : > { %v7602_v20 = vadd.f32 %v2504_v34, %v2125_v61  ;;  %v2981_v30 = vor.u32 %v2980_v25, %v2976_v15  ;;  %v2899_v34 = vld [vmem:[#allocation2 + $0x28] sm:$0xf] }
 0x1be   : > { %v3372_v61 = vpack.c.b16 %v3341_v24, %v3340_v32  ;;  %v3653_v12 = vrot.slane %v2899_v34, 5  ;;  %v2972_v26 = vrot.slane %v2971_v1, 4  ;;  %v5059_v32 = vrot.slane %v7623_v37, 5 }
 0x1bf   : > { %v2982_v2 = vrot.slane %v2981_v30, 4  ;;  %v3002_v1 = vshrl.u32 %v2899_v34, 16 }
 0x1c0   : > { %4199 = vmatmul.bf16.vlgmr.msrb.gmra.mxu3 %v6721_v59  ;;  %v2787_v63 = vpop.f32.mrf.mxu0  ;;  %v2986_v59 = vrot.slane %v2984_v11, 5  ;;  %v2977_v17 = vsel %vm7027_vm12, %v2972_v26, %v2976_v15  ;;  %v3655_v41 = vrot.slane %v3653_v12, 4  ;;  %v6501_v15 = vrot.slane %v4993_v7, 9 }
 0x1c1   : > { %v7613_v4 = vadd.f32 %v2787_v63, %v7379_v51  ;;  %v2129_v56 = vpop.f32.mrf.mxu2  ;;  %v3798_v51 = vpack.c.b16 %v3768_v48, %v3767_v13  ;;  %v6327_v48 = vrot.slane %v3575_v45, 9  ;;  %v2898_v13 = vld [vmem:[#allocation2 + $0x24] sm:$0xf] }
 0x1c2   : > { %v1894_v38 = vpop.f32.mrf.mxu1  ;;  %v2987_v33 = vsel %vm7027_vm12, %v2982_v2, %v2986_v59  ;;  %v4994_v2 = vld [vmem:[#allocation2 + $0x24] sm:$0xe]  ;;  %v5060_v26 = vsel %vm7006_vm9, %v6501_v15, %v5059_v32  ;;  %v2989_v59 = vshrl.u32 %v2898_v13, 16  ;;  %v2992_v7 = vshll.u32 %v2898_v13, 16  ;;  %v4995_v13 = vld [vmem:[#allocation2 + $0x30] sm:$0xe] }
 0x1c3   : > { %v2507_v8 = vpop.f32.mrf.mxu3  ;;  %v2128_v55 = vadd.f32 %v2127_v43, %v1894_v38  ;;  %v6759_v43 = vld [vmem:[%s8983_s3 + $0x230] sm:$0xff]  ;;  %v2998_v38 = vshll.u32 %v2899_v34, 16  ;;  %v3654_v11 = vsel %vm7006_vm9, %v6327_v48, %v3653_v12  ;;  %v6722_v34 = vld [vmem:[#allocation2 + $0x24] sm:$0xff]  ;;  %v7651_v12 = vld [vmem:[#allocation2 + $0x2c] sm:$0x1]  ;;  %v5066_v48 = vrot.slane %v7640_v50, 5 }
 0x1c4   : > { %5298 = vmatpush.bf16.msra.mxu1 %v6759_v43  ;;  %v5069_v23 = vrot.slane %v7651_v12, 5 }
 0x1c5   : > { %v7618_v60 = vadd.f32 %v2507_v8, %v2128_v55  ;;  %3460 = vmatmul.bf16.vlgmr.msrb.gmra.mxu1 %v3372_v61  ;;  %v7634_v8 = vld [vmem:[#allocation2 + $0x20] sm:$0x1]  ;;  %v3342_v61 = vunpack.c.l.b16 %v2977_v17  ;;  %v3004_v17 = vrot.slane %v3002_v1, 4  ;;  %v5068_v58 = vrot.slane %v5066_v48, 4 }
 0x1c6   : > { %3890 = vmatmul.bf16.gmra.mxu2 %v3798_v51  ;;  %v5061_v51 = vrot.slane %v5059_v32, 4  ;;  %v5062_v45 = vrot.slane %v7634_v8, 5 }
 0x1c8   : > { %v2790_v27 = vpop.f32.mrf.mxu0 }
 0x1c9   : > { %v7628_v25 = vadd.f32 %v2790_v27, %v7399_v46  ;;  %v2132_v55 = vpop.f32.mrf.mxu2  ;;  %v3656_v46 = vrot.slane %v7625_v6, 5  ;;  %v3343_v27 = vunpack.c.l.b16 %v2987_v33  ;;  %v5185_v33 = vunpack.c.l.b16 %v5060_v26 }
 0x1ca   : > { %v1896_v63 = vpop.f32.mrf.mxu1 }
 0x1cb   : > { %9035 = vst [vmem:[#allocation19_spill] sm:$0xff] %v7628_v25  ;;  %v2509_v24 = vpop.f32.mrf.mxu3  ;;  %v2130_v30 = vadd.f32 %v2129_v56, %v1896_v63  ;;  %2829 = vmatmul.bf16.gmra.mxu0 %v6691_v19  ;;  %v3657_v56 = vsel %vm7006_vm9, %v3655_v41, %v3656_v46  ;;  %v7649_v19 = vrot.slane %v2998_v38, 5  ;;  %v7653_v63 = vld [vmem:[#allocation2 + $0x34] sm:$0xf]  ;;  %v6502_v41 = vrot.slane %v4994_v2, 9 }
 0x1cc   : > { %v3770_v46 = vunpack.c.l.b16 %v3657_v56  ;;  %v3373_v2 = vpack.c.b16 %v3343_v27, %v3342_v61  ;;  %v7851_v25 = vld [vmem:[#allocation2 + $0x68] sm:$0x1] }
 0x1cd   : > { %v7642_v43 = vadd.f32 %v2509_v24, %v2130_v30  ;;  %v5063_v24 = vsel %vm7006_vm9, %v5061_v51, %v5062_v45  ;;  %v3769_v30 = vunpack.c.l.b16 %v3654_v11  ;;  %v5067_v1 = vsel %vm7006_vm9, %v6502_v41, %v5066_v48 }
 0x1ce   : > { %v5186_v15 = vunpack.c.l.b16 %v5063_v24  ;;  %v2991_v45 = vrot.slane %v2989_v59, 4  ;;  %v5073_v11 = vrot.slane %v7653_v63, 5  ;;  %v2994_v24 = vrot.slane %v2992_v7, 5 }
 0x1cf   : > { %v5070_v41 = vsel %vm7006_vm9, %v5068_v58, %v5069_v23  ;;  %v6503_v48 = vrot.slane %v4995_v13, 9  ;;  %v5187_v52 = vunpack.c.l.b16 %v5067_v1  ;;  %v3799_v59 = vpack.c.b16 %v3770_v46, %v3769_v30  ;;  %v6692_v1 = vld [vmem:[#allocation2 + $0x90] sm:$0xff] }
 0x1d0   : > { %4204 = vmatmul.bf16.gmra.mxu3 %v6722_v34  ;;  %v2792_v32 = vpop.f32.mrf.mxu0  ;;  %v7666_v34 = vpack.c.b16 %v5186_v15, %v5185_v33  ;;  %v5188_v61 = vunpack.c.l.b16 %v5070_v41  ;;  %v5075_v27 = vrot.slane %v5073_v11, 4  ;;  %v3008_v33 = vshll.u32 %v7625_v6, 16 }
 0x1d1   : > { %v7659_v38 = vadd.f32 %v2792_v32, %v7413_v36  ;;  %v2134_v26 = vpop.f32.mrf.mxu2  ;;  %v3005_v36 = vor.u32 %v3004_v17, %v7649_v19  ;;  %v2902_v32 = vld [vmem:[#allocation2 + $0x34] sm:$0xf]  ;;  %v5074_v15 = vsel %vm7006_vm9, %v6503_v48, %v5073_v11  ;;  %v2995_v23 = vor.u32 %v2994_v24, %v2991_v45 }
 0x1d2   : > { %9037 = vst [vmem:[#allocation21_spill] sm:$0xff] %v7666_v34  ;;  %v1899_v56 = vpop.f32.mrf.mxu1  ;;  %v3660_v17 = vrot.slane %v2902_v32, 5  ;;  %v7678_v35 = vpack.c.b16 %v5188_v61, %v5187_v52  ;;  %v5077_v58 = vsel %vm7006_vm9, %v5075_v27, %v5076_v42  ;;  %v5189_v46 = vunpack.c.l.b16 %v5074_v15  ;;  %v2901_v27 = vld [vmem:[#allocation2 + $0x30] sm:$0xf] }
 0x1d3   : > { %9036 = vst [vmem:[#allocation20_spill] sm:$0xff] %v7659_v38  ;;  %v2512_v51 = vpop.f32.mrf.mxu3  ;;  %v2133_v9 = vadd.f32 %v2132_v55, %v1899_v56  ;;  %v3006_v30 = vrot.slane %v3005_v36, 4  ;;  %v5190_v6 = vunpack.c.l.b16 %v5077_v58  ;;  %v3010_v11 = vrot.slane %v3008_v33, 5 }
 0x1d4   : > { %9038 = vst [vmem:[#allocation22_spill] sm:$0xff] %v7678_v35  ;;  %v3662_v52 = vrot.slane %v3660_v17, 4  ;;  %v3022_v56 = vshll.u32 %v2902_v32, 16  ;;  %v3026_v41 = vshrl.u32 %v2902_v32, 16  ;;  %v2996_v36 = vrot.slane %v2995_v23, 4  ;;  %v6723_v32 = vld [vmem:[#allocation2 + $0x30] sm:$0xff] }
 0x1d5   : > { %v7676_v7 = vadd.f32 %v2512_v51, %v2133_v9  ;;  %3465 = vmatmul.bf16.gmra.mxu1 %v3373_v2  ;;  %v7685_v9 = vld [vmem:[#allocation2 + $0x38] sm:$0x1]  ;;  %v3576_v2 = vld [vmem:[#allocation2 + $0x30] sm:$0xe]  ;;  %v7687_v45 = vpack.c.b16 %v5190_v6, %v5189_v46  ;;  %v3013_v46 = vshrl.u32 %v2901_v27, 16  ;;  %v3016_v6 = vshll.u32 %v2901_v27, 16 }
 0x1d6   : > { %3895 = vmatmul.bf16.gmra.mxu2 %v3799_v59  ;;  %v3663_v61 = vrot.slane %v7685_v9, 5  ;;  %v3001_v59 = vsel %vm7027_vm12, %v2996_v36, %v7649_v19  ;;  %v6328_v33 = vrot.slane %v3576_v2, 9  ;;  %v2908_v35 = vld [vmem:[#allocation2 + $0x4c] sm:$0xf] }
 0x1d7   : > { %9040 = vst [vmem:[#allocation24_spill] sm:$0xff] %v7687_v45  ;;  %v3344_v2 = vunpack.c.l.b16 %v3001_v59  ;;  %v3015_v27 = vrot.slane %v3013_v46, 4  ;;  %v6750_v59 = vld [vmem:[%s8983_s3 + $0x1e8] sm:$0xff]  ;;  %v3667_v46 = vrot.slane %v2905_v28, 5 }
 0x1d8   : > { %v2795_v55 = vpop.f32.mrf.mxu0  ;;  %v3664_v58 = vsel %vm7006_vm9, %v3662_v52, %v3663_v61  ;;  %v7708_v52 = vld [vmem:[#allocation2 + $0x44] sm:$0x1]  ;;  %4874 = vmatpush.bf16.msra.mxu0 %v6750_v59 }
 0x1d9   : > { %v7683_v13 = vadd.f32 %v2795_v55, %v7430_v53  ;;  %v2137_v42 = vpop.f32.mrf.mxu2  ;;  %v3011_v53 = vsel %vm7027_vm12, %v3006_v30, %v3010_v11  ;;  %v7699_v55 = vrot.slane %v3022_v56, 5  ;;  %v3661_v30 = vsel %vm7006_vm9, %v6328_v33, %v3660_v17  ;;  %v4996_v11 = vld [vmem:[#allocation2 + $0x3c] sm:$0xe] }
 0x1da   : > { %v1901_v24 = vpop.f32.mrf.mxu1  ;;  %v3345_v23 = vunpack.c.l.b16 %v3011_v53  ;;  %v3771_v56 = vunpack.c.l.b16 %v3661_v30  ;;  %v6504_v36 = vrot.slane %v4996_v11, 9  ;;  %v3018_v33 = vrot.slane %v3016_v6, 5 }
 0x1db   : > { %9039 = vst [vmem:[#allocation23_spill] sm:$0xff] %v7683_v13  ;;  %v2514_v51 = vpop.f32.mrf.mxu3  ;;  %2834 = vmatmul.bf16.gmra.mxu0 %v6692_v1  ;;  %v2135_v48 = vadd.f32 %v2134_v26, %v1901_v24  ;;  %v3028_v26 = vrot.slane %v3026_v41, 4  ;;  %v7703_v1 = vld [vmem:[#allocation2 + $0x40] sm:$0xf]  ;;  %v3772_v24 = vunpack.c.l.b16 %v3664_v58  ;;  %v5083_v30 = vrot.slane %v7708_v52, 5  ;;  %v6695_v13 = vld [vmem:[#allocation2 + $0xb4] sm:$0xff] }
 0x1dc   : > { %v5080_v17 = vrot.slane %v7703_v1, 5  ;;  %v3374_v61 = vpack.c.b16 %v3345_v23, %v3344_v2  ;;  %v3019_v6 = vor.u32 %v3018_v33, %v3015_v27  ;;  %v3669_v59 = vrot.slane %v3667_v46, 4 }
 0x1dd   : > { %v7695_v15 = vadd.f32 %v2514_v51, %v2135_v48  ;;  %v3029_v41 = vor.u32 %v3028_v26, %v7699_v55  ;;  %v3800_v11 = vpack.c.b16 %v3772_v24, %v3771_v56  ;;  %v6693_v56 = vld [vmem:[#allocation2 + $0x9c] sm:$0xff] }
 0x1de   : > { %v5081_v58 = vsel %vm7006_vm9, %v6504_v36, %v5080_v17  ;;  %v5082_v26 = vrot.slane %v5080_v17, 4  ;;  %v3020_v33 = vrot.slane %v3019_v6, 4 }
 0x1df   : > { %v3030_v23 = vrot.slane %v3029_v41, 4  ;;  %v5191_v2 = vunpack.c.l.b16 %v5081_v58  ;;  %v7729_v41 = vld [vmem:[#allocation2 + $0x44] sm:$0x1]  ;;  %v2904_v58 = vld [vmem:[#allocation2 + $0x3c] sm:$0xf] }
 0x1e0   : > { %4209 = vmatmul.bf16.gmra.mxu3 %v6723_v32  ;;  %v2797_v19 = vpop.f32.mrf.mxu0  ;;  %v3032_v32 = vshll.u32 %v7685_v9, 16  ;;  %v6758_v9 = vld [vmem:[%s8983_s3 + $0x228] sm:$0xff]  ;;  %v3037_v6 = vshrl.u32 %v2904_v58, 16 }
 0x1e1   : > { %v7706_v51 = vadd.f32 %v2797_v19, %v7444_v62  ;;  %v2139_v19 = vpop.f32.mrf.mxu2  ;;  %5299 = vmatpush.bf16.msra.mxu1 %v6758_v9  ;;  %v3670_v9 = vrot.slane %v7729_v41, 5 }
 0x1e2   : > { %v1904_v48 = vpop.f32.mrf.mxu1 }
 0x1e3   : > { %9041 = vst [vmem:[#allocation25_spill] sm:$0xff] %v7706_v51  ;;  %v2517_v53 = vpop.f32.mrf.mxu3  ;;  %v2138_v62 = vadd.f32 %v2137_v42, %v1904_v48  ;;  %v5084_v42 = vsel %vm7006_vm9, %v5082_v26, %v5083_v30  ;;  %v3034_v48 = vrot.slane %v3032_v32, 5  ;;  %v3046_v32 = vshll.u32 %v2905_v28, 16 }
 0x1e4   : > { %v5192_v36 = vunpack.c.l.b16 %v5084_v42  ;;  %v3050_v30 = vshrl.u32 %v2905_v28, 16  ;;  %v3025_v42 = vsel %vm7027_vm12, %v3020_v33, %v7699_v55 }
 0x1e5   : > { %v7719_v21 = vadd.f32 %v2517_v53, %v2138_v62  ;;  %3470 = vmatmul.bf16.gmra.mxu1 %v3374_v61  ;;  %v3035_v61 = vsel %vm7027_vm12, %v3030_v23, %v3034_v48  ;;  %v3577_v62 = vld [vmem:[#allocation2 + $0x3c] sm:$0xe]  ;;  %v3671_v48 = vsel %vm7006_vm9, %v3669_v59, %v3670_v9  ;;  %v7743_v14 = vrot.slane %v3046_v32, 5 }
 0x1e6   : > { %3900 = vmatmul.bf16.gmra.mxu2 %v3800_v11  ;;  %v7731_v53 = vpack.c.b16 %v5192_v36, %v5191_v2  ;;  %v3347_v2 = vunpack.c.l.b16 %v3035_v61  ;;  %v6329_v36 = vrot.slane %v3577_v62, 9  ;;  %v3052_v28 = vrot.slane %v3050_v30, 4 }
 0x1e7   : > { %v3346_v45 = vunpack.c.l.b16 %v3025_v42  ;;  %v3774_v62 = vunpack.c.l.b16 %v3671_v48  ;;  %v3039_v9 = vrot.slane %v3037_v6, 4  ;;  %v3674_v48 = vrot.slane %v2908_v35, 5 }
 0x1e8   : > { %v2800_v17 = vpop.f32.mrf.mxu0  ;;  %9043 = vst [vmem:[#allocation27_spill] sm:$0xff] %v7731_v53  ;;  %v3668_v55 = vsel %vm7006_vm9, %v6329_v36, %v3667_v46  ;;  %v3053_v42 = vor.u32 %v3052_v28, %v7743_v14 }
 0x1e9   : > { %v7727_v24 = vadd.f32 %v2800_v17, %v7464_v3  ;;  %v2142_v3 = vpop.f32.mrf.mxu2  ;;  %v6724_v17 = vld [vmem:[#allocation2 + $0x3c] sm:$0xff]  ;;  %v3375_v59 = vpack.c.b16 %v3347_v2, %v3346_v45 }
 0x1ea   : > { %v1906_v26 = vpop.f32.mrf.mxu1 }
 0x1eb   : > { %9042 = vst [vmem:[#allocation26_spill] sm:$0xff] %v7727_v24  ;;  %v2519_v27 = vpop.f32.mrf.mxu3  ;;  %2839 = vmatmul.bf16.gmra.mxu0 %v6693_v56  ;;  %v2140_v11 = vadd.f32 %v2139_v19, %v1906_v26  ;;  %v3040_v56 = vshll.u32 %v2904_v58, 16  ;;  %v7745_v19 = vld [vmem:[#allocation2 + $0x4c] sm:$0xf]  ;;  %v4997_v26 = vld [vmem:[#allocation2 + $0x48] sm:$0xe] }
 0x1ec   : > { %v6505_v33 = vrot.slane %v4997_v26, 9  ;;  %v5087_v58 = vrot.slane %v7745_v19, 5  ;;  %v2907_v26 = vld [vmem:[#allocation2 + $0x48] sm:$0xf]  ;;  %v3579_v24 = vld [vmem:[#allocation2 + $0x54] sm:$0xe] }
 0x1ed   : > { %v7739_v23 = vadd.f32 %v2519_v27, %v2140_v11  ;;  %v7752_v27 = vld [vmem:[#allocation2 + $0x50] sm:$0x1]  ;;  %v3773_v11 = vunpack.c.l.b16 %v3668_v55 }
 0x1ee   : > { %v5090_v36 = vrot.slane %v7752_v27, 5 }
 0x1ef   : > { %v3801_v45 = vpack.c.b16 %v3774_v62, %v3773_v11  ;;  %v6694_v62 = vld [vmem:[#allocation2 + $0xa8] sm:$0xff] }
 0x1f0   : > { %4214 = vmatmul.bf16.gmra.mxu3 %v6724_v17  ;;  %v2802_v53 = vpop.f32.mrf.mxu0  ;;  %v3042_v17 = vrot.slane %v3040_v56, 5  ;;  %v3056_v56 = vshll.u32 %v7729_v41, 16 }
 0x1f1   : > { %v7750_v61 = vadd.f32 %v2802_v53, %v7489_v16  ;;  %v2144_v46 = vpop.f32.mrf.mxu2  ;;  %v5088_v16 = vsel %vm7006_vm9, %v6505_v33, %v5087_v58  ;;  %v5089_v53 = vrot.slane %v5087_v58, 4  ;;  %v3054_v33 = vrot.slane %v3053_v42, 4  ;;  %v6749_v42 = vld [vmem:[%s8983_s3 + $0x1e0] sm:$0xff] }
 0x1f2   : > { %v1909_v32 = vpop.f32.mrf.mxu1  ;;  %v3058_v41 = vrot.slane %v3056_v56, 5  ;;  %v6725_v56 = vld [vmem:[#allocation2 + $0x48] sm:$0xff]  ;;  %4875 = vmatpush.bf16.msra.mxu0 %v6749_v42 }
 0x1f3   : > { %9044 = vst [vmem:[#allocation28_spill] sm:$0xff] %v7750_v61  ;;  %v2522_v30 = vpop.f32.mrf.mxu3  ;;  %v2143_v34 = vadd.f32 %v2142_v3, %v1909_v32  ;;  %v5091_v6 = vsel %vm7006_vm9, %v5089_v53, %v5090_v36  ;;  %v5193_v3 = vunpack.c.l.b16 %v5088_v16  ;;  %v3043_v32 = vor.u32 %v3042_v17, %v3039_v9  ;;  %v3578_v16 = vld [vmem:[#allocation2 + $0x48] sm:$0xe] }
 0x1f4   : > { %v5194_v28 = vunpack.c.l.b16 %v5091_v6  ;;  %v3676_v61 = vrot.slane %v3674_v48, 4  ;;  %v3070_v17 = vshll.u32 %v2908_v35, 16 }
 0x1f5   : > { %v7759_v2 = vadd.f32 %v2522_v30, %v2143_v34  ;;  %3475 = vmatmul.bf16.gmra.mxu1 %v3375_v59  ;;  %v7767_v34 = vld [vmem:[#allocation2 + $0x50] sm:$0x1]  ;;  %v3061_v59 = vshrl.u32 %v2907_v26, 16  ;;  %v3064_v30 = vshll.u32 %v2907_v26, 16  ;;  %v3059_v26 = vsel %vm7027_vm12, %v3054_v33, %v3058_v41  ;;  %v7789_v33 = vld [vmem:[#allocation2 + $0x58] sm:$0xf] }
 0x1f6   : > { %3905 = vmatmul.bf16.gmra.mxu2 %v3801_v45  ;;  %v7769_v11 = vpack.c.b16 %v5194_v28, %v5193_v3  ;;  %v3677_v9 = vrot.slane %v7767_v34, 5 }
 0x1f7   : > { %v3063_v3 = vrot.slane %v3061_v59, 4  ;;  %v3066_v28 = vrot.slane %v3064_v30, 5  ;;  %v3349_v30 = vunpack.c.l.b16 %v3059_v26 }
 0x1f8   : > { %v2805_v55 = vpop.f32.mrf.mxu0  ;;  %9046 = vst [vmem:[#allocation30_spill] sm:$0xff] %v7769_v11 }
 0x1f9   : > { %v7765_v58 = vadd.f32 %v2805_v55, %v7516_v10  ;;  %v2147_v6 = vpop.f32.mrf.mxu2  ;;  %v3074_v10 = vshrl.u32 %v2908_v35, 16  ;;  %v3044_v55 = vrot.slane %v3043_v32, 4  ;;  %v6748_v35 = vld [vmem:[%s8983_s3 + $0x1d8] sm:$0xff] }
 0x1fa   : > { %v1911_v53 = vpop.f32.mrf.mxu1  ;;  %4876 = vmatpush.bf16.msra.mxu0 %v6748_v35  ;;  %v7806_v35 = vld [vmem:[#allocation2 + $0x5c] sm:$0x1] }
 0x1fb   : > { %9045 = vst [vmem:[#allocation29_spill] sm:$0xff] %v7765_v58  ;;  %v2524_v36 = vpop.f32.mrf.mxu3  ;;  %2844 = vmatmul.bf16.gmra.mxu0 %v6694_v62  ;;  %v2145_v45 = vadd.f32 %v2144_v46, %v1911_v53  ;;  %v6330_v62 = vrot.slane %v3578_v16, 9  ;;  %v3678_v46 = vsel %vm7006_vm9, %v3676_v61, %v3677_v9  ;;  %v3049_v32 = vsel %vm7027_vm12, %v3044_v55, %v7743_v14  ;;  %v7787_v53 = vld [vmem:[#allocation2 + $0x58] sm:$0xf] }
 0x1fc   : > { %v7793_v61 = vrot.slane %v3070_v17, 5  ;;  %v3076_v41 = vrot.slane %v3074_v10, 4  ;;  %v3067_v9 = vor.u32 %v3066_v28, %v3063_v3  ;;  %v3348_v42 = vunpack.c.l.b16 %v3049_v32  ;;  %v7804_v3 = vld [vmem:[#allocation2 + $0x5c] sm:$0x1]  ;;  %v4998_v28 = vld [vmem:[#allocation2 + $0x54] sm:$0xe] }
 0x1fd   : > { %v7777_v11 = vadd.f32 %v2524_v36, %v2145_v45  ;;  %v3675_v36 = vsel %vm7006_vm9, %v6330_v62, %v3674_v48  ;;  %v3776_v45 = vunpack.c.l.b16 %v3678_v46  ;;  %v3681_v14 = vrot.slane %v7787_v53, 5  ;;  %9048 = vst [vmem:[#allocation32_spill] sm:$0xff] %v7804_v3  ;;  %v2910_v32 = vld [vmem:[#allocation2 + $0x54] sm:$0xf] }
 0x1fe   : > { %v5094_v55 = vrot.slane %v7789_v33, 5  ;;  %v3775_v26 = vunpack.c.l.b16 %v3675_v36  ;;  %v3376_v17 = vpack.c.b16 %v3349_v30, %v3348_v42  ;;  %v3077_v10 = vor.u32 %v3076_v41, %v7793_v61  ;;  %v6757_v36 = vld [vmem:[%s8983_s3 + $0x220] sm:$0xff]  ;;  %v6746_v41 = vld [vmem:[%s8983_s3 + $0x1c8] sm:$0xff] }
 0x1ff   : > { %v3068_v46 = vrot.slane %v3067_v9, 4  ;;  %v3683_v30 = vrot.slane %v3681_v14, 4  ;;  %v3094_v9 = vshll.u32 %v7787_v53, 16  ;;  %v5097_v42 = vrot.slane %v7804_v3, 5  ;;  %5300 = vmatpush.bf16.msra.mxu1 %v6757_v36 }
 0x200   : > { %4219 = vmatmul.bf16.gmra.mxu3 %v6725_v56  ;;  %v2807_v59 = vpop.f32.mrf.mxu0  ;;  %v3802_v62 = vpack.c.b16 %v3776_v45, %v3775_v26  ;;  %v5096_v45 = vrot.slane %v5094_v55, 4  ;;  %v6331_v26 = vrot.slane %v3579_v24, 9  ;;  %v3088_v38 = vshll.u32 %v2910_v32, 16 }
 0x201   : > { %v7796_v16 = vadd.f32 %v2807_v59, %v7537_v31  ;;  %v2149_v48 = vpop.f32.mrf.mxu2  ;;  %v6747_v31 = vld [vmem:[%s8983_s3 + $0x1d0] sm:$0xff]  ;;  %v3073_v24 = vsel %vm7027_vm12, %v3068_v46, %v7793_v61 }
 0x202   : > { %v1914_v56 = vpop.f32.mrf.mxu1  ;;  %4877 = vmatpush.bf16.msra.mxu0 %v6747_v31  ;;  %v3085_v31 = vshrl.u32 %v2910_v32, 16  ;;  %v3682_v32 = vsel %vm7006_vm9, %v6331_v26, %v3681_v14  ;;  %v3090_v14 = vrot.slane %v3088_v38, 5  ;;  %v3580_v26 = vld [vmem:[#allocation2 + $0x60] sm:$0xe] }
 0x203   : > { %9047 = vst [vmem:[#allocation31_spill] sm:$0xff] %v7796_v16  ;;  %v2527_v58 = vpop.f32.mrf.mxu3  ;;  %v2148_v51 = vadd.f32 %v2147_v6, %v1914_v56  ;;  %v3080_v6 = vshll.u32 %v7767_v34, 16  ;;  %v3078_v56 = vrot.slane %v3077_v10, 4 }
 0x205   : > { %v7808_v59 = vadd.f32 %v2527_v58, %v2148_v51  ;;  %3480 = vmatmul.bf16.gmra.mxu1 %v3376_v17  ;;  %v3098_v51 = vshrl.u32 %v7787_v53, 16  ;;  %v6506_v58 = vrot.slane %v4998_v28, 9  ;;  %v3684_v17 = vrot.slane %v7806_v35, 5 }
 0x206   : > { %3910 = vmatmul.bf16.gmra.mxu2 %v3802_v62  ;;  %v7824_v62 = vld [vmem:[#allocation2 + $0x64] sm:$0xf]  ;;  %v5098_v28 = vsel %vm7006_vm9, %v5096_v45, %v5097_v42  ;;  %v3082_v10 = vrot.slane %v3080_v6, 5  ;;  %4878 = vmatpush.bf16.msra.mxu0 %v6746_v41  ;;  %v3087_v41 = vrot.slane %v3085_v31, 4  ;;  %v6332_v31 = vrot.slane %v3580_v26, 9 }
 0x207   : > { %9049 = vst [vmem:[#allocation33_spill] sm:$0xff] %v7808_v59  ;;  %v5095_v53 = vsel %vm7006_vm9, %v6506_v58, %v5094_v55  ;;  %v5196_v36 = vunpack.c.l.b16 %v5098_v28  ;;  %v7837_v55 = vrot.slane %v3094_v9, 5  ;;  %v3100_v58 = vrot.slane %v3098_v51, 4  ;;  %v4312_v28 = vld [vmem:[#allocation2 + $0x18] sm:$0xf] }
 0x208   : > { %v2810_v34 = vpop.f32.mrf.mxu0  ;;  %v3083_v61 = vsel %vm7027_vm12, %v3078_v56, %v3082_v10  ;;  %v3688_v46 = vrot.slane %v7824_v62, 5  ;;  %v5195_v6 = vunpack.c.l.b16 %v5095_v53  ;;  %v6726_v9 = vld [vmem:[#allocation2 + $0x54] sm:$0xff]  ;;  %v3350_v51 = vunpack.c.l.b16 %v3073_v24 }
 0x209   : > { %v7822_v16 = vadd.f32 %v2810_v34, %v7563_v5  ;;  %v3685_v34 = vsel %vm7006_vm9, %v3683_v30, %v3684_v17  ;;  %v2152_v42 = vpop.f32.mrf.mxu2  ;;  %v3351_v56 = vunpack.c.l.b16 %v3083_v61  ;;  %v3101_v10 = vor.u32 %v3100_v58, %v7837_v55 }
 0x20a   : > { %v1916_v59 = vpop.f32.mrf.mxu1  ;;  %v3778_v17 = vunpack.c.l.b16 %v3685_v34  ;;  %v3690_v53 = vrot.slane %v3688_v46, 4  ;;  %v4374_v34 = vshrl.u32 %v7623_v37, 16  ;;  %v3691_v58 = vrot.slane %v7851_v25, 5 }
 0x20b   : > { %9050 = vst [vmem:[#allocation34_spill] sm:$0xff] %v7822_v16  ;;  %v2529_v5 = vpop.f32.mrf.mxu3  ;;  %2849 = vmatmul.bf16.gmra.mxu0 %v6695_v13  ;;  %v2150_v45 = vadd.f32 %v2149_v48, %v1916_v59  ;;  %v6745_v13 = vld [vmem:[%s8983_s3 + $0x1c0] sm:$0xff]  ;;  %v3777_v48 = vunpack.c.l.b16 %v3682_v32  ;;  %v7847_v59 = vpack.c.b16 %v5196_v36, %v5195_v6  ;;  %v3104_v16 = vshll.u32 %v7806_v35, 16 }
 0x20c   : > { %4879 = vmatpush.bf16.msra.mxu0 %v6745_v13  ;;  %v3091_v32 = vor.u32 %v3090_v14, %v3087_v41  ;;  %v4370_v36 = vshll.u32 %v7623_v37, 16  ;;  %v3377_v13 = vpack.c.b16 %v3351_v56, %v3350_v51  ;;  %v3689_v26 = vsel %vm7006_vm9, %v6332_v31, %v3688_v46  ;;  %v4315_v51 = vld [vmem:[#allocation2 + $0x24] sm:$0xf] }
 0x20d   : > { %v7845_v30 = vadd.f32 %v2529_v5, %v2150_v45  ;;  %9052 = vst [vmem:[#allocation36_spill] sm:$0xff] %v7847_v59  ;;  %v4361_v5 = vshrl.u32 %v4312_v28, 16  ;;  %v4364_v45 = vshll.u32 %v4312_v28, 16  ;;  %v3803_v6 = vpack.c.b16 %v3778_v17, %v3777_v48  ;;  %v6696_v48 = vld [vmem:[#allocation2 + $0xc0] sm:$0xff] }
 0x20e   : > { %v7863_v37 = vrot.slane %v4370_v36, 5  ;;  %v3779_v56 = vunpack.c.l.b16 %v3689_v26  ;;  %v4380_v31 = vshll.u32 %v7634_v8, 16  ;;  %v4388_v36 = vshll.u32 %v4315_v51, 16 }
 0x20f   : > { %9051 = vst [vmem:[#allocation35_spill] sm:$0xff] %v7845_v30  ;;  %v4363_v41 = vrot.slane %v4361_v5, 4  ;;  %v4366_v14 = vrot.slane %v4364_v45, 5  ;;  %v4376_v30 = vrot.slane %v4374_v34, 4  ;;  %v7875_v5 = vld [vmem:[#allocation2 + $0x64] sm:$0xf] }
 0x210   : > { %4224 = vmatmul.bf16.gmra.mxu3 %v6726_v9  ;;  %v2812_v38 = vpop.f32.mrf.mxu0  ;;  %v3102_v9 = vrot.slane %v3101_v10, 4 }
 0x211   : > { %v7854_v24 = vadd.f32 %v2812_v38, %v7584_v49  ;;  %v2154_v28 = vpop.f32.mrf.mxu2  ;;  %v3692_v49 = vsel %vm7006_vm9, %v3690_v53, %v3691_v58  ;;  %v3092_v38 = vrot.slane %v3091_v32, 4  ;;  %v4398_v53 = vshrl.u32 %v7640_v50, 16 }
 0x212   : > { %v1919_v61 = vpop.f32.mrf.mxu1  ;;  %v3780_v17 = vunpack.c.l.b16 %v3692_v49  ;;  %v4385_v32 = vshrl.u32 %v4315_v51, 16  ;;  %v4318_v49 = vld [vmem:[#allocation2 + $0x30] sm:$0xf]  ;;  %v4390_v51 = vrot.slane %v4388_v36, 5 }
 0x213   : > { %9053 = vst [vmem:[#allocation37_spill] sm:$0xff] %v7854_v24  ;;  %v2532_v35 = vpop.f32.mrf.mxu3  ;;  %v2153_v59 = vadd.f32 %v2152_v42, %v1919_v61  ;;  %v3106_v24 = vrot.slane %v3104_v16, 5  ;;  %v3097_v42 = vsel %vm7027_vm12, %v3092_v38, %v7837_v55  ;;  %v4367_v16 = vor.u32 %v4366_v14, %v4363_v41 }
 0x214   : > { %v4377_v55 = vor.u32 %v4376_v30, %v7863_v37  ;;  %v3804_v8 = vpack.c.b16 %v3780_v17, %v3779_v56  ;;  %v4400_v30 = vrot.slane %v4398_v53, 4  ;;  %v4387_v38 = vrot.slane %v4385_v32, 4  ;;  %v2913_v56 = vld [vmem:[#allocation2 + $0x60] sm:$0xf] }
 0x215   : > { %v7865_v3 = vadd.f32 %v2532_v35, %v2153_v59  ;;  %3485 = vmatmul.bf16.gmra.mxu1 %v3377_v13  ;;  %v3107_v46 = vsel %vm7027_vm12, %v3102_v9, %v3106_v24  ;;  %v4394_v59 = vshll.u32 %v7640_v50, 16  ;;  %v7881_v24 = vunpack.c.l.b16 %v3097_v42  ;;  %v7888_v42 = vld [vmem:[#allocation2 + $0x68] sm:$0x1] }
 0x216   : > { %3915 = vmatmul.bf16.gmra.mxu2 %v3803_v6  ;;  %v3353_v34 = vunpack.c.l.b16 %v3107_v46  ;;  %v3118_v35 = vshll.u32 %v7824_v62, 16  ;;  %v3122_v50 = vshrl.u32 %v7824_v62, 16  ;;  %v9007_v13 = vrot.slane %v7875_v5, 5  ;;  %v6727_v46 = vld [vmem:[#allocation2 + $0x60] sm:$0xff] }
 0x217   : > { %v4382_v9 = vrot.slane %v4380_v31, 5  ;;  %v7886_v26 = vrot.slane %v4394_v59, 5  ;;  %v4368_v41 = vrot.slane %v4367_v16, 4  ;;  %v4378_v14 = vrot.slane %v4377_v55, 4 }
 0x218   : > { %v2815_v10 = vpop.f32.mrf.mxu0  ;;  %v4404_v62 = vshll.u32 %v7651_v12, 16  ;;  %v4422_v17 = vshrl.u32 %v7653_v63, 16  ;;  %v3124_v31 = vrot.slane %v3122_v50, 4  ;;  %v4409_v59 = vshrl.u32 %v4318_v49, 16 }
 0x219   : > { %v7878_v45 = vadd.f32 %v2815_v10, %v7596_v22  ;;  %v2157_v22 = vpop.f32.mrf.mxu2  ;;  %v7895_v10 = vrot.slane %v3118_v35, 5  ;;  %v5103_v16 = vrot.slane %v9007_v13, 4  ;;  %v4373_v55 = vsel %vm7027_vm12, %v4368_v41, %v7863_v37 }
 0x21a   : > { %v1921_v58 = vpop.f32.mrf.mxu1  ;;  %v4401_v32 = vor.u32 %v4400_v30, %v7886_v26  ;;  %v4412_v12 = vshll.u32 %v4318_v49, 16  ;;  %v5104_v36 = vrot.slane %v7888_v42, 5  ;;  %v3112_v35 = vshll.u32 %v2913_v56, 16 }
 0x21b   : > { %9054 = vst [vmem:[#allocation38_spill] sm:$0xff] %v7878_v45  ;;  %v2534_v61 = vpop.f32.mrf.mxu3  ;;  %2854 = vmatmul.bf16.gmra.mxu0 %v6696_v48  ;;  %v2155_v6 = vadd.f32 %v2154_v28, %v1921_v58  ;;  %v4418_v28 = vshll.u32 %v7653_v63, 16  ;;  %v4383_v58 = vsel %vm7027_vm12, %v4378_v14, %v4382_v9  ;;  %v3378_v50 = vpack.c.b16 %v3353_v34, %v7881_v24 }
 0x21c   : > { %v7914_v37 = vsel %vm7006_vm9, %v5103_v16, %v5104_v36  ;;  %v4760_v41 = vunpack.c.l.b16 %v4373_v55  ;;  %v4391_v13 = vor.u32 %v4390_v51, %v4387_v38  ;;  %v7919_v9 = vrot.slane %v4409_v59, 4 }
 0x21d   : > { %v7890_v48 = vadd.f32 %v2534_v61, %v2155_v6  ;;  %v3109_v61 = vshrl.u32 %v2913_v56, 16  ;;  %v7910_v6 = vrot.slane %v4418_v28, 5  ;;  %v4761_v24 = vunpack.c.l.b16 %v4383_v58 }
 0x21e   : > { %v7921_v34 = vrot.slane %v4401_v32, 4  ;;  %v7923_v28 = vrot.slane %v4412_v12, 5  ;;  %v3114_v36 = vrot.slane %v3112_v35, 5  ;;  %v7926_v55 = vrot.slane %v4404_v62, 5  ;;  %v2916_v62 = vld [vmem:[#allocation2 + $0x6c] sm:$0xf] }
 0x21f   : > { %v3111_v16 = vrot.slane %v3109_v61, 4  ;;  %v4428_v51 = vshll.u32 %v7664_v57, 16  ;;  %v7933_v32 = vrot.slane %v4391_v13, 4  ;;  %v4792_v61 = vpack.c.b16 %v4761_v24, %v4760_v41  ;;  %v6756_v35 = vld [vmem:[%s8983_s3 + $0x218] sm:$0xff] }
 0x220   : > { %4229 = vmatmul.bf16.gmra.mxu3 %v6727_v46  ;;  %v2817_v53 = vpop.f32.mrf.mxu0  ;;  %v4424_v46 = vrot.slane %v4422_v17, 4  ;;  %v4999_v17 = vld [vmem:[#allocation2 + $0x60] sm:$0xe]  ;;  %v4415_v57 = vor.u32 %v7923_v28, %v7919_v9  ;;  %v9058_v41 = vrot.slane %v7875_v5, 5  ;;  %5301 = vmatpush.bf16.msra.mxu1 %v6756_v35 }
 0x221   : > { %v7905_v63 = vadd.f32 %v2817_v53, %v7602_v20  ;;  %v3125_v20 = vor.u32 %v3124_v31, %v7895_v10  ;;  %v7917_v53 = vld [vmem:[#allocation2 + $0x70] sm:$0xf]  ;;  %v2159_v56 = vpop.f32.mrf.mxu2  ;;  %v4321_v31 = vld [vmem:[#allocation2 + $0x3c] sm:$0xf]  ;;  %v6507_v12 = vrot.slane %v4999_v17, 9  ;;  %v7957_v9 = vrot.slane %v4428_v51, 5 }
 0x222   : > { %v1924_v30 = vpop.f32.mrf.mxu1  ;;  %v3695_v38 = vrot.slane %v7917_v53, 5  ;;  %v3581_v17 = vld [vmem:[#allocation2 + $0x6c] sm:$0xe] }
 0x223   : > { %9055 = vst [vmem:[#allocation39_spill] sm:$0xff] %v7905_v63  ;;  %v2537_v49 = vpop.f32.mrf.mxu3  ;;  %v2158_v14 = vadd.f32 %v2157_v22, %v1924_v30  ;;  %v3128_v63 = vshll.u32 %v7851_v25, 16  ;;  %v4425_v22 = vor.u32 %v4424_v46, %v7910_v6  ;;  %v3126_v59 = vrot.slane %v3125_v20, 4  ;;  %v7947_v30 = vld [vmem:[#allocation2 + $0x74] sm:$0x1] }
 0x224   : > { %v4407_v25 = vsel %vm7027_vm12, %v7921_v34, %v7926_v55  ;;  %v5102_v20 = vsel %vm7006_vm9, %v6507_v12, %v9058_v41  ;;  %v4436_v55 = vshll.u32 %v4321_v31, 16  ;;  %v3698_v35 = vrot.slane %v7947_v30, 5 }
 0x225   : > { %v7928_v45 = vadd.f32 %v2537_v49, %v2158_v14  ;;  %3490 = vmatmul.bf16.gmra.mxu1 %v3378_v50  ;;  %v3115_v50 = vor.u32 %v3114_v36, %v3111_v16  ;;  %v3130_v46 = vrot.slane %v3128_v63, 5  ;;  %v7949_v49 = vld [vmem:[#allocation2 + $0x70] sm:$0xf]  ;;  %v3697_v14 = vrot.slane %v3695_v38, 4 }
 0x226   : > { %3920 = vmatmul.bf16.gmra.mxu2 %v3804_v8  ;;  %v4433_v8 = vshrl.u32 %v4321_v31, 16  ;;  %v7955_v24 = vrot.slane %v4425_v22, 4  ;;  %v3133_v16 = vshrl.u32 %v2916_v62, 16  ;;  %v3136_v36 = vshll.u32 %v2916_v62, 16 }
 0x227   : > { %9056 = vst [vmem:[#allocation40_spill] sm:$0xff] %v7928_v45  ;;  %v3131_v63 = vsel %vm7027_vm12, %v3126_v59, %v3130_v46  ;;  %v5197_v22 = vunpack.c.l.b16 %v5102_v20  ;;  %v3116_v41 = vrot.slane %v3115_v50, 4  ;;  %v7966_v45 = vld [vmem:[#allocation2 + $0x74] sm:$0x1]  ;;  %v6728_v46 = vld [vmem:[#allocation2 + $0x6c] sm:$0xff]  ;;  %v6333_v62 = vrot.slane %v3581_v17, 9 }
 0x228   : > { %v2820_v58 = vpop.f32.mrf.mxu0  ;;  %v3355_v20 = vunpack.c.l.b16 %v3131_v63  ;;  %v4438_v51 = vrot.slane %v4436_v55, 5  ;;  %v9060_v17 = vrot.slane %v7949_v49, 5  ;;  %v2090_v55 = vadd.f32 %v7331_v44, %v7340_v29  ;;  %v6776_v44 = vld [vmem:[%s8986_s6 + $0x38] sm:$0xff] }
 0x229   : > { %v7945_v13 = vadd.f32 %v2820_v58, %v7618_v60  ;;  %v5198_v60 = vunpack.c.l.b16 %v7914_v37  ;;  %v2162_v12 = vpop.f32.mrf.mxu2  ;;  %v3142_v37 = vshll.u32 %v7917_v53, 16  ;;  %v3121_v50 = vsel %vm7027_vm12, %v3116_v41, %v7895_v10  ;;  %v6768_v29 = vld [vmem:[%s8985_s5 + $0x38] sm:$0xff]  ;;  %5582 = vmatpush.bf16.msra.mxu2 %v6776_v44 }
 0x22a   : > { %v1926_v34 = vpop.f32.mrf.mxu1  ;;  %v3354_v63 = vunpack.c.l.b16 %v3121_v50  ;;  %5719 = vmatpush.bf16.msra.mxu3 %v6768_v29 }
 0x22b   : > { %9057 = vst [vmem:[#allocation41_spill] sm:$0xff] %v7945_v13  ;;  %v2539_v28 = vpop.f32.mrf.mxu3  ;;  %4880 = vmatmul.bf16.vlgmr.msra.gmra.mxu0 %v4792_v61  ;;  %v2160_v58 = vadd.f32 %v2159_v56, %v1926_v34  ;;  %v3146_v13 = vshrl.u32 %v7917_v53, 16  ;;  %v4435_v61 = vrot.slane %v4433_v8, 4  ;;  %v3699_v56 = vsel %vm7006_vm9, %v3697_v14, %v3698_v35 }
 0x22c   : > { %v7972_v31 = vpack.c.b16 %v5198_v60, %v5197_v22  ;;  %v3135_v34 = vrot.slane %v3133_v16, 4  ;;  %v3696_v8 = vsel %vm7006_vm9, %v6333_v62, %v3695_v38  ;;  %v5111_v14 = vrot.slane %v7966_v45, 5  ;;  %v7997_v62 = vld [vmem:[#allocation2 + $0x7c] sm:$0xf] }
 0x22d   : > { %v7968_v59 = vadd.f32 %v2539_v28, %v2160_v58  ;;  %v3138_v28 = vrot.slane %v3136_v36, 5  ;;  %v5110_v58 = vrot.slane %v9060_v17, 4  ;;  %v3782_v35 = vunpack.c.l.b16 %v3699_v56 }
 0x22e   : > { %9059 = vst [vmem:[#allocation42_spill] sm:$0xff] %v7972_v31  ;;  %v7985_v22 = vrot.slane %v3142_v37, 5  ;;  %v3148_v10 = vrot.slane %v3146_v13, 4  ;;  %v4397_v16 = vsel %vm7027_vm12, %v7933_v32, %v7886_v26  ;;  %v4416_v38 = vrot.slane %v4415_v57, 4  ;;  %v5000_v26 = vld [vmem:[#allocation2 + $0x6c] sm:$0xe] }
 0x22f   : > { %v7993_v36 = vsel %vm7006_vm9, %v5110_v58, %v5111_v14  ;;  %v4763_v37 = vunpack.c.l.b16 %v4407_v25  ;;  %v4431_v13 = vsel %vm7027_vm12, %v7955_v24, %v7957_v9  ;;  %v3379_v56 = vpack.c.b16 %v3355_v20, %v3354_v63  ;;  %v5002_v31 = vld [vmem:[#allocation2 + $0x84] sm:$0xe] }
 0x230   : > { %4234 = vmatmul.bf16.gmra.mxu3 %v6728_v46  ;;  %v2822_v53 = vpop.f32.mrf.mxu0  ;;  %v3781_v46 = vunpack.c.l.b16 %v3696_v8  ;;  %v4421_v50 = vsel %vm7027_vm12, %v4416_v38, %v7910_v6  ;;  %v4439_v25 = vor.u32 %v4438_v51, %v4435_v61  ;;  %v4762_v8 = vunpack.c.l.b16 %v4397_v16 }
 0x231   : > { %v7983_v60 = vadd.f32 %v2822_v53, %v7642_v43  ;;  %v2164_v57 = vpop.f32.mrf.mxu2  ;;  %v3139_v24 = vor.u32 %v3138_v28, %v3135_v34  ;;  %v3149_v9 = vor.u32 %v3148_v10, %v7985_v22  ;;  %v3702_v20 = vrot.slane %v7997_v62, 5 }
 0x232   : > { %v1929_v43 = vpop.f32.mrf.mxu1  ;;  %v3805_v53 = vpack.c.b16 %v3782_v35, %v3781_v46  ;;  %v8016_v6 = vunpack.c.l.b16 %v4431_v13  ;;  %v6508_v17 = vrot.slane %v5000_v26, 9  ;;  %v2548_v58 = vadd.f32 %v7337_v18, %v2090_v55  ;;  %v8033_v55 = vld [vmem:[#allocation2 + $0x80] sm:$0x1]  ;;  %v8042_v13 = vld [vmem:[#allocation2 + $0x7c] sm:$0xf] }
 0x233   : > { %9061 = vst [vmem:[#allocation43_spill] sm:$0xff] %v7983_v60  ;;  %v2542_v41 = vpop.f32.mrf.mxu3  ;;  %v2163_v32 = vadd.f32 %v2162_v12, %v1929_v43  ;;  %v4793_v14 = vpack.c.b16 %v4763_v37, %v4762_v8  ;;  %v3152_v51 = vshll.u32 %v7947_v30, 16  ;;  %v8020_v61 = vunpack.c.l.b16 %v4421_v50  ;;  %v5001_v26 = vld [vmem:[#allocation2 + $0x78] sm:$0xe] }
 0x234   : > { %v8022_v28 = vrot.slane %v4439_v25, 4  ;;  %v4442_v35 = vshll.u32 %v7703_v1, 16  ;;  %v4446_v10 = vshrl.u32 %v7703_v1, 16  ;;  %v9062_v63 = vrot.slane %v7949_v49, 5  ;;  %v3582_v50 = vld [vmem:[#allocation2 + $0x78] sm:$0xe] }
 0x235   : > { %v8013_v12 = vadd.f32 %v2542_v41, %v2163_v32  ;;  %3495 = vmatmul.bf16.gmra.mxu1 %v3379_v56  ;;  %v3140_v38 = vrot.slane %v3139_v24, 4  ;;  %v3150_v30 = vrot.slane %v3149_v9, 4  ;;  %v5200_v43 = vunpack.c.l.b16 %v7993_v36  ;;  %v8052_v9 = vld [vmem:[#allocation2 + $0x80] sm:$0x1] }
 0x236   : > { %3925 = vmatmul.bf16.gmra.mxu2 %v3805_v53  ;;  %v5109_v16 = vsel %vm7006_vm9, %v6508_v17, %v9062_v63  ;;  %v8037_v41 = vadd.f32 %v7588_v54, %v2548_v58  ;;  %v3704_v46 = vrot.slane %v3702_v20, 4  ;;  %v3166_v37 = vshll.u32 %v7997_v62, 16  ;;  %v2919_v58 = vld [vmem:[#allocation2 + $0x78] sm:$0xf] }
 0x237   : > { %v3154_v56 = vrot.slane %v3152_v51, 5  ;;  %v3170_v44 = vshrl.u32 %v7997_v62, 16  ;;  %v5199_v54 = vunpack.c.l.b16 %v5109_v16  ;;  %v3145_v53 = vsel %vm7027_vm12, %v3140_v38, %v7985_v22  ;;  %v4324_v38 = vld [vmem:[#allocation2 + $0x48] sm:$0xf] }
 0x238   : > { %v2825_v34 = vpop.f32.mrf.mxu0  ;;  %v3705_v8 = vrot.slane %v8033_v55, 5  ;;  %v8050_v24 = vrot.slane %v4442_v35, 5  ;;  %v6334_v63 = vrot.slane %v3582_v50, 9  ;;  %v8063_v35 = vrot.slane %v3166_v37, 5 }
 0x239   : > { %v8031_v18 = vadd.f32 %v2825_v34, %v7676_v7  ;;  %v3886_v25 = vpop.f32.mrf.mxu2  ;;  %v3155_v17 = vsel %vm7027_vm12, %v3150_v30, %v3154_v56  ;;  %v8056_v62 = vpack.c.b16 %v5200_v43, %v5199_v54  ;;  %v6729_v34 = vld [vmem:[#allocation2 + $0x78] sm:$0xff]  ;;  %v3172_v16 = vrot.slane %v3170_v44, 4 }
 0x23a   : > { %v1931_v7 = vpop.f32.mrf.mxu1  ;;  %v3706_v22 = vsel %vm7006_vm9, %v3704_v46, %v3705_v8  ;;  %v5118_v43 = vrot.slane %v8052_v9, 5  ;;  %v3357_v56 = vunpack.c.l.b16 %v3155_v17  ;;  %v3157_v50 = vshrl.u32 %v2919_v58, 16 }
 0x23b   : > { %9063 = vst [vmem:[#allocation44_spill] sm:$0xff] %v8031_v18  ;;  %v2544_v32 = vpop.f32.mrf.mxu3  ;;  %4885 = vmatmul.bf16.gmra.mxu0 %v4793_v14  ;;  %v2165_v29 = vadd.f32 %v2164_v57, %v1931_v7  ;;  %v6509_v14 = vrot.slane %v5001_v26, 9  ;;  %v5115_v57 = vrot.slane %v8042_v13, 5  ;;  %v4448_v54 = vrot.slane %v4446_v10, 4  ;;  %v8078_v10 = vld [vmem:[#allocation2 + $0x88] sm:$0xf] }
 0x23c   : > { %9064 = vst [vmem:[#allocation45_spill] sm:$0xff] %v8056_v62  ;;  %v3784_v37 = vunpack.c.l.b16 %v3706_v22  ;;  %v3160_v44 = vshll.u32 %v2919_v58, 16  ;;  %v4470_v18 = vshrl.u32 %v7745_v19, 16  ;;  %v6510_v60 = vrot.slane %v5002_v31, 9 }
 0x23d   : > { %v8059_v51 = vadd.f32 %v2544_v32, %v2165_v29  ;;  %v5116_v30 = vsel %vm7006_vm9, %v6509_v14, %v5115_v57  ;;  %v5117_v7 = vrot.slane %v5115_v57, 4  ;;  %v3703_v32 = vsel %vm7006_vm9, %v6334_v63, %v3702_v20  ;;  %v8070_v29 = vld [vmem:[#allocation2 + $0x88] sm:$0xf] }
 0x23e   : > { %v3356_v14 = vunpack.c.l.b16 %v3145_v53  ;;  %v4457_v57 = vshrl.u32 %v4324_v38, 16  ;;  %v3783_v62 = vunpack.c.l.b16 %v3703_v32  ;;  %v3173_v20 = vor.u32 %v3172_v16, %v8063_v35 }
 0x23f   : > { %v5119_v8 = vsel %vm7006_vm9, %v5117_v7, %v5118_v43  ;;  %v4460_v63 = vshll.u32 %v4324_v38, 16  ;;  %v4466_v53 = vshll.u32 %v7745_v19, 16  ;;  %v4341_v7 = vld [vmem:[#allocation2 + $0x8c] sm:$0x1]  ;;  %v3162_v32 = vrot.slane %v3160_v44, 5 }
 0x240   : > { %4239 = vmatmul.bf16.gmra.mxu3 %v6729_v34  ;;  %v2827_v26 = vpop.f32.mrf.mxu0  ;;  %v5201_v34 = vunpack.c.l.b16 %v5116_v30  ;;  %v5202_v36 = vunpack.c.l.b16 %v5119_v8  ;;  %v3380_v22 = vpack.c.b16 %v3357_v56, %v3356_v14  ;;  %v3806_v43 = vpack.c.b16 %v3784_v37, %v3783_v62 }
 0x241   : > { %v8073_v46 = vadd.f32 %v2827_v26, %v7695_v15  ;;  %v5122_v15 = vrot.slane %v8070_v29, 5  ;;  %v3888_v26 = vpop.f32.mrf.mxu2  ;;  %v3159_v8 = vrot.slane %v3157_v50, 4  ;;  %v3176_v16 = vshll.u32 %v8033_v55, 16  ;;  %v6755_v55 = vld [vmem:[%s8983_s3 + $0x210] sm:$0xff] }
 0x242   : > { %v3461_v17 = vpop.f32.mrf.mxu1  ;;  %v8083_v30 = vpack.c.b16 %v5202_v36, %v5201_v34  ;;  %v3709_v38 = vrot.slane %v8078_v10, 5  ;;  %v4449_v56 = vor.u32 %v4448_v54, %v8050_v24  ;;  %v4462_v50 = vrot.slane %v4460_v63, 5  ;;  %v8099_v54 = vld [vmem:[#allocation2 + $0x8c] sm:$0x1]  ;;  %5302 = vmatpush.bf16.msra.mxu1 %v6755_v55  ;;  %v2922_v55 = vld [vmem:[#allocation2 + $0x84] sm:$0xf] }
 0x243   : > { %9065 = vst [vmem:[#allocation46_spill] sm:$0xff] %v8073_v46  ;;  %v4200_v1 = vpop.f32.mrf.mxu3  ;;  %v3541_v58 = vadd.f32 %v3461_v17, %v7573_v47  ;;  %v3174_v47 = vrot.slane %v3173_v20, 4  ;;  %v5124_v14 = vrot.slane %v5122_v15, 4  ;;  %v5125_v17 = vrot.slane %v4341_v7, 5 }
 0x244   : > { %9066 = vst [vmem:[#allocation47_spill] sm:$0xff] %v8083_v30  ;;  %v5123_v37 = vsel %vm7006_vm9, %v6510_v60, %v5122_v15  ;;  %v3163_v31 = vor.u32 %v3162_v32, %v3159_v8  ;;  %v3178_v44 = vrot.slane %v3176_v16, 5  ;;  %v8103_v34 = vrot.slane %v4466_v53, 5  ;;  %v3583_v15 = vld [vmem:[#allocation2 + $0x84] sm:$0xe] }
 0x245   : > { %v3966_v46 = vadd.f32 %v3886_v25, %v3541_v58  ;;  %3500 = vmatmul.bf16.gmra.mxu1 %v3380_v22  ;;  %v4459_v25 = vrot.slane %v4457_v57, 4  ;;  %v4472_v20 = vrot.slane %v4470_v18, 4  ;;  %v9067_v60 = vpack.c.b16 %v8016_v6, %v8020_v61 }
 0x246   : > { %3930 = vmatmul.bf16.gmra.mxu2 %v3806_v43  ;;  %v4450_v22 = vrot.slane %v4449_v56, 4  ;;  %v9068_v7 = vshll.u32 %v7708_v52, 16  ;;  %v5203_v8 = vunpack.c.l.b16 %v5123_v37  ;;  %v3712_v18 = vrot.slane %v8099_v54, 5 }
 0x247   : > { %v8089_v36 = vadd.f32 %v4200_v1, %v3966_v46  ;;  %v5126_v1 = vsel %vm7006_vm9, %v5124_v14, %v5125_v17  ;;  %v3711_v46 = vrot.slane %v3709_v38, 4  ;;  %v3190_v16 = vshll.u32 %v8078_v10, 16  ;;  %v6730_v17 = vld [vmem:[#allocation2 + $0x84] sm:$0xff] }
 0x248   : > { %v2830_v62 = vpop.f32.mrf.mxu0  ;;  %v5204_v57 = vunpack.c.l.b16 %v5126_v1  ;;  %v4454_v43 = vrot.slane %v9068_v7, 5  ;;  %v3194_v14 = vshrl.u32 %v8078_v10, 16  ;;  %v3164_v6 = vrot.slane %v3163_v31, 4 }
 0x249   : > { %v8097_v19 = vadd.f32 %v2830_v62, %v7719_v21  ;;  %v3179_v21 = vsel %vm7027_vm12, %v3174_v47, %v3178_v44  ;;  %v3891_v32 = vpop.f32.mrf.mxu2  ;;  %v4445_v61 = vsel %vm7027_vm12, %v8022_v28, %v8050_v24  ;;  %v4463_v47 = vor.u32 %v4462_v50, %v4459_v25 }
 0x24a   : > { %v3463_v63 = vpop.f32.mrf.mxu1  ;;  %v8120_v56 = vpack.c.b16 %v5204_v57, %v5203_v8  ;;  %v6335_v62 = vrot.slane %v3583_v15, 9  ;;  %v4473_v37 = vor.u32 %v4472_v20, %v8103_v34  ;;  %v3169_v10 = vsel %vm7027_vm12, %v3164_v6, %v8063_v35 }
 0x24b   : > { %v4202_v58 = vpop.f32.mrf.mxu3  ;;  %4890 = vmatmul.bf16.gmra.mxu0 %v9067_v60  ;;  %v3542_v53 = vadd.f32 %v3463_v63, %v8037_v41  ;;  %v3713_v41 = vsel %vm7006_vm9, %v3711_v46, %v3712_v18  ;;  %v3359_v31 = vunpack.c.l.b16 %v3179_v21  ;;  %v4455_v28 = vsel %vm7027_vm12, %v4450_v22, %v4454_v43  ;;  %v8140_v43 = vld [vmem:[#allocation2 + $0x94] sm:$0xf] }
 0x24c   : > { %9069 = vst [vmem:[#allocation48_spill] sm:$0xff] %v8120_v56  ;;  %v4476_v24 = vshll.u32 %v7752_v27, 16  ;;  %v3710_v50 = vsel %vm7006_vm9, %v6335_v62, %v3709_v38  ;;  %v8135_v44 = vrot.slane %v3190_v16, 5  ;;  %v3196_v1 = vrot.slane %v3194_v14, 4  ;;  %v4327_v38 = vld [vmem:[#allocation2 + $0x54] sm:$0xf] }
 0x24d   : > { %v3967_v52 = vadd.f32 %v3888_v26, %v3542_v53  ;;  %v3786_v35 = vunpack.c.l.b16 %v3713_v41  ;;  %v3181_v20 = vshrl.u32 %v2922_v55, 16  ;;  %v3184_v57 = vshll.u32 %v2922_v55, 16 }
 0x24e   : > { %v3358_v63 = vunpack.c.l.b16 %v3169_v10  ;;  %v4766_v60 = vunpack.c.l.b16 %v4445_v61  ;;  %v4464_v21 = vrot.slane %v4463_v47, 4  ;;  %v4474_v27 = vrot.slane %v4473_v37, 4  ;;  %v6775_v61 = vld [vmem:[%s8986_s6 + $0x30] sm:$0xff] }
 0x24f   : > { %v8131_v25 = vadd.f32 %v4202_v58, %v3967_v52  ;;  %v3785_v22 = vunpack.c.l.b16 %v3710_v50  ;;  %v4767_v7 = vunpack.c.l.b16 %v4455_v28  ;;  %v4490_v8 = vshll.u32 %v7789_v33, 16  ;;  %v6767_v47 = vld [vmem:[%s8985_s5 + $0x30] sm:$0xff]  ;;  %5583 = vmatpush.bf16.msra.mxu2 %v6775_v61  ;;  %v8163_v50 = vld [vmem:[#allocation2 + $0x60] sm:$0xf] }
 0x250   : > { %4244 = vmatmul.bf16.gmra.mxu3 %v6730_v17  ;;  %v2832_v26 = vpop.f32.mrf.mxu0  ;;  %v4494_v53 = vshrl.u32 %v7789_v33, 16  ;;  %v3381_v18 = vpack.c.b16 %v3359_v31, %v3358_v63  ;;  %v3197_v14 = vor.u32 %v3196_v1, %v8135_v44  ;;  %v4478_v6 = vrot.slane %v4476_v24, 5 }
 0x251   : > { %v8138_v46 = vadd.f32 %v2832_v26, %v7739_v23  ;;  %v3893_v16 = vpop.f32.mrf.mxu2  ;;  %v3807_v52 = vpack.c.b16 %v3786_v35, %v3785_v22  ;;  %v3183_v17 = vrot.slane %v3181_v20, 4  ;;  %v3186_v62 = vrot.slane %v3184_v57, 5  ;;  %5720 = vmatpush.bf16.msra.mxu3 %v6767_v47  ;;  %v8168_v20 = vld [vmem:[#allocation2 + $0x98] sm:$0x1] }
 0x252   : > { %v3466_v58 = vpop.f32.mrf.mxu1  ;;  %v3200_v41 = vshll.u32 %v8099_v54, 16  ;;  %v3716_v55 = vrot.slane %v8140_v43, 5  ;;  %v4481_v37 = vshrl.u32 %v4327_v38, 16  ;;  %v4479_v10 = vsel %vm7027_vm12, %v4474_v27, %v4478_v6 }
 0x253   : > { %v4205_v15 = vpop.f32.mrf.mxu3  ;;  %v3543_v23 = vadd.f32 %v3466_v58, %v7600_v40  ;;  %v4469_v40 = vsel %vm7027_vm12, %v4464_v21, %v8103_v34  ;;  %v4484_v31 = vshll.u32 %v4327_v38, 16  ;;  %v8159_v28 = vrot.slane %v4490_v8, 5  ;;  %v3584_v21 = vld [vmem:[#allocation2 + $0x90] sm:$0xe] }
 0x254   : > { %v4496_v24 = vrot.slane %v4494_v53, 4  ;;  %v4795_v1 = vpack.c.b16 %v4767_v7, %v4766_v60  ;;  %v3187_v35 = vor.u32 %v3186_v62, %v3183_v17  ;;  %v8170_v57 = vunpack.c.l.b16 %v4469_v40  ;;  %v8179_v53 = vld [vmem:[#allocation2 + $0x94] sm:$0xf]  ;;  %v8188_v40 = vld [vmem:[#allocation2 + $0x98] sm:$0x1] }
 0x255   : > { %v3968_v33 = vadd.f32 %v3891_v32, %v3543_v23  ;;  %3505 = vmatmul.bf16.gmra.mxu1 %v3381_v18  ;;  %v3198_v32 = vrot.slane %v3197_v14, 4  ;;  %v3202_v63 = vrot.slane %v3200_v41, 5  ;;  %v3718_v27 = vrot.slane %v3716_v55, 4  ;;  %v6731_v41 = vld [vmem:[#allocation2 + $0x90] sm:$0xff] }
 0x256   : > { %3935 = vmatmul.bf16.gmra.mxu2 %v3807_v52  ;;  %v8172_v58 = vunpack.c.l.b16 %v4479_v10  ;;  %v3214_v8 = vshll.u32 %v8140_v43, 16  ;;  %v4497_v60 = vor.u32 %v4496_v24, %v8159_v28  ;;  %v4505_v7 = vshrl.u32 %v8163_v50, 16 }
 0x257   : > { %v8161_v26 = vadd.f32 %v4205_v15, %v3968_v33  ;;  %v8174_v15 = vrot.slane %v4481_v37, 4  ;;  %v3203_v14 = vsel %vm7027_vm12, %v3198_v32, %v3202_v63  ;;  %v3719_v6 = vrot.slane %v8168_v20, 5  ;;  %v2925_v37 = vld [vmem:[#allocation2 + $0x90] sm:$0xf] }
 0x258   : > { %v2835_v34 = vpop.f32.mrf.mxu0  ;;  %v3218_v61 = vshrl.u32 %v8140_v43, 16  ;;  %v3188_v47 = vrot.slane %v3187_v35, 4  ;;  %v6336_v52 = vrot.slane %v3584_v21, 9  ;;  %v4508_v17 = vshll.u32 %v8163_v50, 16 }
 0x259   : > { %v8166_v54 = vadd.f32 %v2835_v34, %v7759_v2  ;;  %v4486_v2 = vrot.slane %v4484_v31, 5  ;;  %v3896_v18 = vpop.f32.mrf.mxu2  ;;  %v4514_v62 = vshll.u32 %v7875_v5, 16  ;;  %v4518_v10 = vshrl.u32 %v7875_v5, 16 }
 0x25a   : > { %v3468_v22 = vpop.f32.mrf.mxu1  ;;  %v5129_v31 = vrot.slane %v8179_v53, 5  ;;  %v3193_v43 = vsel %vm7027_vm12, %v3188_v47, %v8135_v44  ;;  %v3361_v24 = vunpack.c.l.b16 %v3203_v14  ;;  %v3717_v34 = vsel %vm7006_vm9, %v6336_v52, %v3716_v55  ;;  %v9071_v55 = vld [vmem:[#allocation32_spill] sm:$0xff] }
 0x25b   : > { %v4207_v38 = vpop.f32.mrf.mxu3  ;;  %4895 = vmatmul.bf16.gmra.mxu0 %v4795_v1  ;;  %v3544_v23 = vadd.f32 %v3468_v22, %v7613_v4  ;;  %v3720_v4 = vsel %vm7006_vm9, %v3718_v27, %v3719_v6  ;;  %v8199_v32 = vrot.slane %v3214_v8, 5  ;;  %v3220_v1 = vrot.slane %v3218_v61, 4  ;;  %v8214_v47 = vld [vmem:[#allocation2 + $0xa0] sm:$0xf] }
 0x25c   : > { %v5131_v35 = vrot.slane %v5129_v31, 4  ;;  %v5132_v5 = vrot.slane %v8188_v40, 5  ;;  %v3788_v21 = vunpack.c.l.b16 %v3720_v4  ;;  %v3205_v27 = vshrl.u32 %v2925_v37, 16  ;;  %v9072_v4 = vld [vmem:[#allocation19_spill] sm:$0xff] }
 0x25d   : > { %v3969_v33 = vadd.f32 %v3893_v16, %v3544_v23  ;;  %v3208_v44 = vshll.u32 %v2925_v37, 16  ;;  %v3360_v22 = vunpack.c.l.b16 %v3193_v43  ;;  %v8207_v23 = vrot.slane %v4497_v60, 4 }
 0x25e   : > { %v4500_v8 = vshll.u32 %v9071_v55, 16  ;;  %v3787_v61 = vunpack.c.l.b16 %v3717_v34  ;;  %v8217_v52 = vrot.slane %v4514_v62, 5  ;;  %v8221_v55 = vrot.slane %v4505_v7, 4 }
 0x25f   : > { %v8201_v16 = vadd.f32 %v4207_v38, %v3969_v33  ;;  %v8212_v38 = vsel %vm7006_vm9, %v5131_v35, %v5132_v5  ;;  %v4520_v33 = vrot.slane %v4518_v10, 4  ;;  %v3382_v37 = vpack.c.b16 %v3361_v24, %v3360_v22 }
 0x260   : > { %4249 = vmatmul.bf16.gmra.mxu3 %v6731_v41  ;;  %v2837_v50 = vpop.f32.mrf.mxu0  ;;  %v5003_v41 = vld [vmem:[#allocation2 + $0x90] sm:$0xe]  ;;  %v3808_v35 = vpack.c.b16 %v3788_v21, %v3787_v61  ;;  %v3207_v5 = vrot.slane %v3205_v27, 4  ;;  %v3210_v56 = vrot.slane %v3208_v44, 5  ;;  %v8223_v34 = vrot.slane %v4508_v17, 5  ;;  %v9073_v44 = vld [vmem:[#allocation33_spill] sm:$0xff] }
 0x261   : > { %v8205_v63 = vadd.f32 %v2837_v50, %v7777_v11  ;;  %v4487_v11 = vor.u32 %v4486_v2, %v8174_v15  ;;  %v3898_v43 = vpop.f32.mrf.mxu2  ;;  %v3221_v50 = vor.u32 %v3220_v1, %v8199_v32  ;;  %v3224_v15 = vshll.u32 %v8168_v20, 16  ;;  %v6754_v20 = vld [vmem:[%s8983_s3 + $0x208] sm:$0xff] }
 0x262   : > { %v3471_v14 = vpop.f32.mrf.mxu1  ;;  %v3723_v2 = vrot.slane %v8214_v47, 5  ;;  %v6511_v62 = vrot.slane %v5003_v41, 9  ;;  %v8229_v24 = vrot.slane %v4500_v8, 5  ;;  %v4521_v7 = vor.u32 %v4520_v33, %v8217_v52  ;;  %5303 = vmatpush.bf16.msra.mxu1 %v6754_v20 }
 0x263   : > { %9070 = vst [vmem:[#allocation49_spill] sm:$0xff] %v8205_v63  ;;  %v4210_v6 = vpop.f32.mrf.mxu3  ;;  %v3545_v60 = vadd.f32 %v3471_v14, %v9072_v4  ;;  %v8227_v10 = vrot.slane %v4487_v11, 4  ;;  %v4796_v17 = vpack.c.b16 %v8172_v58, %v8170_v57  ;;  %v3211_v8 = vor.u32 %v3210_v56, %v3207_v5  ;;  %v8244_v14 = vld [vmem:[#allocation2 + $0xa4] sm:$0x1] }
 0x264   : > { %v5130_v27 = vsel %vm7006_vm9, %v6511_v62, %v5129_v31  ;;  %v4503_v57 = vsel %vm7027_vm12, %v8207_v23, %v8229_v24  ;;  %v3226_v58 = vrot.slane %v3224_v15, 5  ;;  %v3725_v61 = vrot.slane %v3723_v2, 4  ;;  %v2928_v31 = vld [vmem:[#allocation2 + $0x9c] sm:$0xf]  ;;  %v8261_v23 = vld [vmem:[#allocation2 + $0xa0] sm:$0xf] }
 0x265   : > { %v3970_v30 = vadd.f32 %v3896_v18, %v3545_v60  ;;  %3510 = vmatmul.bf16.gmra.mxu1 %v3382_v37  ;;  %v3222_v18 = vrot.slane %v3221_v50, 4  ;;  %v4511_v56 = vor.u32 %v8223_v34, %v8221_v55  ;;  %v5206_v11 = vunpack.c.l.b16 %v8212_v38  ;;  %v9075_v50 = vld [vmem:[#allocation20_spill] sm:$0xff] }
 0x266   : > { %3940 = vmatmul.bf16.gmra.mxu2 %v3808_v35  ;;  %v8258_v4 = vrot.slane %v4521_v7, 4  ;;  %v4524_v60 = vshll.u32 %v7888_v42, 16  ;;  %v5205_v37 = vunpack.c.l.b16 %v5130_v27  ;;  %v3726_v38 = vrot.slane %v8244_v14, 5  ;;  %v8268_v24 = vld [vmem:[#allocation2 + $0xa4] sm:$0x1] }
 0x267   : > { %v8232_v1 = vadd.f32 %v4210_v6, %v3970_v30  ;;  %v4493_v30 = vsel %vm7027_vm12, %v8227_v10, %v8159_v28  ;;  %v3585_v6 = vld [vmem:[#allocation2 + $0x9c] sm:$0xe]  ;;  %v3238_v28 = vshll.u32 %v8214_v47, 16  ;;  %v3227_v55 = vsel %vm7027_vm12, %v3222_v18, %v3226_v58 }
 0x268   : > { %v2840_v21 = vpop.f32.mrf.mxu0  ;;  %v3242_v34 = vshrl.u32 %v8214_v47, 16  ;;  %v3212_v15 = vrot.slane %v3211_v8, 4  ;;  %v6337_v62 = vrot.slane %v3585_v6, 9  ;;  %v3229_v10 = vshrl.u32 %v2928_v31, 16 }
 0x269   : > { %v8242_v22 = vadd.f32 %v2840_v21, %v9073_v44  ;;  %v3901_v5 = vpop.f32.mrf.mxu2  ;;  %v8270_v7 = vpack.c.b16 %v5206_v11, %v5205_v37  ;;  %v6732_v21 = vld [vmem:[#allocation2 + $0x9c] sm:$0xff]  ;;  %v3232_v20 = vshll.u32 %v2928_v31, 16  ;;  %v5136_v27 = vrot.slane %v8261_v23, 5 }
 0x26a   : > { %v3473_v33 = vpop.f32.mrf.mxu1  ;;  %v3217_v18 = vsel %vm7027_vm12, %v3212_v15, %v8199_v32  ;;  %v3363_v47 = vunpack.c.l.b16 %v3227_v55  ;;  %v3724_v44 = vsel %vm7006_vm9, %v6337_v62, %v3723_v2  ;;  %v8280_v8 = vrot.slane %v3238_v28, 5  ;;  %v9077_v31 = vld [vmem:[#allocation35_spill] sm:$0xff]  ;;  %v8288_v2 = vld [vmem:[#allocation2 + $0xac] sm:$0xf] }
 0x26b   : > { %9074 = vst [vmem:[#allocation32_spill] sm:$0xff] %v8242_v22  ;;  %v4212_v41 = vpop.f32.mrf.mxu3  ;;  %4900 = vmatmul.bf16.gmra.mxu0 %v4796_v17  ;;  %v3546_v35 = vadd.f32 %v3473_v33, %v9075_v50  ;;  %v3727_v17 = vsel %vm7006_vm9, %v3725_v61, %v3726_v38  ;;  %v3244_v6 = vrot.slane %v3242_v34, 4  ;;  %v5138_v11 = vrot.slane %v5136_v27, 4  ;;  %v4333_v28 = vld [vmem:[#allocation2 + $0x6c] sm:$0xf] }
 0x26c   : > { %9076 = vst [vmem:[#allocation19_spill] sm:$0xff] %v8270_v7  ;;  %v5139_v61 = vrot.slane %v8268_v24, 5  ;;  %v3790_v37 = vunpack.c.l.b16 %v3727_v17  ;;  %v4512_v50 = vrot.slane %v4511_v56, 4  ;;  %v4526_v32 = vrot.slane %v4524_v60, 5  ;;  %v5004_v56 = vld [vmem:[#allocation2 + $0x9c] sm:$0xe] }
 0x26d   : > { %v3971_v42 = vadd.f32 %v3898_v43, %v3546_v35  ;;  %v3362_v35 = vunpack.c.l.b16 %v3217_v18  ;;  %v3231_v55 = vrot.slane %v3229_v10, 4  ;;  %v3234_v38 = vrot.slane %v3232_v20, 5  ;;  %v9079_v60 = vld [vmem:[#allocation23_spill] sm:$0xff]  ;;  %v8314_v7 = vld [vmem:[#allocation2 + $0xac] sm:$0xf] }
 0x26e   : > { %v3789_v62 = vunpack.c.l.b16 %v3724_v44  ;;  %v4517_v17 = vsel %vm7027_vm12, %v4512_v50, %v8217_v52  ;;  %v3730_v44 = vrot.slane %v8288_v2, 5  ;;  %v3248_v50 = vshll.u32 %v8244_v14, 16 }
 0x26f   : > { %v8282_v58 = vadd.f32 %v4212_v41, %v3971_v42  ;;  %v5140_v41 = vsel %vm7006_vm9, %v5138_v11, %v5139_v61  ;;  %v4770_v42 = vunpack.c.l.b16 %v4493_v30  ;;  %v3383_v10 = vpack.c.b16 %v3363_v47, %v3362_v35  ;;  %v6774_v30 = vld [vmem:[%s8986_s6 + $0x28] sm:$0xff]  ;;  %v8308_v35 = vld [vmem:[#allocation2 + $0xb0] sm:$0x1] }
 0x270   : > { %4254 = vmatmul.bf16.gmra.mxu3 %v6732_v21  ;;  %v2842_v43 = vpop.f32.mrf.mxu0  ;;  %v4771_v21 = vunpack.c.l.b16 %v4503_v57  ;;  %v4527_v11 = vsel %vm7027_vm12, %v8258_v4, %v4526_v32  ;;  %v6766_v57 = vld [vmem:[%s8985_s5 + $0x28] sm:$0xff]  ;;  %v3809_v52 = vpack.c.b16 %v3790_v37, %v3789_v62  ;;  %v4529_v61 = vshrl.u32 %v4333_v28, 16  ;;  %5584 = vmatpush.bf16.msra.mxu2 %v6774_v30 }
 0x271   : > { %v8286_v33 = vadd.f32 %v2842_v43, %v9077_v31  ;;  %v3903_v20 = vpop.f32.mrf.mxu2  ;;  %v3245_v43 = vor.u32 %v3244_v6, %v8280_v8  ;;  %v4532_v47 = vshll.u32 %v4333_v28, 16  ;;  %v3235_v6 = vor.u32 %v3234_v38, %v3231_v55  ;;  %5721 = vmatpush.bf16.msra.mxu3 %v6766_v57  ;;  %v5005_v57 = vld [vmem:[#allocation2 + $0xa8] sm:$0xe] }
 0x272   : > { %v3476_v15 = vpop.f32.mrf.mxu1  ;;  %v6512_v4 = vrot.slane %v5004_v56, 9  ;;  %v4797_v32 = vpack.c.b16 %v4771_v21, %v4770_v42  ;;  %v8312_v62 = vunpack.c.l.b16 %v4517_v17  ;;  %v3732_v55 = vrot.slane %v3730_v44, 4  ;;  %v3586_v21 = vld [vmem:[#allocation2 + $0xa8] sm:$0xe] }
 0x273   : > { %9078 = vst [vmem:[#allocation33_spill] sm:$0xff] %v8286_v33  ;;  %v4215_v34 = vpop.f32.mrf.mxu3  ;;  %v3547_v18 = vadd.f32 %v3476_v15, %v9079_v60  ;;  %v3246_v37 = vrot.slane %v3245_v43, 4  ;;  %v8321_v38 = vunpack.c.l.b16 %v4527_v11  ;;  %v8323_v28 = vrot.slane %v4529_v61, 4  ;;  %v2931_v43 = vld [vmem:[#allocation2 + $0xa8] sm:$0xf] }
 0x274   : > { %v3236_v42 = vrot.slane %v3235_v6, 4  ;;  %v3733_v56 = vrot.slane %v8308_v35, 5  ;;  %v8326_v17 = vrot.slane %v4532_v47, 5  ;;  %v5208_v30 = vunpack.c.l.b16 %v5140_v41 }
 0x275   : > { %v3972_v31 = vadd.f32 %v3901_v5, %v3547_v18  ;;  %3515 = vmatmul.bf16.gmra.mxu1 %v3383_v10  ;;  %v5137_v5 = vsel %vm7006_vm9, %v6512_v4, %v5136_v27  ;;  %v3262_v27 = vshll.u32 %v8288_v2, 16  ;;  %v5143_v11 = vrot.slane %v8314_v7, 5  ;;  %v8337_v4 = vld [vmem:[#allocation2 + $0xb0] sm:$0x1] }
 0x276   : > { %3945 = vmatmul.bf16.gmra.mxu2 %v3809_v52  ;;  %v9081_v52 = vld [vmem:[#allocation25_spill] sm:$0xff]  ;;  %v3241_v6 = vsel %vm7027_vm12, %v3236_v42, %v8280_v8  ;;  %v3734_v41 = vsel %vm7006_vm9, %v3732_v55, %v3733_v56  ;;  %v3256_v33 = vshll.u32 %v2931_v43, 16  ;;  %v6513_v22 = vrot.slane %v5005_v57, 9 }
 0x277   : > { %v8310_v15 = vadd.f32 %v4215_v34, %v3972_v31  ;;  %v3250_v34 = vrot.slane %v3248_v50, 5  ;;  %v3266_v50 = vshrl.u32 %v8288_v2, 16  ;;  %v8345_v42 = vrot.slane %v3262_v27, 5  ;;  %v8357_v27 = vld [vmem:[#allocation2 + $0xb8] sm:$0xf] }
 0x278   : > { %v2845_v60 = vpop.f32.mrf.mxu0  ;;  %v5146_v2 = vrot.slane %v8337_v4, 5  ;;  %v3364_v57 = vunpack.c.l.b16 %v3241_v6 }
 0x279   : > { %v8319_v14 = vadd.f32 %v2845_v60, %v7865_v3  ;;  %v5207_v3 = vunpack.c.l.b16 %v5137_v5  ;;  %v3906_v31 = vpop.f32.mrf.mxu2  ;;  %v3251_v47 = vsel %vm7027_vm12, %v3246_v37, %v3250_v34  ;;  %v5145_v5 = vrot.slane %v5143_v11, 4 }
 0x27a   : > { %v3478_v18 = vpop.f32.mrf.mxu1  ;;  %v3365_v8 = vunpack.c.l.b16 %v3251_v47  ;;  %v3268_v56 = vrot.slane %v3266_v50, 4  ;;  %v8361_v50 = vld [vmem:[#allocation2 + $0xbc] sm:$0x1] }
 0x27b   : > { %9080 = vst [vmem:[#allocation20_spill] sm:$0xff] %v8319_v14  ;;  %v4217_v10 = vpop.f32.mrf.mxu3  ;;  %4905 = vmatmul.bf16.gmra.mxu0 %v4797_v32  ;;  %v3548_v61 = vadd.f32 %v3478_v18, %v9081_v52  ;;  %v6338_v32 = vrot.slane %v3586_v21, 9  ;;  %v8341_v60 = vpack.c.b16 %v5208_v30, %v5207_v3  ;;  %v6733_v52 = vld [vmem:[#allocation2 + $0xa8] sm:$0xff]  ;;  %v3253_v14 = vshrl.u32 %v2931_v43, 16  ;;  %v5006_v3 = vld [vmem:[#allocation2 + $0xb4] sm:$0xe] }
 0x27c   : > { %v3792_v21 = vunpack.c.l.b16 %v3734_v41  ;;  %v4538_v30 = vshll.u32 %v7949_v49, 16  ;;  %v3258_v41 = vrot.slane %v3256_v33, 5 }
 0x27d   : > { %9082 = vst [vmem:[#allocation35_spill] sm:$0xff] %v8341_v60  ;;  %v3973_v18 = vadd.f32 %v3903_v20, %v3548_v61  ;;  %v3731_v37 = vsel %vm7006_vm9, %v6338_v32, %v3730_v44  ;;  %v5144_v20 = vsel %vm7006_vm9, %v6513_v22, %v5143_v11  ;;  %v4542_v44 = vshrl.u32 %v7949_v49, 16 }
 0x27e   : > { %v3791_v61 = vunpack.c.l.b16 %v3731_v37  ;;  %v3255_v47 = vrot.slane %v3253_v14, 4  ;;  %v5150_v49 = vrot.slane %v8357_v27, 5  ;;  %v3269_v14 = vor.u32 %v3268_v56, %v8345_v42 }
 0x27f   : > { %v8348_v34 = vadd.f32 %v4217_v10, %v3973_v18  ;;  %v5147_v10 = vsel %vm7006_vm9, %v5145_v5, %v5146_v2  ;;  %v5209_v18 = vunpack.c.l.b16 %v5144_v20  ;;  %v5153_v2 = vrot.slane %v8361_v50, 5 }
 0x280   : > { %4259 = vmatmul.bf16.gmra.mxu3 %v6733_v52  ;;  %v2847_v55 = vpop.f32.mrf.mxu0  ;;  %v5210_v32 = vunpack.c.l.b16 %v5147_v10  ;;  %v6514_v52 = vrot.slane %v5006_v3, 9  ;;  %v3810_v6 = vpack.c.b16 %v3792_v21, %v3791_v61  ;;  %v5152_v33 = vrot.slane %v5150_v49, 4 }
 0x281   : > { %v8353_v43 = vadd.f32 %v2847_v55, %v7890_v48  ;;  %v8363_v48 = vld [vmem:[#allocation2 + $0xb8] sm:$0xf]  ;;  %v9084_v55 = vld [vmem:[#allocation26_spill] sm:$0xff]  ;;  %v8367_v63 = vpop.f32.mrf.mxu2  ;;  %v8376_v10 = vrot.slane %v4538_v30, 5  ;;  %v3272_v21 = vshll.u32 %v8308_v35, 16  ;;  %v4535_v56 = vor.u32 %v8326_v17, %v8323_v28 }
 0x282   : > { %v3481_v22 = vpop.f32.mrf.mxu1  ;;  %v8370_v5 = vpack.c.b16 %v5210_v32, %v5209_v18  ;;  %v5151_v37 = vsel %vm7006_vm9, %v6514_v52, %v5150_v49  ;;  %v3737_v3 = vrot.slane %v8363_v48, 5  ;;  %v5154_v61 = vsel %vm7006_vm9, %v5152_v33, %v5153_v2  ;;  %v8394_v17 = vld [vmem:[#allocation2 + $0xbc] sm:$0x1]  ;;  %v4336_v52 = vld [vmem:[#allocation2 + $0x78] sm:$0xf] }
 0x283   : > { %9083 = vst [vmem:[#allocation23_spill] sm:$0xff] %v8353_v43  ;;  %v4220_v11 = vpop.f32.mrf.mxu3  ;;  %v3549_v60 = vadd.f32 %v3481_v22, %v9084_v55  ;;  %v3384_v43 = vpack.c.b16 %v3365_v8, %v3364_v57  ;;  %v4544_v8 = vrot.slane %v4542_v44, 4  ;;  %v4548_v57 = vshll.u32 %v7966_v45, 16  ;;  %v9086_v44 = vld [vmem:[#allocation40_spill] sm:$0xff]  ;;  %v3587_v33 = vld [vmem:[#allocation2 + $0xb4] sm:$0xe] }
 0x284   : > { %9085 = vst [vmem:[#allocation25_spill] sm:$0xff] %v8370_v5  ;;  %v5212_v30 = vunpack.c.l.b16 %v5154_v61  ;;  %v4798_v35 = vpack.c.b16 %v8321_v38, %v8312_v62  ;;  %v3259_v28 = vor.u32 %v3258_v41, %v3255_v47  ;;  %v3270_v45 = vrot.slane %v3269_v14, 4  ;;  %v9089_v62 = vld [vmem:[#allocation28_spill] sm:$0xff]  ;;  %v2934_v14 = vld [vmem:[#allocation2 + $0xb4] sm:$0xf] }
 0x285   : > { %v3974_v20 = vadd.f32 %v3906_v31, %v3549_v60  ;;  %3520 = vmatmul.bf16.gmra.mxu1 %v3384_v43  ;;  %v6753_v60 = vld [vmem:[%s8983_s3 + $0x200] sm:$0xff]  ;;  %v5211_v43 = vunpack.c.l.b16 %v5151_v37  ;;  %v3739_v18 = vrot.slane %v3737_v3, 4  ;;  %v3274_v37 = vrot.slane %v3272_v21, 5 }
 0x286   : > { %3950 = vmatmul.bf16.gmra.mxu2 %v3810_v6  ;;  %5304 = vmatpush.bf16.msra.mxu1 %v6753_v60  ;;  %v4536_v2 = vrot.slane %v4535_v56, 4  ;;  %v3740_v41 = vrot.slane %v8394_v17, 5  ;;  %v3290_v61 = vshrl.u32 %v8363_v48, 16  ;;  %v4556_v21 = vshll.u32 %v4336_v52, 16 }
 0x287   : > { %v8384_v32 = vadd.f32 %v4220_v11, %v3974_v20  ;;  %v4545_v11 = vor.u32 %v4544_v8, %v8376_v10  ;;  %v8397_v49 = vpack.c.b16 %v5212_v30, %v5211_v43  ;;  %v4550_v20 = vrot.slane %v4548_v57, 5  ;;  %v6734_v30 = vld [vmem:[#allocation2 + $0xb4] sm:$0xff] }
 0x288   : > { %v2850_v31 = vpop.f32.mrf.mxu0  ;;  %v3286_v8 = vshll.u32 %v8363_v48, 16  ;;  %v3275_v60 = vsel %vm7027_vm12, %v3270_v45, %v3274_v37  ;;  %v4553_v43 = vshrl.u32 %v4336_v52, 16  ;;  %v6339_v56 = vrot.slane %v3587_v33, 9 }
 0x289   : > { %v8390_v22 = vadd.f32 %v2850_v31, %v9086_v44  ;;  %9087 = vst [vmem:[#allocation26_spill] sm:$0xff] %v8397_v49  ;;  %v3911_v47 = vpop.f32.mrf.mxu2  ;;  %v3260_v31 = vrot.slane %v3259_v28, 4  ;;  %v3741_v57 = vsel %vm7006_vm9, %v3739_v18, %v3740_v41  ;;  %v4546_v44 = vrot.slane %v4545_v11, 4 }
 0x28a   : > { %v3483_v55 = vpop.f32.mrf.mxu1  ;;  %v3280_v48 = vshll.u32 %v2934_v14, 16  ;;  %v4566_v28 = vshrl.u32 %v8042_v13, 16  ;;  %v3367_v37 = vunpack.c.l.b16 %v3275_v60  ;;  %v3738_v52 = vsel %vm7006_vm9, %v6339_v56, %v3737_v3 }
 0x28b   : > { %v8399_v6 = vpop.f32.mrf.mxu3  ;;  %4910 = vmatmul.bf16.gmra.mxu0 %v4798_v35  ;;  %v8402_v38 = vadd.f32 %v3483_v55, %v9089_v62  ;;  %v4562_v35 = vshll.u32 %v8042_v13, 16  ;;  %v3265_v55 = vsel %vm7027_vm12, %v3260_v31, %v8345_v42  ;;  %v3277_v62 = vshrl.u32 %v2934_v14, 16 }
 0x28c   : > { %9088 = vst [vmem:[#allocation40_spill] sm:$0xff] %v8399_v6  ;;  %v8418_v33 = vrot.slane %v3286_v8, 5  ;;  %v3292_v18 = vrot.slane %v3290_v61, 4  ;;  %v3794_v41 = vunpack.c.l.b16 %v3741_v57  ;;  %v4541_v42 = vsel %vm7027_vm12, %v4536_v2, %v8376_v10  ;;  %v2938_v2 = vld [vmem:[#allocation2 + $0xc4] sm:$0xf] }
 0x28d   : > { %v4555_v14 = vrot.slane %v4553_v43, 4  ;;  %v3366_v31 = vunpack.c.l.b16 %v3265_v55  ;;  %v4551_v13 = vsel %vm7027_vm12, %v4546_v44, %v4550_v20  ;;  %v4558_v60 = vrot.slane %v4556_v21, 5  ;;  %v6773_v20 = vld [vmem:[%s8986_s6 + $0x20] sm:$0xff] }
 0x28e   : > { %v3793_v56 = vunpack.c.l.b16 %v3738_v52  ;;  %v3279_v61 = vrot.slane %v3277_v62, 4  ;;  %v3282_v49 = vrot.slane %v3280_v48, 5  ;;  %v3293_v10 = vor.u32 %v3292_v18, %v8418_v33  ;;  %v6765_v43 = vld [vmem:[%s8985_s5 + $0x20] sm:$0xff]  ;;  %5585 = vmatpush.bf16.msra.mxu2 %v6773_v20  ;;  %v9092_v20 = vld [vmem:[#allocation31_spill] sm:$0xff] }
 0x28f   : > { %v3385_v6 = vpack.c.b16 %v3367_v37, %v3366_v31  ;;  %v4775_v44 = vunpack.c.l.b16 %v4551_v13  ;;  %v3744_v55 = vrot.slane %v2938_v2, 5  ;;  %v4774_v48 = vunpack.c.l.b16 %v4541_v42  ;;  %v8441_v37 = vld [vmem:[#allocation2 + $0xc8] sm:$0x1]  ;;  %5722 = vmatpush.bf16.msra.mxu3 %v6765_v43 }
 0x290   : > { %4264 = vmatmul.bf16.gmra.mxu3 %v6734_v30  ;;  %v2852_v45 = vpop.f32.mrf.mxu0  ;;  %v8428_v30 = vrot.slane %v4562_v35, 5  ;;  %v3811_v21 = vpack.c.b16 %v3794_v41, %v3793_v56  ;;  %v3588_v35 = vld [vmem:[#allocation2 + $0xc0] sm:$0xe]  ;;  %v3283_v52 = vor.u32 %v3282_v49, %v3279_v61  ;;  %v4559_v18 = vor.u32 %v4558_v60, %v4555_v14 }
 0x291   : > { %v8421_v11 = vadd.f32 %v2852_v45, %v7968_v59  ;;  %v4568_v59 = vrot.slane %v4566_v28, 4  ;;  %v9090_v45 = vld [vmem:[#allocation29_spill] sm:$0xff]  ;;  %v8431_v5 = vpop.f32.mrf.mxu2  ;;  %v3296_v28 = vshll.u32 %v8394_v17, 16  ;;  %v3294_v56 = vrot.slane %v3293_v10, 4  ;;  %v2937_v49 = vld [vmem:[#allocation2 + $0xc0] sm:$0xf] }
 0x292   : > { %v3486_v3 = vpop.f32.mrf.mxu1  ;;  %v4799_v17 = vpack.c.b16 %v4775_v44, %v4774_v48  ;;  %v3746_v42 = vrot.slane %v3744_v55, 4  ;;  %v4560_v61 = vrot.slane %v4559_v18, 4  ;;  %v3310_v44 = vshll.u32 %v2938_v2, 16 }
 0x293   : > { %v4225_v8 = vpop.f32.mrf.mxu3  ;;  %v3551_v57 = vadd.f32 %v3486_v3, %v9090_v45  ;;  %v4569_v31 = vor.u32 %v4568_v59, %v8428_v30  ;;  %v4572_v3 = vshll.u32 %v8052_v9, 16  ;;  %v3747_v45 = vrot.slane %v8441_v37, 5 }
 0x294   : > { %v3284_v9 = vrot.slane %v3283_v52, 4  ;;  %v3304_v48 = vshll.u32 %v2937_v49, 16  ;;  %v6735_v52 = vld [vmem:[#allocation2 + $0xc0] sm:$0xff] }
 0x295   : > { %v3976_v62 = vadd.f32 %v3911_v47, %v3551_v57  ;;  %3525 = vmatmul.bf16.gmra.mxu1 %v3385_v6  ;;  %v6340_v47 = vrot.slane %v3588_v35, 9  ;;  %v3298_v57 = vrot.slane %v3296_v28, 5  ;;  %v4574_v59 = vrot.slane %v4572_v3, 5 }
 0x296   : > { %3955 = vmatmul.bf16.gmra.mxu2 %v3811_v21  ;;  %v3748_v35 = vsel %vm7006_vm9, %v3746_v42, %v3747_v45  ;;  %v3314_v28 = vshrl.u32 %v2938_v2, 16  ;;  %v3289_v18 = vsel %vm7027_vm12, %v3284_v9, %v8418_v33  ;;  %v3306_v45 = vrot.slane %v3304_v48, 5  ;;  %v4339_v33 = vld [vmem:[#allocation2 + $0x84] sm:$0xf] }
 0x297   : > { %v8445_v41 = vadd.f32 %v4225_v8, %v3976_v62  ;;  %v4570_v8 = vrot.slane %v4569_v31, 4  ;;  %v3745_v21 = vsel %vm7006_vm9, %v6340_v47, %v3744_v55  ;;  %v3301_v62 = vshrl.u32 %v2937_v49, 16 }
 0x298   : > { %v2855_v13 = vpop.f32.mrf.mxu0  ;;  %v4565_v31 = vsel %vm7027_vm12, %v4560_v61, %v8428_v30  ;;  %v3796_v47 = vunpack.c.l.b16 %v3748_v35  ;;  %v3368_v49 = vunpack.c.l.b16 %v3289_v18  ;;  %v4590_v30 = vshrl.u32 %v8070_v29, 16 }
 0x299   : > { %v8448_v6 = vadd.f32 %v2855_v13, %v8013_v12  ;;  %v3916_v43 = vpop.f32.mrf.mxu2  ;;  %v3299_v12 = vsel %vm7027_vm12, %v3294_v56, %v3298_v57  ;;  %v4575_v3 = vsel %vm7027_vm12, %v4570_v8, %v4574_v59  ;;  %v3795_v56 = vunpack.c.l.b16 %v3745_v21  ;;  %v9093_v59 = vld [vmem:[#allocation34_spill] sm:$0xff] }
 0x29a   : > { %v3488_v14 = vpop.f32.mrf.mxu1  ;;  %v3369_v13 = vunpack.c.l.b16 %v3299_v12  ;;  %v3303_v42 = vrot.slane %v3301_v62, 4  ;;  %v3316_v57 = vrot.slane %v3314_v28, 4  ;;  %v4776_v8 = vunpack.c.l.b16 %v4565_v31 }
 0x29b   : > { %v8451_v60 = vpop.f32.mrf.mxu3  ;;  %4915 = vmatmul.bf16.gmra.mxu0 %v4799_v17  ;;  %v8454_v10 = vadd.f32 %v3488_v14, %v9092_v20  ;;  %v3312_v17 = vrot.slane %v3310_v44, 5  ;;  %v4586_v14 = vshll.u32 %v8070_v29, 16  ;;  %v4777_v44 = vunpack.c.l.b16 %v4575_v3 }
 0x29c   : > { %9091 = vst [vmem:[#allocation28_spill] sm:$0xff] %v8451_v60  ;;  %v3386_v12 = vpack.c.b16 %v3369_v13, %v3368_v49  ;;  %v3812_v35 = vpack.c.b16 %v3796_v47, %v3795_v56  ;;  %v3307_v62 = vor.u32 %v3306_v45, %v3303_v42  ;;  %v3320_v28 = vshll.u32 %v8441_v37, 16 }
 0x29d   : > { %v3317_v48 = vor.u32 %v3316_v57, %v3312_v17  ;;  %v4580_v18 = vshll.u32 %v4339_v33, 16  ;;  %v4592_v29 = vrot.slane %v4590_v30, 4  ;;  %v9094_v57 = vld [vmem:[#allocation37_spill] sm:$0xff] }
 0x29e   : > { %v3308_v3 = vrot.slane %v3307_v62, 4  ;;  %v3322_v56 = vrot.slane %v3320_v28, 5  ;;  %v6736_v30 = vld [vmem:[#allocation2 + $0xcc] sm:$0xff] }
 0x29f   : > { %v3318_v49 = vrot.slane %v3317_v48, 4  ;;  %v4582_v42 = vrot.slane %v4580_v18, 5  ;;  %v4342_v18 = vld [vmem:[#allocation2 + $0x90] sm:$0xf] }
 0x2a0   : > { %4269 = vmatmul.bf16.gmra.mxu3 %v6735_v52  ;;  %v2857_v55 = vpop.f32.mrf.mxu0 }
 0x2a1   : > { %v8471_v2 = vadd.f32 %v2857_v55, %v8059_v51  ;;  %v8476_v21 = vpop.f32.mrf.mxu2  ;;  %v4577_v51 = vshrl.u32 %v4339_v33, 16  ;;  %v4588_v55 = vrot.slane %v4586_v14, 5 }
 0x2a2   : > { %v3491_v9 = vpop.f32.mrf.mxu1 }
 0x2a3   : > { %v4230_v61 = vpop.f32.mrf.mxu3  ;;  %v3553_v20 = vadd.f32 %v3491_v9, %v9093_v59  ;;  %v4800_v9 = vpack.c.b16 %v4777_v44, %v4776_v8  ;;  %v4579_v47 = vrot.slane %v4577_v51, 4  ;;  %v4593_v45 = vor.u32 %v4592_v29, %v4588_v55 }
 0x2a4   : > { %v3323_v59 = vsel %vm7027_vm12, %v3318_v49, %v3322_v56  ;;  %v4614_v29 = vshrl.u32 %v8179_v53, 16 }
 0x2a5   : > { %v3978_v52 = vadd.f32 %v3916_v43, %v3553_v20  ;;  %3530 = vmatmul.bf16.gmra.mxu1 %v3386_v12  ;;  %v4583_v20 = vor.u32 %v4582_v42, %v4579_v47  ;;  %v4594_v12 = vrot.slane %v4593_v45, 4  ;;  %v6772_v42 = vld [vmem:[%s8986_s6 + $0x18] sm:$0xff] }
 0x2a6   : > { %3960 = vmatmul.bf16.gmra.mxu2 %v3812_v35  ;;  %v3371_v35 = vunpack.c.l.b16 %v3323_v59  ;;  %v6764_v45 = vld [vmem:[%s8985_s5 + $0x18] sm:$0xff] }
 0x2a7   : > { %v8479_v60 = vadd.f32 %v4230_v61, %v3978_v52  ;;  %v6791_v61 = vld [vmem:[#allocation2 + $0x8c] sm:$0x1]  ;;  %v4584_v28 = vrot.slane %v4583_v20, 4  ;;  %5586 = vmatpush.bf16.msra.mxu2 %v6772_v42  ;;  %5723 = vmatpush.bf16.msra.mxu3 %v6764_v45  ;;  %v4634_v42 = vshll.u32 %v8261_v23, 16  ;;  %v4638_v45 = vshrl.u32 %v8261_v23, 16 }
 0x2a8   : > { %v4881_v31 = vpop.f32.mrf.mxu0  ;;  %v4596_v8 = vshll.u32 %v6791_v61, 16 }
 0x2a9   : > { %v8482_v13 = vadd.f32 %v4881_v31, %v8089_v36  ;;  %v3921_v14 = vpop.f32.mrf.mxu2  ;;  %v3313_v36 = vsel %vm7027_vm12, %v3308_v3, %v3312_v17  ;;  %v4610_v17 = vshll.u32 %v8179_v53, 16  ;;  %v9095_v3 = vld [vmem:[#allocation38_spill] sm:$0xff]  ;;  %v4601_v53 = vshrl.u32 %v4342_v18, 16 }
 0x2aa   : > { %v3493_v37 = vpop.f32.mrf.mxu1  ;;  %v3370_v51 = vunpack.c.l.b16 %v3313_v36  ;;  %v4598_v62 = vrot.slane %v4596_v8, 5  ;;  %v4616_v8 = vrot.slane %v4614_v29, 4 }
 0x2ab   : > { %v8484_v43 = vpop.f32.mrf.mxu3  ;;  %4920 = vmatmul.bf16.gmra.mxu0 %v4800_v9  ;;  %v8487_v33 = vadd.f32 %v3493_v37, %v9094_v57  ;;  %v4612_v61 = vrot.slane %v4610_v17, 5  ;;  %v4620_v17 = vshll.u32 %v8188_v40, 16 }
 0x2ac   : > { %v4599_v52 = vsel %vm7027_vm12, %v4594_v12, %v4598_v62  ;;  %v3387_v56 = vpack.c.b16 %v3371_v35, %v3370_v51 }
 0x2ad   : > { %v4779_v37 = vunpack.c.l.b16 %v4599_v52  ;;  %v4617_v35 = vor.u32 %v4616_v8, %v4612_v61 }
 0x2b0   : > { %v4883_v44 = vpop.f32.mrf.mxu0  ;;  %4274 = vmatmul.bf16.gmra.mxu3 %v6736_v30  ;;  %v4604_v30 = vshll.u32 %v4342_v18, 16 }
 0x2b1   : > { %v8494_v48 = vadd.f32 %v4883_v44, %v8131_v25  ;;  %v8501_v47 = vpop.f32.mrf.mxu2  ;;  %v4589_v25 = vsel %vm7027_vm12, %v4584_v28, %v4588_v55  ;;  %v4603_v44 = vrot.slane %v4601_v53, 4 }
 0x2b2   : > { %v3496_v31 = vpop.f32.mrf.mxu1  ;;  %v4778_v36 = vunpack.c.l.b16 %v4589_v25  ;;  %v4606_v51 = vrot.slane %v4604_v30, 5  ;;  %v4345_v25 = vld [vmem:[#allocation2 + $0x9c] sm:$0xf] }
 0x2b3   : > { %v4235_v9 = vpop.f32.mrf.mxu3  ;;  %v3555_v49 = vadd.f32 %v3496_v31, %v9095_v3  ;;  %v4618_v31 = vrot.slane %v4617_v35, 4  ;;  %v4622_v3 = vrot.slane %v4620_v17, 5  ;;  %v4640_v35 = vrot.slane %v4638_v45, 4 }
 0x2b4   : > { %v4801_v12 = vpack.c.b16 %v4779_v37, %v4778_v36  ;;  %v4607_v29 = vor.u32 %v4606_v51, %v4603_v44  ;;  %v4625_v36 = vshrl.u32 %v4345_v25, 16  ;;  %v4628_v44 = vshll.u32 %v4345_v25, 16 }
 0x2b5   : > { %v3980_v57 = vadd.f32 %v3921_v14, %v3555_v49  ;;  %3535 = vmatmul.bf16.gmra.mxu1 %v3387_v56  ;;  %v9096_v14 = vld [vmem:[#allocation39_spill] sm:$0xff]  ;;  %v4623_v56 = vsel %vm7027_vm12, %v4618_v31, %v4622_v3  ;;  %v4636_v51 = vrot.slane %v4634_v42, 5  ;;  %v4644_v42 = vshll.u32 %v8268_v24, 16 }
 0x2b6   : > { %v4608_v49 = vrot.slane %v4607_v29, 4  ;;  %v4627_v31 = vrot.slane %v4625_v36, 4  ;;  %v4658_v36 = vshll.u32 %v8314_v7, 16 }
 0x2b7   : > { %v8511_v59 = vadd.f32 %v4235_v9, %v3980_v57  ;;  %v9097_v57 = vld [vmem:[#allocation41_spill] sm:$0xff]  ;;  %v4641_v3 = vor.u32 %v4640_v35, %v4636_v51  ;;  %v9100_v35 = vld [vmem:[#allocation44_spill] sm:$0xff] }
 0x2b8   : > { %v4886_v55 = vpop.f32.mrf.mxu0  ;;  %v4613_v8 = vsel %vm7027_vm12, %v4608_v49, %v4612_v61 }
 0x2b9   : > { %v8514_v20 = vadd.f32 %v4886_v55, %v8161_v26  ;;  %v3926_v18 = vpop.f32.mrf.mxu2 }
 0x2ba   : > { %v3498_v62 = vpop.f32.mrf.mxu1 }
 0x2bb   : > { %v8516_v28 = vpop.f32.mrf.mxu3  ;;  %4925 = vmatmul.bf16.gmra.mxu0 %v4801_v12  ;;  %v8519_v52 = vadd.f32 %v3498_v62, %v9096_v14  ;;  %v9098_v12 = vld [vmem:[#allocation21_spill] sm:$0xff]  ;;  %v4780_v62 = vunpack.c.l.b16 %v4613_v8 }
 0x2c0   : > { %v4888_v9 = vpop.f32.mrf.mxu0 }
 0x2c1   : > { %v8523_v26 = vadd.f32 %v4888_v9, %v8201_v16  ;;  %v8530_v30 = vpop.f32.mrf.mxu2  ;;  %v4781_v16 = vunpack.c.l.b16 %v4623_v56  ;;  %v4630_v9 = vrot.slane %v4628_v44, 5 }
 0x2c2   : > { %v3501_v37 = vpop.f32.mrf.mxu1 }
 0x2c3   : > { %v4240_v53 = vpop.f32.mrf.mxu3  ;;  %v3557_v40 = vadd.f32 %v3501_v37, %v9097_v57  ;;  %v4802_v29 = vpack.c.b16 %v4781_v16, %v4780_v62  ;;  %v4631_v45 = vor.u32 %v4630_v9, %v4627_v31  ;;  %v4642_v37 = vrot.slane %v4641_v3, 4  ;;  %v4348_v16 = vld [vmem:[#allocation2 + $0xa8] sm:$0xf]  ;;  %v9101_v3 = vld [vmem:[#allocation22_spill] sm:$0xff] }
 0x2c4   : > { %v4646_v57 = vrot.slane %v4644_v42, 5  ;;  %v4649_v9 = vshrl.u32 %v4348_v16, 16 }
 0x2c5   : > { %v3982_v55 = vadd.f32 %v3926_v18, %v3557_v40  ;;  %5305 = vmatmul.bf16.vlgmr.msra.gmra.mxu1 %v9098_v12  ;;  %v9099_v18 = vld [vmem:[#allocation43_spill] sm:$0xff]  ;;  %v4632_v40 = vrot.slane %v4631_v45, 4 }
 0x2c6   : > { %v4647_v8 = vsel %vm7027_vm12, %v4642_v37, %v4646_v57 }
 0x2c7   : > { %v8535_v14 = vadd.f32 %v4240_v53, %v3982_v55  ;;  %v4662_v55 = vshrl.u32 %v8314_v7, 16  ;;  %v4783_v31 = vunpack.c.l.b16 %v4647_v8 }
 0x2c8   : > { %v4891_v23 = vpop.f32.mrf.mxu0 }
 0x2c9   : > { %v8538_v17 = vadd.f32 %v4891_v23, %v8232_v1  ;;  %v3931_v25 = vpop.f32.mrf.mxu2  ;;  %v4637_v23 = vsel %vm7027_vm12, %v4632_v40, %v4636_v51  ;;  %v4664_v42 = vrot.slane %v4662_v55, 4  ;;  %v4651_v40 = vrot.slane %v4649_v9, 4 }
 0x2ca   : > { %v3503_v61 = vpop.f32.mrf.mxu1  ;;  %v4782_v45 = vunpack.c.l.b16 %v4637_v23 }
 0x2cb   : > { %v8540_v49 = vpop.f32.mrf.mxu3  ;;  %4930 = vmatmul.bf16.gmra.mxu0 %v4802_v29  ;;  %v8543_v56 = vadd.f32 %v3503_v61, %v9099_v18  ;;  %v6763_v29 = vld [vmem:[%s8985_s5 + $0x10] sm:$0xff]  ;;  %v4652_v61 = vshll.u32 %v4348_v16, 16  ;;  %v4660_v18 = vrot.slane %v4658_v36, 5 }
 0x2cc   : > { %5724 = vmatpush.bf16.msra.mxu3 %v6763_v29  ;;  %v4803_v57 = vpack.c.b16 %v4783_v31, %v4782_v45  ;;  %v9102_v16 = vld [vmem:[#allocation46_spill] sm:$0xff] }
 0x2cd   : > { %v4665_v8 = vor.u32 %v4664_v42, %v4660_v18 }
 0x2cf   : > { %v4666_v23 = vrot.slane %v4665_v8, 4 }
 0x2d0   : > { %v4893_v53 = vpop.f32.mrf.mxu0 }
 0x2d1   : > { %v8547_v1 = vadd.f32 %v4893_v53, %v8282_v58  ;;  %v8554_v62 = vpop.f32.mrf.mxu2  ;;  %v6771_v58 = vld [vmem:[%s8986_s6 + $0x10] sm:$0xff] }
 0x2d2   : > { %v3506_v12 = vpop.f32.mrf.mxu1  ;;  %5587 = vmatpush.bf16.msra.mxu2 %v6771_v58 }
 0x2d3   : > { %v4245_v44 = vpop.f32.mrf.mxu3  ;;  %v3559_v24 = vadd.f32 %v3506_v12, %v9100_v35  ;;  %v4654_v12 = vrot.slane %v4652_v61, 5  ;;  %v4686_v61 = vshrl.u32 %v8357_v27, 16 }
 0x2d5   : > { %v3984_v7 = vadd.f32 %v3931_v25, %v3559_v24  ;;  %5310 = vmatmul.bf16.gmra.mxu1 %v9101_v3  ;;  %v4668_v24 = vshll.u32 %v8337_v4, 16  ;;  %v4682_v3 = vshll.u32 %v8357_v27, 16 }
 0x2d7   : > { %v8565_v51 = vadd.f32 %v4245_v44, %v3984_v7  ;;  %v4655_v44 = vor.u32 %v4654_v12, %v4651_v40  ;;  %v4670_v29 = vrot.slane %v4668_v24, 5  ;;  %v4351_v7 = vld [vmem:[#allocation2 + $0xb4] sm:$0xf]  ;;  %v4688_v24 = vrot.slane %v4686_v61, 4  ;;  %v4354_v61 = vld [vmem:[#allocation2 + $0xc0] sm:$0xf] }
 0x2d8   : > { %v4896_v37 = vpop.f32.mrf.mxu0  ;;  %v4673_v40 = vshrl.u32 %v4351_v7, 16  ;;  %v4676_v12 = vshll.u32 %v4351_v7, 16 }
 0x2d9   : > { %v8568_v53 = vadd.f32 %v4896_v37, %v8310_v15  ;;  %v3936_v55 = vpop.f32.mrf.mxu2  ;;  %v4656_v31 = vrot.slane %v4655_v44, 4  ;;  %v4671_v9 = vsel %vm7027_vm12, %v4666_v23, %v4670_v29 }
 0x2da   : > { %v3508_v35 = vpop.f32.mrf.mxu1  ;;  %v4678_v29 = vrot.slane %v4676_v12, 5 }
 0x2db   : > { %v8570_v25 = vpop.f32.mrf.mxu3  ;;  %4935 = vmatmul.bf16.gmra.mxu0 %v4803_v57  ;;  %v8573_v36 = vadd.f32 %v3508_v35, %v9102_v16  ;;  %v4661_v57 = vsel %vm7027_vm12, %v4656_v31, %v4660_v18  ;;  %v9104_v35 = vld [vmem:[#allocation24_spill] sm:$0xff]  ;;  %v4684_v16 = vrot.slane %v4682_v3, 5 }
 0x2dc   : > { %v4784_v44 = vunpack.c.l.b16 %v4661_v57  ;;  %v4697_v57 = vshrl.u32 %v4354_v61, 16 }
 0x2e0   : > { %v4898_v58 = vpop.f32.mrf.mxu0 }
 0x2e1   : > { %v8577_v15 = vadd.f32 %v4898_v58, %v8348_v34  ;;  %v8584_v37 = vpop.f32.mrf.mxu2  ;;  %v4785_v34 = vunpack.c.l.b16 %v4671_v9  ;;  %v4675_v58 = vrot.slane %v4673_v40, 4  ;;  %v4700_v40 = vshll.u32 %v4354_v61, 16  ;;  %v8615_v61 = vld [vmem:[#allocation2 + $0xc8] sm:$0x1] }
 0x2e2   : > { %v3511_v42 = vpop.f32.mrf.mxu1  ;;  %9103 = vst [vmem:[#allocation29_spill] sm:$0xff] %v8584_v37 }
 0x2e3   : > { %v4250_v45 = vpop.f32.mrf.mxu3  ;;  %v3561_v4 = vadd.f32 %v3511_v42, %v8097_v19  ;;  %v4804_v27 = vpack.c.b16 %v4785_v34, %v4784_v44  ;;  %v4689_v19 = vor.u32 %v4688_v24, %v4684_v16  ;;  %v4679_v9 = vor.u32 %v4678_v29, %v4675_v58  ;;  %v6762_v58 = vld [vmem:[%s8985_s5 + $0x8] sm:$0xff] }
 0x2e4   : > { %5725 = vmatpush.bf16.msra.mxu3 %v6762_v58  ;;  %v8625_v58 = vld [vmem:[#allocation2 + $0xd0] sm:$0xf] }
 0x2e5   : > { %v3986_v8 = vadd.f32 %v3936_v55, %v3561_v4  ;;  %5315 = vmatmul.bf16.gmra.mxu1 %v9104_v35  ;;  %v4692_v55 = vshll.u32 %v8361_v50, 16  ;;  %v4690_v7 = vrot.slane %v4689_v19, 4  ;;  %v4680_v4 = vrot.slane %v4679_v9, 4 }
 0x2e6   : > { %v4699_v19 = vrot.slane %v4697_v57, 4  ;;  %v4702_v9 = vrot.slane %v4700_v40, 5 }
 0x2e7   : > { %v8589_v23 = vadd.f32 %v4250_v45, %v3986_v8  ;;  %v4694_v3 = vrot.slane %v4692_v55, 5  ;;  %v8597_v45 = vld [vmem:[#allocation2 + $0xc4] sm:$0xf]  ;;  %v4685_v44 = vsel %vm7027_vm12, %v4680_v4, %v4684_v16  ;;  %v9109_v55 = vld [vmem:[#allocation27_spill] sm:$0xff] }
 0x2e8   : > { %v4706_v12 = vshll.u32 %v8597_v45, 16 }
 0x2e9   : > { %9105 = vst [vmem:[#allocation31_spill] sm:$0xff] %v8589_v23  ;;  %v3941_v31 = vpop.f32.mrf.mxu2  ;;  %v4695_v34 = vsel %vm7027_vm12, %v4690_v7, %v4694_v3  ;;  %v4786_v3 = vunpack.c.l.b16 %v4685_v44 }
 0x2ea   : > { %v3513_v42 = vpop.f32.mrf.mxu1  ;;  %v4787_v29 = vunpack.c.l.b16 %v4695_v34 }
 0x2eb   : > { %v8591_v37 = vpop.f32.mrf.mxu3  ;;  %4940 = vmatmul.bf16.gmra.mxu0 %v4804_v27  ;;  %v8594_v18 = vadd.f32 %v3513_v42, %v8138_v46  ;;  %v4710_v46 = vshrl.u32 %v8597_v45, 16  ;;  %v6770_v27 = vld [vmem:[%s8986_s6 + $0x8] sm:$0xff] }
 0x2ec   : > { %9106 = vst [vmem:[#allocation34_spill] sm:$0xff] %v8591_v37  ;;  %5588 = vmatpush.bf16.msra.mxu2 %v6770_v27  ;;  %v4805_v4 = vpack.c.b16 %v4787_v29, %v4786_v3  ;;  %v4716_v37 = vshll.u32 %v8615_v61, 16  ;;  %v4357_v27 = vld [vmem:[#allocation2 + $0xcc] sm:$0xf] }
 0x2ed   : > { %9107 = vst [vmem:[#allocation37_spill] sm:$0xff] %v8594_v18  ;;  %v4712_v7 = vrot.slane %v4710_v46, 4  ;;  %v4724_v29 = vshll.u32 %v4357_v27, 16 }
 0x2ee   : > { %v4718_v44 = vrot.slane %v4716_v37, 5 }
 0x2f1   : > { %v8604_v24 = vpop.f32.mrf.mxu2 }
 0x2f2   : > { %v3516_v8 = vpop.f32.mrf.mxu1  ;;  %9108 = vst [vmem:[#allocation38_spill] sm:$0xff] %v8604_v24 }
 0x2f3   : > { %v4255_v35 = vpop.f32.mrf.mxu3  ;;  %v3563_v50 = vadd.f32 %v3516_v8, %v8166_v54  ;;  %v4708_v54 = vrot.slane %v4706_v12, 5  ;;  %v4703_v8 = vor.u32 %v4702_v9, %v4699_v19  ;;  %v4730_v19 = vshll.u32 %v8625_v58, 16 }
 0x2f4   : > { %v4734_v9 = vshrl.u32 %v8625_v58, 16 }
 0x2f5   : > { %v3988_v42 = vadd.f32 %v3941_v31, %v3563_v50  ;;  %5320 = vmatmul.bf16.gmra.mxu1 %v9109_v55  ;;  %v4713_v24 = vor.u32 %v4712_v7, %v4708_v54  ;;  %v9112_v31 = vld [vmem:[#allocation49_spill] sm:$0xff]  ;;  %v4704_v46 = vrot.slane %v4703_v8, 4 }
 0x2f7   : > { %v8617_v16 = vadd.f32 %v4255_v35, %v3988_v42  ;;  %v4714_v50 = vrot.slane %v4713_v24, 4  ;;  %v4721_v35 = vshrl.u32 %v4357_v27, 16  ;;  %v4709_v42 = vsel %vm7027_vm12, %v4704_v46, %v4708_v54  ;;  %v9114_v24 = vld [vmem:[#allocation32_spill] sm:$0xff]  ;;  %v9115_v46 = vld [vmem:[#allocation30_spill] sm:$0xff] }
 0x2f8   : > { %v4736_v27 = vrot.slane %v4734_v9, 4 }
 0x2f9   : > { %9110 = vst [vmem:[#allocation39_spill] sm:$0xff] %v8617_v16  ;;  %v3946_v12 = vpop.f32.mrf.mxu2  ;;  %v4719_v55 = vsel %vm7027_vm12, %v4714_v50, %v4718_v44 }
 0x2fa   : > { %v3518_v34 = vpop.f32.mrf.mxu1  ;;  %v4789_v16 = vunpack.c.l.b16 %v4719_v55 }
 0x2fb   : > { %v8620_v57 = vpop.f32.mrf.mxu3  ;;  %4945 = vmatmul.bf16.gmra.mxu0 %v4805_v4  ;;  %v8623_v40 = vadd.f32 %v3518_v34, %v9112_v31  ;;  %v4723_v4 = vrot.slane %v4721_v35, 4  ;;  %v4726_v34 = vrot.slane %v4724_v29, 5  ;;  %v4732_v31 = vrot.slane %v4730_v19, 5  ;;  %v9116_v29 = vld [vmem:[#allocation33_spill] sm:$0xff] }
 0x2fc   : > { %9111 = vst [vmem:[#allocation41_spill] sm:$0xff] %v8620_v57  ;;  %v4788_v57 = vunpack.c.l.b16 %v4709_v42 }
 0x2fd   : > { %9113 = vst [vmem:[#allocation21_spill] sm:$0xff] %v8623_v40  ;;  %v8636_v40 = vld [vmem:[#allocation2 + $0xd4] sm:$0x1]  ;;  %v4727_v44 = vor.u32 %v4726_v34, %v4723_v4  ;;  %v4737_v23 = vor.u32 %v4736_v27, %v4732_v31  ;;  %v9117_v27 = vld [vmem:[#allocation20_spill] sm:$0xff] }
 0x2fe   : > { %v4740_v35 = vshll.u32 %v8636_v40, 16  ;;  %v4806_v18 = vpack.c.b16 %v4789_v16, %v4788_v57 }
 0x2ff   : > { %v4728_v42 = vrot.slane %v4727_v44, 4  ;;  %v4738_v55 = vrot.slane %v4737_v23, 4  ;;  %v6761_v23 = vld [vmem:[%s8985_s5] sm:$0xff] }
 0x300   : > { %v4742_v9 = vrot.slane %v4740_v35, 5  ;;  %v9118_v44 = vld [vmem:[#allocation36_spill] sm:$0xff]  ;;  %5726 = vmatpush.bf16.msra.mxu3 %v6761_v23 }
 0x301   : > { %v8634_v8 = vpop.f32.mrf.mxu2 }
 0x302   : > { %v3521_v7 = vpop.f32.mrf.mxu1  ;;  %v4743_v4 = vsel %vm7027_vm12, %v4738_v55, %v4742_v9  ;;  %v9120_v55 = vld [vmem:[#allocation23_spill] sm:$0xff] }
 0x303   : > { %v4260_v3 = vpop.f32.mrf.mxu3  ;;  %v3565_v37 = vadd.f32 %v3521_v7, %v9114_v24  ;;  %v4791_v57 = vunpack.c.l.b16 %v4743_v4 }
 0x305   : > { %v3990_v54 = vadd.f32 %v3946_v12, %v3565_v37  ;;  %5325 = vmatmul.bf16.gmra.mxu1 %v9115_v46 }
 0x307   : > { %v8639_v50 = vadd.f32 %v4260_v3, %v3990_v54  ;;  %v4733_v3 = vsel %vm7027_vm12, %v4728_v42, %v4732_v31 }
 0x308   : > { %v4790_v16 = vunpack.c.l.b16 %v4733_v3  ;;  %v5007_v3 = vld [vmem:[#allocation2 + $0xc0] sm:$0xe] }
 0x309   : > { %v3951_v12 = vpop.f32.mrf.mxu2  ;;  %v6515_v4 = vrot.slane %v5007_v3, 9 }
 0x30a   : > { %v3523_v7 = vpop.f32.mrf.mxu1  ;;  %v4807_v31 = vpack.c.b16 %v4791_v57, %v4790_v16  ;;  %v5160_v16 = vrot.slane %v8615_v61, 5  ;;  %v9122_v61 = vld [vmem:[#allocation4_spill] sm:$0xff] }
 0x30b   : > { %v8642_v24 = vpop.f32.mrf.mxu3  ;;  %4950 = vmatmul.bf16.gmra.mxu0 %v4806_v18  ;;  %v8645_v19 = vadd.f32 %v3523_v7, %v9116_v29  ;;  %v6769_v18 = vld [vmem:[%s8986_s6] sm:$0xff]  ;;  %v9119_v7 = vld [vmem:[#allocation3_spill] sm:$0xff] }
 0x30c   : > { %5589 = vmatpush.bf16.msra.mxu2 %v6769_v18 }
 0x30f   : > { %6581 = vmatmul.msk.bf16.vlgmr.msra.gmra.mxu2 %vm561_vm0, %v9119_v7  ;;  %v9121_v7 = vld [vmem:[#allocation42_spill] sm:$0xff] }
 0x311   : > { %v8659_v0 = vpop.f32.mrf.mxu2 }
 0x312   : > { %v3526_v37 = vpop.f32.mrf.mxu1 }
 0x313   : > { %v4265_v34 = vpop.f32.mrf.mxu3  ;;  %v3567_v54 = vadd.f32 %v3526_v37, %v9117_v27 }
 0x315   : > { %v3992_v46 = vadd.f32 %v3951_v12, %v3567_v54  ;;  %5330 = vmatmul.bf16.gmra.mxu1 %v9118_v44  ;;  %v5157_v12 = vrot.slane %v8597_v45, 5 }
 0x317   : > { %v8661_v35 = vadd.f32 %v4265_v34, %v3992_v46  ;;  %v5159_v37 = vrot.slane %v5157_v12, 4  ;;  %v5158_v34 = vsel %vm7006_vm9, %v6515_v4, %v5157_v12 }
 0x318   : > { %v5213_v54 = vunpack.c.l.b16 %v5158_v34 }
 0x319   : > { %v5161_v57 = vsel %vm7006_vm9, %v5159_v37, %v5160_v16  ;;  %v3956_v27 = vpop.f32.mrf.mxu2 }
 0x31a   : > { %v3528_v29 = vpop.f32.mrf.mxu1  ;;  %v5214_v18 = vunpack.c.l.b16 %v5161_v57  ;;  %v9123_v57 = vld [vmem:[#allocation45_spill] sm:$0xff] }
 0x31b   : > { %v8665_v42 = vpop.f32.mrf.mxu3  ;;  %4955 = vmatmul.bf16.gmra.mxu0 %v4807_v31  ;;  %v8668_v9 = vadd.f32 %v3528_v29, %v9120_v55 }
 0x31c   : > { %v8676_v44 = vpack.c.b16 %v5214_v18, %v5213_v54  ;;  %v9124_v18 = vld [vmem:[#allocation5_spill] sm:$0xff] }
 0x31f   : > { %6582 = vmatmul.msk.bf16.gmra.mxu2 %vm561_vm0, %v9122_v61 }
 0x321   : > { %v8684_v55 = vpop.f32.mrf.mxu2 }
 0x322   : > { %v3531_v23 = vpop.f32.mrf.mxu1 }
 0x323   : > { %v4270_v46 = vpop.f32.mrf.mxu3  ;;  %v3569_v45 = vadd.f32 %v3531_v23, %v8390_v22 }
 0x325   : > { %v3994_v31 = vadd.f32 %v3956_v27, %v3569_v45  ;;  %5335 = vmatmul.bf16.gmra.mxu1 %v9121_v7  ;;  %v9125_v45 = vld [vmem:[#allocation47_spill] sm:$0xff]  ;;  %v9126_v7 = vld [vmem:[#allocation6_spill] sm:$0xff] }
 0x327   : > { %v8680_v29 = vadd.f32 %v4270_v46, %v3994_v31 }
 0x329   : > { %v3961_v22 = vpop.f32.mrf.mxu2 }
 0x32a   : > { %v3533_v12 = vpop.f32.mrf.mxu1 }
 0x32b   : > { %v8687_v3 = vadd.f32 %v3533_v12, %v8421_v11  ;;  %v8689_v4 = vpop.f32.mrf.mxu3 }
 0x32f   : > { %6583 = vmatmul.msk.bf16.gmra.mxu2 %vm561_vm0, %v9124_v18 }
 0x332   : > { %v3536_v37 = vpop.f32.mrf.mxu1 }
 0x333   : > { %v3571_v16 = vadd.f32 %v3536_v37, %v8448_v6  ;;  %v4275_v34 = vpop.f32.mrf.mxu3  ;;  %v8705_v6 = vld [vmem:[%s8984_s4] ss:$0 sm:$0xff] }
 0x335   : > { %5340 = vmatmul.bf16.gmra.mxu1 %v9123_v57  ;;  %v3996_v27 = vadd.f32 %v3961_v22, %v3571_v16 }
 0x337   : > { %v8693_v54 = vadd.f32 %v4275_v34, %v3996_v27  ;;  %v4901_v34 = vpop.f32.mrf.mxu0  ;;  %v9127_v27 = vld [vmem:[#allocation48_spill] sm:$0xff] }
 0x33a   : > { %v3538_v23 = vpop.f32.mrf.mxu1 }
 0x33b   : > { %v8698_v46 = vadd.f32 %v3538_v23, %v8471_v2  ;;  %v9128_v23 = vld [vmem:[#allocation7_spill] sm:$0xff] }
 0x33f   : > { %6584 = vmatmul.msk.bf16.gmra.mxu2 %vm561_vm0, %v9126_v7 }
 0x342   : > { %v5306_v11 = vpop.f32.mrf.mxu1 }
 0x343   : > { %v5386_v31 = vadd.f32 %v5306_v11, %v8482_v13  ;;  %v4903_v11 = vpop.f32.mrf.mxu0 }
 0x345   : > { %5345 = vmatmul.bf16.gmra.mxu1 %v9125_v45  ;;  %v5422_v12 = vadd.f32 %v8705_v6, %v5386_v31 }
 0x347   : > { %v5454_v16 = vmax.f32 %v5422_v12, 0.0 }
 0x34a   : > { %v5308_v61 = vpop.f32.mrf.mxu1 }
 0x34b   : > { %v5387_v37 = vadd.f32 %v5308_v61, %v8494_v48 }
 0x34d   : > { %v5423_v2 = vadd.f32 %v8705_v6, %v5387_v37 }
 0x34f   : > { %v5455_v22 = vmax.f32 %v5423_v2, 0.0  ;;  %6585 = vmatmul.msk.bf16.gmra.mxu2 %vm561_vm0, %v9128_v23 }
 0x351   : > { %v5486_v57 = vpack.c.bf16 %v5455_v22, %v5454_v16  ;;  %v4906_v16 = vpop.f32.mrf.mxu0  ;;  %v9129_v22 = vld [vmem:[#allocation19_spill] sm:$0xff] }
 0x352   : > { %v5311_v13 = vpop.f32.mrf.mxu1 }
 0x353   : > { %5727 = vmatmul.bf16.vlgmr.msra.gmra.mxu3 %v5486_v57  ;;  %v5388_v18 = vadd.f32 %v5311_v13, %v8514_v20  ;;  %v9130_v57 = vld [vmem:[#allocation8_spill] sm:$0xff] }
 0x355   : > { %5350 = vmatmul.bf16.gmra.mxu1 %v9127_v27  ;;  %v5424_v31 = vadd.f32 %v8705_v6, %v5388_v18 }
 0x357   : > { %v5456_v61 = vmax.f32 %v5424_v31, 0.0 }
 0x359   : > { %v4908_v23 = vpop.f32.mrf.mxu0 }
 0x35a   : > { %v5313_v45 = vpop.f32.mrf.mxu1 }
 0x35b   : > { %v5389_v48 = vadd.f32 %v5313_v45, %v8523_v26 }
 0x35d   : > { %v5425_v7 = vadd.f32 %v8705_v6, %v5389_v48 }
 0x35f   : > { %v5457_v12 = vmax.f32 %v5425_v7, 0.0  ;;  %6586 = vmatmul.msk.bf16.gmra.mxu2 %vm561_vm0, %v9130_v57 }
 0x361   : > { %v5487_v37 = vpack.c.bf16 %v5457_v12, %v5456_v61  ;;  %v9131_v61 = vld [vmem:[#allocation35_spill] sm:$0xff]  ;;  %v4911_v12 = vpop.f32.mrf.mxu0 }
 0x362   : > { %v5316_v2 = vpop.f32.mrf.mxu1 }
 0x363   : > { %5732 = vmatmul.bf16.gmra.mxu3 %v5487_v37  ;;  %v5390_v20 = vadd.f32 %v5316_v2, %v8538_v17  ;;  %v9132_v37 = vld [vmem:[#allocation9_spill] sm:$0xff] }
 0x365   : > { %5355 = vmatmul.bf16.gmra.mxu1 %v9129_v22  ;;  %v5426_v27 = vadd.f32 %v8705_v6, %v5390_v20 }
 0x367   : > { %v5458_v45 = vmax.f32 %v5426_v27, 0.0 }
 0x36a   : > { %v5318_v13 = vpop.f32.mrf.mxu1 }
 0x36b   : > { %v5391_v26 = vadd.f32 %v5318_v13, %v8547_v1 }
 0x36d   : > { %v5427_v18 = vadd.f32 %v8705_v6, %v5391_v26  ;;  %v4913_v26 = vpop.f32.mrf.mxu0 }
 0x36f   : > { %v5459_v31 = vmax.f32 %v5427_v18, 0.0  ;;  %6587 = vmatmul.msk.bf16.gmra.mxu2 %vm561_vm0, %v9132_v37 }
 0x371   : > { %v5488_v48 = vpack.c.bf16 %v5459_v31, %v5458_v45  ;;  %v3975_v45 = vadd.f32 %v8367_v63, %v8402_v38  ;;  %v9133_v31 = vld [vmem:[#allocation25_spill] sm:$0xff] }
 0x372   : > { %v5321_v7 = vpop.f32.mrf.mxu1 }
 0x373   : > { %5737 = vmatmul.bf16.gmra.mxu3 %v5488_v48  ;;  %v5392_v17 = vadd.f32 %v5321_v7, %v8568_v53  ;;  %v4969_v53 = vadd.f32 %v4901_v34, %v8384_v32  ;;  %v9134_v48 = vld [vmem:[#allocation40_spill] sm:$0xff]  ;;  %v3977_v34 = vadd.f32 %v8431_v5, %v8454_v10 }
 0x374   : > { %v4289_v7 = vadd.f32 %v9134_v48, %v3975_v45 }
 0x375   : > { %5360 = vmatmul.bf16.gmra.mxu1 %v9131_v61  ;;  %v5428_v22 = vadd.f32 %v8705_v6, %v5392_v17  ;;  %v9135_v17 = vld [vmem:[#allocation10_spill] sm:$0xff] }
 0x377   : > { %v5460_v57 = vmax.f32 %v5428_v22, 0.0 }
 0x37a   : > { %v5323_v2 = vpop.f32.mrf.mxu1 }
 0x37b   : > { %v5393_v1 = vadd.f32 %v5323_v2, %v8577_v15  ;;  %v4970_v15 = vadd.f32 %v4903_v11, %v4289_v7 }
 0x37d   : > { %v5429_v20 = vadd.f32 %v8705_v6, %v5393_v1  ;;  %v4916_v1 = vpop.f32.mrf.mxu0 }
 0x37e   : > { %v4975_v39 = vadd.f32 %v4916_v1, %v8511_v59 }
 0x37f   : > { %v5461_v13 = vmax.f32 %v5429_v20, 0.0  ;;  %6588 = vmatmul.msk.bf16.gmra.mxu2 %vm561_vm0, %v9135_v17 }
 0x381   : > { %v5489_v27 = vpack.c.bf16 %v5461_v13, %v5460_v57  ;;  %v4971_v13 = vadd.f32 %v4906_v16, %v8445_v41 }
 0x382   : > { %v5326_v18 = vpop.f32.mrf.mxu1 }
 0x383   : > { %5742 = vmatmul.bf16.gmra.mxu3 %v5489_v27  ;;  %v5394_v61 = vadd.f32 %v5326_v18, %v4969_v53  ;;  %v9136_v27 = vld [vmem:[#allocation26_spill] sm:$0xff]  ;;  %v9137_v18 = vld [vmem:[#allocation28_spill] sm:$0xff] }
 0x384   : > { %v4291_v45 = vadd.f32 %v9137_v18, %v3977_v34  ;;  %v8758_v34 = vpop.f32.mrf.mxu2 }
 0x385   : > { %5365 = vmatmul.bf16.gmra.mxu1 %v9133_v31  ;;  %v5430_v2 = vadd.f32 %v8705_v6, %v5394_v61  ;;  %v4918_v11 = vpop.f32.mrf.mxu0  ;;  %v9138_v31 = vld [vmem:[#allocation11_spill] sm:$0xff] }
 0x386   : > { %v4972_v48 = vadd.f32 %v4908_v23, %v4291_v45  ;;  %v4973_v23 = vadd.f32 %v4911_v12, %v8479_v60 }
 0x387   : > { %v5462_v63 = vmax.f32 %v5430_v2, 0.0  ;;  %v5164_v2 = vrot.slane %v8625_v58, 5 }
 0x38a   : > { %v5328_v37 = vpop.f32.mrf.mxu1 }
 0x38b   : > { %v5395_v22 = vadd.f32 %v5328_v37, %v4970_v15 }
 0x38d   : > { %v5431_v20 = vadd.f32 %v8705_v6, %v5395_v22  ;;  %v4921_v37 = vpop.f32.mrf.mxu0  ;;  %v3979_v22 = vadd.f32 %v8476_v21, %v8487_v33 }
 0x38f   : > { %v5463_v38 = vmax.f32 %v5431_v20, 0.0  ;;  %6589 = vmatmul.msk.bf16.gmra.mxu2 %vm561_vm0, %v9138_v31  ;;  %v5008_v20 = vld [vmem:[#allocation2 + $0xcc] sm:$0xe] }
 0x391   : > { %v5490_v57 = vpack.c.bf16 %v5463_v38, %v5462_v63  ;;  %v6516_v63 = vrot.slane %v5008_v20, 9  ;;  %v5166_v38 = vrot.slane %v5164_v2, 4 }
 0x392   : > { %v5331_v32 = vpop.f32.mrf.mxu1 }
 0x393   : > { %5747 = vmatmul.bf16.gmra.mxu3 %v5490_v57  ;;  %v5396_v53 = vadd.f32 %v5331_v32, %v4971_v13  ;;  %v5167_v57 = vrot.slane %v8636_v40, 5  ;;  %v4293_v32 = vadd.f32 %v8484_v43, %v3979_v22  ;;  %v5165_v60 = vsel %vm7006_vm9, %v6516_v63, %v5164_v2 }
 0x394   : > { %v5215_v18 = vunpack.c.l.b16 %v5165_v60 }
 0x395   : > { %5370 = vmatmul.bf16.gmra.mxu1 %v9136_v27  ;;  %v5432_v61 = vadd.f32 %v8705_v6, %v5396_v53  ;;  %v9139_v27 = vld [vmem:[#allocation12_spill] sm:$0xff]  ;;  %v4974_v58 = vadd.f32 %v4913_v26, %v4293_v32  ;;  %v4923_v21 = vpop.f32.mrf.mxu0  ;;  %v4977_v32 = vadd.f32 %v4921_v37, %v8535_v14 }
 0x397   : > { %v5464_v5 = vmax.f32 %v5432_v61, 0.0 }
 0x39a   : > { %v5333_v7 = vpop.f32.mrf.mxu1 }
 0x39b   : > { %v5397_v17 = vadd.f32 %v5333_v7, %v4972_v48  ;;  %v5591_v48 = vpop.f32.mrf.mxu2 }
 0x39d   : > { %v5433_v15 = vadd.f32 %v8705_v6, %v5397_v17  ;;  %v3981_v17 = vadd.f32 %v8501_v47, %v8519_v52 }
 0x39f   : > { %v5465_v10 = vmax.f32 %v5433_v15, 0.0  ;;  %6590 = vmatmul.msk.bf16.gmra.mxu2 %vm561_vm0, %v9139_v27  ;;  %v4926_v15 = vpop.f32.mrf.mxu0 }
 0x3a1   : > { %v5491_v41 = vpack.c.bf16 %v5465_v10, %v5464_v5  ;;  %v4295_v5 = vadd.f32 %v8516_v28, %v3981_v17  ;;  %v3983_v28 = vadd.f32 %v8530_v30, %v8543_v56  ;;  %v8786_v30 = vpop.f32.mrf.mxu3 }
 0x3a2   : > { %v5336_v16 = vpop.f32.mrf.mxu1 }
 0x3a3   : > { %5752 = vmatmul.bf16.gmra.mxu3 %v5491_v41  ;;  %v5398_v13 = vadd.f32 %v5336_v16, %v4973_v23  ;;  %v5593_v41 = vpop.f32.mrf.mxu2  ;;  %v9140_v16 = vld [vmem:[#allocation13_spill] sm:$0xff]  ;;  %v4976_v2 = vadd.f32 %v4918_v11, %v4295_v5  ;;  %v4297_v11 = vadd.f32 %v8540_v49, %v3983_v28  ;;  %v9142_v5 = vld [vmem:[#allocation15_spill] sm:$0xff] }
 0x3a5   : > { %5375 = vmatmul.bf16.gmra.mxu1 %v8676_v44  ;;  %v5168_v44 = vsel %vm7006_vm9, %v5166_v38, %v5167_v57  ;;  %v5434_v12 = vadd.f32 %v8705_v6, %v5398_v13  ;;  %v4978_v60 = vadd.f32 %v4923_v21, %v4297_v11  ;;  %v4979_v21 = vadd.f32 %v4926_v15, %v8565_v51  ;;  %v9145_v11 = vld [vmem:[#allocation31_spill] sm:$0xff] }
 0x3a6   : > { %v5216_v45 = vunpack.c.l.b16 %v5168_v44 }
 0x3a7   : > { %v5466_v53 = vmax.f32 %v5434_v12, 0.0  ;;  %v4928_v47 = vpop.f32.mrf.mxu0 }
 0x3a8   : > { %v5232_v26 = vpack.c.b16 %v5216_v45, %v5215_v18 }
 0x3aa   : > { %v5338_v33 = vpop.f32.mrf.mxu1 }
 0x3ab   : > { %v5399_v40 = vadd.f32 %v5338_v33, %v4974_v58  ;;  %v5596_v57 = vpop.f32.mrf.mxu2  ;;  %v9141_v33 = vld [vmem:[#allocation14_spill] sm:$0xff] }
 0x3ad   : > { %v5435_v43 = vadd.f32 %v8705_v6, %v5399_v40 }
 0x3af   : > { %v5467_v31 = vmax.f32 %v5435_v43, 0.0  ;;  %6591 = vmatmul.msk.bf16.gmra.mxu2 %vm561_vm0, %v9140_v16  ;;  %v4931_v58 = vpop.f32.mrf.mxu0 }
 0x3b1   : > { %v5492_v7 = vpack.c.bf16 %v5467_v31, %v5466_v53  ;;  %v3985_v53 = vadd.f32 %v8554_v62, %v8573_v36  ;;  %v8796_v31 = vld [vmem:[%s8987_s7] ss:$0 sm:$0xff] }
 0x3b2   : > { %v5341_v61 = vpop.f32.mrf.mxu1 }
 0x3b3   : > { %5757 = vmatmul.bf16.gmra.mxu3 %v5492_v7  ;;  %v5400_v10 = vadd.f32 %v5341_v61, %v4975_v39  ;;  %v8780_v27 = vpop.f32.mrf.mxu2 }
 0x3b5   : > { %5380 = vmatmul.bf16.gmra.mxu1 %v5232_v26  ;;  %v5436_v20 = vadd.f32 %v8705_v6, %v5400_v10  ;;  %v4299_v26 = vadd.f32 %v8570_v25, %v3985_v53 }
 0x3b7   : > { %v5468_v52 = vmax.f32 %v5436_v20, 0.0  ;;  %v4933_v18 = vpop.f32.mrf.mxu0  ;;  %v4980_v10 = vadd.f32 %v4928_v47, %v4299_v26 }
 0x3ba   : > { %v5343_v22 = vpop.f32.mrf.mxu1 }
 0x3bb   : > { %v5401_v23 = vadd.f32 %v5343_v22, %v4976_v2  ;;  %v8788_v37 = vpop.f32.mrf.mxu2 }
 0x3bd   : > { %v5437_v63 = vadd.f32 %v8705_v6, %v5401_v23 }
 0x3bf   : > { %v5469_v38 = vmax.f32 %v5437_v63, 0.0  ;;  %6592 = vmatmul.msk.bf16.gmra.mxu2 %vm561_vm0, %v9141_v33  ;;  %v4936_v15 = vpop.f32.mrf.mxu0 }
 0x3c1   : > { %v5493_v59 = vpack.c.bf16 %v5469_v38, %v5468_v52 }
 0x3c2   : > { %v5346_v1 = vpop.f32.mrf.mxu1 }
 0x3c3   : > { %5762 = vmatmul.bf16.gmra.mxu3 %v5493_v59  ;;  %v5402_v13 = vadd.f32 %v5346_v1, %v4977_v32  ;;  %v8799_v39 = vpop.f32.mrf.mxu2  ;;  %v9143_v59 = vld [vmem:[#allocation37_spill] sm:$0xff] }
 0x3c4   : > { %v9144_v1 = vld [vmem:[#allocation29_spill] sm:$0xff] }
 0x3c5   : > { %v5438_v12 = vadd.f32 %v8705_v6, %v5402_v13  ;;  %v3987_v28 = vadd.f32 %v9144_v1, %v9143_v59  ;;  %v4981_v13 = vadd.f32 %v4931_v58, %v9145_v11  ;;  %v9152_v59 = vld [vmem:[#allocation17_spill] sm:$0xff] }
 0x3c7   : > { %v5470_v56 = vmax.f32 %v5438_v12, 0.0  ;;  %v4938_v33 = vpop.f32.mrf.mxu0 }
 0x3ca   : > { %v5348_v44 = vpop.f32.mrf.mxu1 }
 0x3cb   : > { %v5403_v40 = vadd.f32 %v5348_v44, %v4978_v60  ;;  %v8815_v63 = vpop.f32.mrf.mxu2  ;;  %v9146_v44 = vld [vmem:[#allocation34_spill] sm:$0xff] }
 0x3cd   : > { %v5439_v43 = vadd.f32 %v8705_v6, %v5403_v40 }
 0x3cf   : > { %v5471_v14 = vmax.f32 %v5439_v43, 0.0  ;;  %6593 = vmatmul.msk.bf16.gmra.mxu2 %vm561_vm0, %v9142_v5 }
 0x3d1   : > { %v5494_v49 = vpack.c.bf16 %v5471_v14, %v5470_v56  ;;  %v9147_v56 = vld [vmem:[#allocation16_spill] sm:$0xff] }
 0x3d2   : > { %v5351_v45 = vpop.f32.mrf.mxu1 }
 0x3d3   : > { %5767 = vmatmul.bf16.gmra.mxu3 %v5494_v49  ;;  %v5404_v61 = vadd.f32 %v5351_v45, %v4979_v21  ;;  %v8824_v43 = vpop.f32.mrf.mxu2 }
 0x3d5   : > { %v5440_v25 = vadd.f32 %v8705_v6, %v5404_v61 }
 0x3d6   : > { %v5728_v7 = vpop.f32.mrf.mxu3 }
 0x3d7   : > { %v5729_v17 = vadd.f32 %v5728_v7, %v5591_v48  ;;  %v5472_v22 = vmax.f32 %v5440_v25, 0.0  ;;  %v9148_v25 = vld [vmem:[#allocation21_spill] sm:$0xff] }
 0x3d9   : > { %v5812_v62 = vadd.f32 %v8796_v31, %v5729_v17 }
 0x3da   : > { %v5353_v51 = vpop.f32.mrf.mxu1 }
 0x3db   : > { %v5844_v36 = vmax.f32 %v5812_v62, 0.0  ;;  %v5405_v48 = vadd.f32 %v5353_v51, %v4980_v10  ;;  %v8834_v5 = vpop.f32.mrf.mxu2 }
 0x3dd   : > { %5877 = vst.msk [vmem:[%s8809_s30] sm:$0xff] %vm5876_vm15, %v5844_v36  ;;  %v5441_v16 = vadd.f32 %v8705_v6, %v5405_v48  ;;  %v9149_v36 = vld [vmem:[#allocation38_spill] sm:$0xff] }
 0x3de   : > { %v5730_v2 = vpop.f32.mrf.mxu3  ;;  %v3989_v48 = vadd.f32 %v9149_v36, %v9148_v25 }
 0x3df   : > { %v5473_v20 = vmax.f32 %v5441_v16, 0.0  ;;  %v5731_v23 = vadd.f32 %v5730_v2, %v5593_v41  ;;  %v4301_v41 = vadd.f32 %v9146_v44, %v3987_v28  ;;  %6594 = vmatmul.msk.bf16.gmra.mxu2 %vm561_vm0, %v9147_v56  ;;  %v9150_v2 = vld [vmem:[#allocation39_spill] sm:$0xff] }
 0x3e1   : > { %v5813_v47 = vadd.f32 %v8796_v31, %v5731_v23  ;;  %v5495_v52 = vpack.c.bf16 %v5473_v20, %v5472_v22  ;;  %v4982_v14 = vadd.f32 %v4933_v18, %v4301_v41  ;;  %v4941_v18 = vpop.f32.mrf.mxu0  ;;  %v4983_v22 = vadd.f32 %v4936_v15, %v9150_v2  ;;  %v9151_v23 = vld [vmem:[#allocation41_spill] sm:$0xff] }
 0x3e2   : > { %v5356_v38 = vpop.f32.mrf.mxu1 }
 0x3e3   : > { %v5845_v32 = vmax.f32 %v5813_v47, 0.0  ;;  %5772 = vmatmul.bf16.gmra.mxu3 %v5495_v52  ;;  %v5406_v12 = vadd.f32 %v5356_v38, %v4981_v13  ;;  %v8844_v38 = vpop.f32.mrf.mxu2 }
 0x3e5   : > { %5878 = vst.msk [vmem:[%s8809_s30 + $0x8] sm:$0xff] %vm5876_vm15, %v5845_v32  ;;  %v5442_v53 = vadd.f32 %v8705_v6, %v5406_v12 }
 0x3e6   : > { %v5733_v60 = vpop.f32.mrf.mxu3 }
 0x3e7   : > { %v5734_v40 = vadd.f32 %v5733_v60, %v5596_v57  ;;  %v5474_v57 = vmax.f32 %v5442_v53, 0.0 }
 0x3e9   : > { %v5814_v49 = vadd.f32 %v8796_v31, %v5734_v40  ;;  %v4943_v32 = vpop.f32.mrf.mxu0 }
 0x3ea   : > { %v5358_v45 = vpop.f32.mrf.mxu1 }
 0x3eb   : > { %v5846_v58 = vmax.f32 %v5814_v49, 0.0  ;;  %v5407_v21 = vadd.f32 %v5358_v45, %v4982_v14  ;;  %v8854_v56 = vpop.f32.mrf.mxu2  ;;  %v3991_v45 = vadd.f32 %v8634_v8, %v8645_v19 }
 0x3ed   : > { %5879 = vst.msk [vmem:[%s8809_s30 + $0x10] sm:$0xff] %vm5876_vm15, %v5846_v58  ;;  %v5443_v7 = vadd.f32 %v8705_v6, %v5407_v21  ;;  %v4985_v21 = vadd.f32 %v4941_v18, %v8639_v50 }
 0x3ee   : > { %v5735_v26 = vpop.f32.mrf.mxu3 }
 0x3ef   : > { %v5475_v61 = vmax.f32 %v5443_v7, 0.0  ;;  %v5736_v17 = vadd.f32 %v5735_v26, %v8780_v27  ;;  %v4303_v27 = vadd.f32 %v9151_v23, %v3989_v48  ;;  %6595 = vmatmul.msk.bf16.gmra.mxu2 %vm561_vm0, %v9152_v59  ;;  %v3993_v23 = vadd.f32 %v8659_v0, %v8668_v9 }
 0x3f1   : > { %v5815_v10 = vadd.f32 %v8796_v31, %v5736_v17  ;;  %v5496_v62 = vpack.c.bf16 %v5475_v61, %v5474_v57  ;;  %v4984_v1 = vadd.f32 %v4938_v33, %v4303_v27  ;;  %v4946_v58 = vpop.f32.mrf.mxu0  ;;  %v9153_v17 = vld [vmem:[#allocation18_spill] sm:$0xff]  ;;  %v4307_v59 = vadd.f32 %v8665_v42, %v3993_v23 }
 0x3f2   : > { %v5361_v51 = vpop.f32.mrf.mxu1 }
 0x3f3   : > { %v5847_v16 = vmax.f32 %v5815_v10, 0.0  ;;  %5777 = vmatmul.bf16.gmra.mxu3 %v5496_v62  ;;  %v5408_v47 = vadd.f32 %v5361_v51, %v4983_v22  ;;  %v8864_v61 = vpop.f32.mrf.mxu2 }
 0x3f5   : > { %5880 = vst.msk [vmem:[%s8809_s30 + $0x18] sm:$0xff] %vm5876_vm15, %v5847_v16  ;;  %v5444_v15 = vadd.f32 %v8705_v6, %v5408_v47  ;;  %v4987_v47 = vadd.f32 %v4946_v58, %v8661_v35 }
 0x3f6   : > { %v5738_v20 = vpop.f32.mrf.mxu3 }
 0x3f7   : > { %v5739_v52 = vadd.f32 %v5738_v20, %v8788_v37  ;;  %v5476_v41 = vmax.f32 %v5444_v15, 0.0 }
 0x3f9   : > { %v5816_v28 = vadd.f32 %v8796_v31, %v5739_v52  ;;  %v4948_v51 = vpop.f32.mrf.mxu0 }
 0x3fa   : > { %v5363_v11 = vpop.f32.mrf.mxu1 }
 0x3fb   : > { %v5848_v13 = vmax.f32 %v5816_v28, 0.0  ;;  %v5409_v60 = vadd.f32 %v5363_v11, %v4984_v1  ;;  %v8874_v16 = vpop.f32.mrf.mxu2 }
 0x3fd   : > { %5881 = vst.msk [vmem:[%s8809_s30 + $0x20] sm:$0xff] %vm5876_vm15, %v5848_v13  ;;  %v5445_v44 = vadd.f32 %v8705_v6, %v5409_v60 }
 0x3fe   : > { %v5740_v37 = vpop.f32.mrf.mxu3 }
 0x3ff   : > { %v5477_v12 = vmax.f32 %v5445_v44, 0.0  ;;  %v5741_v40 = vadd.f32 %v5740_v37, %v8799_v39  ;;  %v4305_v39 = vadd.f32 %v8642_v24, %v3991_v45  ;;  %6596 = vmatmul.msk.bf16.gmra.mxu2 %vm561_vm0, %v9153_v17 }
 0x401   : > { %v5817_v33 = vadd.f32 %v8796_v31, %v5741_v40  ;;  %v5497_v14 = vpack.c.bf16 %v5477_v12, %v5476_v41  ;;  %v4986_v8 = vadd.f32 %v4943_v32, %v4305_v39  ;;  %v4951_v28 = vpop.f32.mrf.mxu0  ;;  %v4988_v32 = vadd.f32 %v4948_v51, %v4307_v59 }
 0x402   : > { %v5366_v49 = vpop.f32.mrf.mxu1  ;;  %v3997_v51 = vadd.f32 %v8758_v34, %v8698_v46 }
 0x403   : > { %v5849_v53 = vmax.f32 %v5817_v33, 0.0  ;;  %5782 = vmatmul.bf16.gmra.mxu3 %v5497_v14  ;;  %v5410_v26 = vadd.f32 %v5366_v49, %v4985_v21  ;;  %v8885_v13 = vpop.f32.mrf.mxu2  ;;  %v3995_v14 = vadd.f32 %v8684_v55, %v8687_v3 }
 0x405   : > { %5882 = vst.msk [vmem:[%s8809_s30 + $0x28] sm:$0xff] %vm5876_vm15, %v5849_v53  ;;  %v5446_v62 = vadd.f32 %v8705_v6, %v5410_v26  ;;  %v4989_v53 = vadd.f32 %v4951_v28, %v8680_v29  ;;  %v4309_v21 = vadd.f32 %v8689_v4, %v3995_v14 }
 0x406   : > { %v5743_v7 = vpop.f32.mrf.mxu3 }
 0x407   : > { %v5744_v57 = vadd.f32 %v5743_v7, %v8815_v63  ;;  %v5478_v25 = vmax.f32 %v5446_v62, 0.0 }
 0x409   : > { %v5818_v19 = vadd.f32 %v8796_v31, %v5744_v57  ;;  %v4953_v40 = vpop.f32.mrf.mxu0 }
 0x40a   : > { %v5368_v10 = vpop.f32.mrf.mxu1  ;;  %v4990_v39 = vadd.f32 %v4953_v40, %v4309_v21 }
 0x40b   : > { %v5850_v50 = vmax.f32 %v5818_v19, 0.0  ;;  %v5411_v18 = vadd.f32 %v5368_v10, %v4986_v8  ;;  %v5626_v45 = vpop.f32.mrf.mxu2 }
 0x40d   : > { %5883 = vst.msk [vmem:[%s8809_s30 + $0x30] sm:$0xff] %vm5876_vm15, %v5850_v50  ;;  %v5447_v24 = vadd.f32 %v8705_v6, %v5411_v18 }
 0x40e   : > { %v5745_v63 = vpop.f32.mrf.mxu3 }
 0x40f   : > { %v5479_v36 = vmax.f32 %v5447_v24, 0.0  ;;  %v5746_v48 = vadd.f32 %v5745_v63, %v8824_v43 }
 0x411   : > { %v5819_v2 = vadd.f32 %v8796_v31, %v5746_v48  ;;  %v5498_v22 = vpack.c.bf16 %v5479_v36, %v5478_v25  ;;  %v4956_v8 = vpop.f32.mrf.mxu0 }
 0x412   : > { %v5371_v20 = vpop.f32.mrf.mxu1  ;;  %v4991_v25 = vadd.f32 %v4956_v8, %v8693_v54 }
 0x413   : > { %v5851_v27 = vmax.f32 %v5819_v2, 0.0  ;;  %5787 = vmatmul.bf16.gmra.mxu3 %v5498_v22  ;;  %v5412_v43 = vadd.f32 %v5371_v20, %v4987_v47  ;;  %v5628_v10 = vpop.f32.mrf.mxu2  ;;  %v4311_v2 = vadd.f32 %v8786_v30, %v3997_v51 }
 0x415   : > { %5884 = vst.msk [vmem:[%s8809_s30 + $0x38] sm:$0xff] %vm5876_vm15, %v5851_v27  ;;  %v5448_v0 = vadd.f32 %v8705_v6, %v5412_v43 }
 0x416   : > { %v5748_v52 = vpop.f32.mrf.mxu3 }
 0x417   : > { %v5749_v1 = vadd.f32 %v5748_v52, %v8834_v5  ;;  %v5480_v44 = vmax.f32 %v5448_v0, 0.0 }
 0x419   : > { %v5820_v11 = vadd.f32 %v8796_v31, %v5749_v1  ;;  %v4958_v36 = vpop.f32.mrf.mxu0 }
 0x41a   : > { %v5373_v15 = vpop.f32.mrf.mxu1  ;;  %v4992_v23 = vadd.f32 %v4958_v36, %v4311_v2 }
 0x41b   : > { %v5852_v9 = vmax.f32 %v5820_v11, 0.0  ;;  %v5413_v60 = vadd.f32 %v5373_v15, %v4988_v32  ;;  %v5631_v20 = vpop.f32.mrf.mxu2 }
 0x41d   : > { %5885 = vst.msk [vmem:[%s8809_s30 + $0x40] sm:$0xff] %vm5876_vm15, %v5852_v9  ;;  %v5449_v35 = vadd.f32 %v8705_v6, %v5413_v60 }
 0x41e   : > { %v5750_v42 = vpop.f32.mrf.mxu3 }
 0x41f   : > { %v5481_v37 = vmax.f32 %v5449_v35, 0.0  ;;  %v5751_v5 = vadd.f32 %v5750_v42, %v8844_v38 }
 0x421   : > { %v5821_v41 = vadd.f32 %v8796_v31, %v5751_v5  ;;  %v5499_v12 = vpack.c.bf16 %v5481_v37, %v5480_v44 }
 0x422   : > { %v5376_v33 = vpop.f32.mrf.mxu1 }
 0x423   : > { %v5853_v49 = vmax.f32 %v5821_v41, 0.0  ;;  %5792 = vmatmul.bf16.gmra.mxu3 %v5499_v12  ;;  %v5414_v38 = vadd.f32 %v5376_v33, %v4989_v53  ;;  %v5633_v32 = vpop.f32.mrf.mxu2 }
 0x425   : > { %5886 = vst.msk [vmem:[%s8809_s30 + $0x48] sm:$0xff] %vm5876_vm15, %v5853_v49  ;;  %v5450_v55 = vadd.f32 %v8705_v6, %v5414_v38 }
 0x426   : > { %v5753_v58 = vpop.f32.mrf.mxu3 }
 0x427   : > { %v5754_v7 = vadd.f32 %v5753_v58, %v8854_v56  ;;  %v5482_v4 = vmax.f32 %v5450_v55, 0.0 }
 0x429   : > { %v5822_v26 = vadd.f32 %v8796_v31, %v5754_v7 }
 0x42a   : > { %v5378_v57 = vpop.f32.mrf.mxu1 }
 0x42b   : > { %v5854_v3 = vmax.f32 %v5822_v26, 0.0  ;;  %v5415_v17 = vadd.f32 %v5378_v57, %v4990_v39  ;;  %v5636_v60 = vpop.f32.mrf.mxu2 }
 0x42d   : > { %5887 = vst.msk [vmem:[%s8809_s30 + $0x50] sm:$0xff] %vm5876_vm15, %v5854_v3  ;;  %v5451_v29 = vadd.f32 %v8705_v6, %v5415_v17 }
 0x42e   : > { %v5755_v19 = vpop.f32.mrf.mxu3 }
 0x42f   : > { %v5483_v62 = vmax.f32 %v5451_v29, 0.0  ;;  %v5756_v56 = vadd.f32 %v5755_v19, %v8864_v61 }
 0x431   : > { %v5823_v50 = vadd.f32 %v8796_v31, %v5756_v56  ;;  %v5500_v18 = vpack.c.bf16 %v5483_v62, %v5482_v4 }
 0x432   : > { %v5381_v24 = vpop.f32.mrf.mxu1 }
 0x433   : > { %v5855_v63 = vmax.f32 %v5823_v50, 0.0  ;;  %5797 = vmatmul.bf16.gmra.mxu3 %v5500_v18  ;;  %v5416_v22 = vadd.f32 %v5381_v24, %v4991_v25  ;;  %v5638_v5 = vpop.f32.mrf.mxu2 }
 0x435   : > { %5888 = vst.msk [vmem:[%s8809_s30 + $0x58] sm:$0xff] %vm5876_vm15, %v5855_v63  ;;  %v5452_v34 = vadd.f32 %v8705_v6, %v5416_v22 }
 0x436   : > { %v5758_v48 = vpop.f32.mrf.mxu3 }
 0x437   : > { %v5759_v61 = vadd.f32 %v5758_v48, %v8874_v16  ;;  %v5484_v30 = vmax.f32 %v5452_v34, 0.0 }
 0x439   : > { %v5824_v27 = vadd.f32 %v8796_v31, %v5759_v61 }
 0x43a   : > { %v5383_v46 = vpop.f32.mrf.mxu1 }
 0x43b   : > { %v5856_v47 = vmax.f32 %v5824_v27, 0.0  ;;  %v5417_v52 = vadd.f32 %v5383_v46, %v4992_v23  ;;  %v5641_v49 = vpop.f32.mrf.mxu2 }
 0x43d   : > { %5889 = vst.msk [vmem:[%s8809_s30 + $0x60] sm:$0xff] %vm5876_vm15, %v5856_v47  ;;  %v5453_v54 = vadd.f32 %v8705_v6, %v5417_v52 }
 0x43e   : > { %v5760_v59 = vpop.f32.mrf.mxu3 }
 0x43f   : > { %v5485_v43 = vmax.f32 %v5453_v54, 0.0  ;;  %v5761_v16 = vadd.f32 %v5760_v59, %v8885_v13 }
 0x441   : > { %v5825_v1 = vadd.f32 %v8796_v31, %v5761_v16  ;;  %v5501_v28 = vpack.c.bf16 %v5485_v43, %v5484_v30 }
 0x443   : > { %v5857_v11 = vmax.f32 %v5825_v1, 0.0  ;;  %5802 = vmatmul.bf16.gmra.mxu3 %v5501_v28  ;;  %v5643_v7 = vpop.f32.mrf.mxu2 }
 0x445   : > { %5890 = vst.msk [vmem:[%s8809_s30 + $0x68] sm:$0xff] %vm5876_vm15, %v5857_v11 }
 0x446   : > { %v5763_v15 = vpop.f32.mrf.mxu3 }
 0x447   : > { %v5764_v0 = vadd.f32 %v5763_v15, %v5626_v45 }
 0x449   : > { %v5826_v6 = vadd.f32 %v8796_v31, %v5764_v0 }
 0x44b   : > { %v5858_v9 = vmax.f32 %v5826_v6, 0.0  ;;  %v5646_v17 = vpop.f32.mrf.mxu2 }
 0x44d   : > { %5891 = vst.msk [vmem:[%s8809_s30 + $0x70] sm:$0xff] %vm5876_vm15, %v5858_v9 }
 0x44e   : > { %v5765_v35 = vpop.f32.mrf.mxu3 }
 0x44f   : > { %v5766_v13 = vadd.f32 %v5765_v35, %v5628_v10 }
 0x451   : > { %v5827_v42 = vadd.f32 %v8796_v31, %v5766_v13 }
 0x453   : > { %v5859_v44 = vmax.f32 %v5827_v42, 0.0  ;;  %v5648_v62 = vpop.f32.mrf.mxu2 }
 0x455   : > { %5892 = vst.msk [vmem:[%s8809_s30 + $0x78] sm:$0xff] %vm5876_vm15, %v5859_v44 }
 0x456   : > { %v5768_v37 = vpop.f32.mrf.mxu3 }
 0x457   : > { %v5769_v41 = vadd.f32 %v5768_v37, %v5631_v20 }
 0x459   : > { %v5828_v12 = vadd.f32 %v8796_v31, %v5769_v41 }
 0x45b   : > { %v5860_v40 = vmax.f32 %v5828_v12, 0.0  ;;  %v5651_v63 = vpop.f32.mrf.mxu2 }
 0x45d   : > { %5893 = vst.msk [vmem:[%s8809_s30 + $0x80] sm:$0xff] %vm5876_vm15, %v5860_v40 }
 0x45e   : > { %v5770_v33 = vpop.f32.mrf.mxu3 }
 0x45f   : > { %v5771_v14 = vadd.f32 %v5770_v33, %v5633_v32 }
 0x461   : > { %v5829_v45 = vadd.f32 %v8796_v31, %v5771_v14 }
 0x463   : > { %v5861_v53 = vmax.f32 %v5829_v45, 0.0  ;;  %v5653_v61 = vpop.f32.mrf.mxu2 }
 0x465   : > { %5894 = vst.msk [vmem:[%s8809_s30 + $0x88] sm:$0xff] %vm5876_vm15, %v5861_v53 }
 0x466   : > { %v5773_v58 = vpop.f32.mrf.mxu3 }
 0x467   : > { %v5774_v21 = vadd.f32 %v5773_v58, %v5636_v60 }
 0x469   : > { %v5830_v38 = vadd.f32 %v8796_v31, %v5774_v21 }
 0x46b   : > { %v5862_v39 = vmax.f32 %v5830_v38, 0.0  ;;  %v5656_v47 = vpop.f32.mrf.mxu2 }
 0x46d   : > { %5895 = vst.msk [vmem:[%s8809_s30 + $0x90] sm:$0xff] %vm5876_vm15, %v5862_v39 }
 0x46e   : > { %v5775_v26 = vpop.f32.mrf.mxu3 }
 0x46f   : > { %v5776_v57 = vadd.f32 %v5775_v26, %v5638_v5 }
 0x471   : > { %v5831_v55 = vadd.f32 %v8796_v31, %v5776_v57 }
 0x473   : > { %v5863_v3 = vmax.f32 %v5831_v55, 0.0  ;;  %v5658_v43 = vpop.f32.mrf.mxu2 }
 0x475   : > { %5896 = vst.msk [vmem:[%s8809_s30 + $0x98] sm:$0xff] %vm5876_vm15, %v5863_v3 }
 0x476   : > { %v5778_v8 = vpop.f32.mrf.mxu3 }
 0x477   : > { %v5779_v29 = vadd.f32 %v5778_v8, %v5641_v49 }
 0x479   : > { %v5832_v19 = vadd.f32 %v8796_v31, %v5779_v29 }
 0x47b   : > { %v5864_v10 = vmax.f32 %v5832_v19, 0.0  ;;  %v5661_v0 = vpop.f32.mrf.mxu2 }
 0x47d   : > { %5897 = vst.msk [vmem:[%s8809_s30 + $0xa0] sm:$0xff] %vm5876_vm15, %v5864_v10 }
 0x47e   : > { %v5780_v4 = vpop.f32.mrf.mxu3 }
 0x47f   : > { %v5781_v56 = vadd.f32 %v5780_v4, %v5643_v7 }
 0x481   : > { %v5833_v50 = vadd.f32 %v8796_v31, %v5781_v56 }
 0x483   : > { %v5865_v18 = vmax.f32 %v5833_v50, 0.0  ;;  %v5663_v42 = vpop.f32.mrf.mxu2 }
 0x485   : > { %5898 = vst.msk [vmem:[%s8809_s30 + $0xa8] sm:$0xff] %vm5876_vm15, %v5865_v18 }
 0x486   : > { %v5783_v24 = vpop.f32.mrf.mxu3 }
 0x487   : > { %v5784_v51 = vadd.f32 %v5783_v24, %v5646_v17 }
 0x489   : > { %v5834_v25 = vadd.f32 %v8796_v31, %v5784_v51 }
 0x48b   : > { %v5866_v36 = vmax.f32 %v5834_v25, 0.0  ;;  %v5666_v40 = vpop.f32.mrf.mxu2 }
 0x48d   : > { %5899 = vst.msk [vmem:[%s8809_s30 + $0xb0] sm:$0xff] %vm5876_vm15, %v5866_v36 }
 0x48e   : > { %v5785_v48 = vpop.f32.mrf.mxu3 }
 0x48f   : > { %v5786_v2 = vadd.f32 %v5785_v48, %v5648_v62 }
 0x491   : > { %v5835_v22 = vadd.f32 %v8796_v31, %v5786_v2 }
 0x493   : > { %v5867_v20 = vmax.f32 %v5835_v22, 0.0  ;;  %v5668_v53 = vpop.f32.mrf.mxu2 }
 0x495   : > { %5900 = vst.msk [vmem:[%s8809_s30 + $0xb8] sm:$0xff] %vm5876_vm15, %v5867_v20 }
 0x496   : > { %v5788_v23 = vpop.f32.mrf.mxu3 }
 0x497   : > { %v5789_v27 = vadd.f32 %v5788_v23, %v5651_v63 }
 0x499   : > { %v5836_v46 = vadd.f32 %v8796_v31, %v5789_v27 }
 0x49b   : > { %v5868_v34 = vmax.f32 %v5836_v46, 0.0 }
 0x49d   : > { %5901 = vst.msk [vmem:[%s8809_s30 + $0xc0] sm:$0xff] %vm5876_vm15, %v5868_v34 }
 0x49e   : > { %v5790_v52 = vpop.f32.mrf.mxu3 }
 0x49f   : > { %v5791_v54 = vadd.f32 %v5790_v52, %v5653_v61 }
 0x4a1   : > { %v5837_v59 = vadd.f32 %v8796_v31, %v5791_v54 }
 0x4a3   : > { %v5869_v30 = vmax.f32 %v5837_v59, 0.0 }
 0x4a5   : > { %5902 = vst.msk [vmem:[%s8809_s30 + $0xc8] sm:$0xff] %vm5876_vm15, %v5869_v30 }
 0x4a6   : > { %v5793_v16 = vpop.f32.mrf.mxu3 }
 0x4a7   : > { %v5794_v1 = vadd.f32 %v5793_v16, %v5656_v47 }
 0x4a9   : > { %v5838_v28 = vadd.f32 %v8796_v31, %v5794_v1 }
 0x4ab   : > { %v5870_v32 = vmax.f32 %v5838_v28, 0.0 }
 0x4ad   : > { %5903 = vst.msk [vmem:[%s8809_s30 + $0xd0] sm:$0xff] %vm5876_vm15, %v5870_v32 }
 0x4ae   : > { %v5795_v11 = vpop.f32.mrf.mxu3 }
 0x4af   : > { %v5796_v15 = vadd.f32 %v5795_v11, %v5658_v43 }
 0x4b1   : > { %v5839_v6 = vadd.f32 %v8796_v31, %v5796_v15 }
 0x4b3   : > { %v5871_v9 = vmax.f32 %v5839_v6, 0.0 }
 0x4b5   : > { %5904 = vst.msk [vmem:[%s8809_s30 + $0xd8] sm:$0xff] %vm5876_vm15, %v5871_v9 }
 0x4b6   : > { %v5798_v60 = vpop.f32.mrf.mxu3 }
 0x4b7   : > { %v5799_v35 = vadd.f32 %v5798_v60, %v5661_v0 }
 0x4b9   : > { %v5840_v13 = vadd.f32 %v8796_v31, %v5799_v35 }
 0x4bb   : > { %v5872_v44 = vmax.f32 %v5840_v13, 0.0 }
 0x4bd   : > { %5905 = vst.msk [vmem:[%s8809_s30 + $0xe0] sm:$0xff] %vm5876_vm15, %v5872_v44 }
 0x4be   : > { %v5800_v37 = vpop.f32.mrf.mxu3 }
 0x4bf   : > { %v5801_v5 = vadd.f32 %v5800_v37, %v5663_v42 }
 0x4c1   : > { %v5841_v41 = vadd.f32 %v8796_v31, %v5801_v5 }
 0x4c3   : > { %v5873_v12 = vmax.f32 %v5841_v41, 0.0 }
 0x4c5   : > { %5906 = vst.msk [vmem:[%s8809_s30 + $0xe8] sm:$0xff] %vm5876_vm15, %v5873_v12 }
 0x4c6   : > { %v5803_v33 = vpop.f32.mrf.mxu3 }
 0x4c7   : > { %v5804_v14 = vadd.f32 %v5803_v33, %v5666_v40 }
 0x4c9   : > { %v5842_v49 = vadd.f32 %v8796_v31, %v5804_v14 }
 0x4cb   : > { %v5874_v45 = vmax.f32 %v5842_v49, 0.0 }
 0x4cd   : > { %5907 = vst.msk [vmem:[%s8809_s30 + $0xf0] sm:$0xff] %vm5876_vm15, %v5874_v45 }
 0x4ce   : > { %v5805_v58 = vpop.f32.mrf.mxu3 }
 0x4cf   : > { %v5806_v21 = vadd.f32 %v5805_v58, %v5668_v53 }
 0x4d1   : > { %v5843_v38 = vadd.f32 %v8796_v31, %v5806_v21 }
 0x4d3   : > { %v5875_v7 = vmax.f32 %v5843_v38, 0.0 }
 0x4d5   : > { %5908 = vst.msk [vmem:[%s8809_s30 + $0xf8] sm:$0xff] %vm5876_vm15, %v5875_v7 }
 0x4d6 PF: > { %s18_s27 = sadd.s32 1, %s6798_s27  }
 0x4d7   : > { %p15_p4 = scmp.ge.s32.totalorder %s18_s27, 4  }
 0x4d9   :  { %17 = sbr.rel (!%p15_p4) target bundleno = 1 (0x1), region = 85 }

</bundles_post_ra>
